<compile_context>
chip_gen: v7x
topology: tpu7x:2x2x1
jax: 0.10.0
libtpu: 0.0.40
codegen_flags: <defaults>
</compile_context>

<pallas_src>
import functools

import jax
import jax.numpy as jnp
from jax.experimental import pallas as pl
from jax.experimental.pallas import tpu as pltpu

H_IN = 768           # hidden size of the backbone
D1 = 768             # dense  output
D2 = 512             # dense2 output
NCLS = 2             # cls_header output
NPAD = 128           # lane-dense padding for the final projection
TM_CAP = 512         # batch-tile cap (see header comment)


def _round_up(x, m):
    return ((x + m - 1) // m) * m


def init_params(key):
    """nn.Linear-style init (uniform +/- 1/sqrt(fan_in)).

    Weights stored [in, out] (transposed vs. PyTorch) so kernel computes x @ W + b.
    """
    def linear(k, fan_in, fan_out):
        kw, kb = jax.random.split(k)
        bound = 1.0 / jnp.sqrt(fan_in)
        w = jax.random.uniform(kw, (fan_in, fan_out), jnp.float32, -bound, bound)
        b = jax.random.uniform(kb, (1, fan_out), jnp.float32, -bound, bound)
        return w, b

    k1, k2, k3 = jax.random.split(key, 3)
    w1, b1 = linear(k1, 2 * H_IN, D1)
    w2, b2 = linear(k2, D1, D2)
    w3, b3 = linear(k3, D2, NCLS)
    return (w1, b1, w2, b2, w3, b3)


def prepare_params(params):
    """One-time weight prep, hoisted out of the forward pass.

    Splits w1 into its two 768-row halves (split-K, no concat in the kernel),
    casts matmul weights to bf16, and zero-pads the final projection from
    2 -> 128 output lanes so the kernel's store is lane-dense.
    """
    w1, b1, w2, b2, w3, b3 = params
    w1a = w1[:H_IN].astype(jnp.bfloat16)                                   # [768, 768]
    w1b = w1[H_IN:].astype(jnp.bfloat16)                                   # [768, 768]
    w2b = w2.astype(jnp.bfloat16)                                          # [768, 512]
    w3p = jnp.pad(w3, ((0, 0), (0, NPAD - NCLS))).astype(jnp.bfloat16)     # [512, 128]
    b3p = jnp.pad(b3, ((0, 0), (0, NPAD - NCLS)))                          # [1, 128] f32
    return (w1a, w1b, b1, w2b, b2, w3p, b3p)


def _make_kernel(n1, n2):
    inv1 = 1.0 / n1
    inv2 = 1.0 / n2

    def kernel(hs_ref, w1a_ref, w1b_ref, b1_ref,
               w2_ref, b2_ref, w3_ref, b3_ref, o_ref):
        # hs_ref: [tm, n1+n2, 768] f32 — selected positions for this batch tile.
        hs = hs_ref[...]

        # Fused pooling: f32 mean over each (static) position group, then bf16
        # cast for the MXU.
        t1 = (jnp.sum(hs[:, :n1, :], axis=1) * inv1).astype(jnp.bfloat16)
        t2 = (jnp.sum(hs[:, n1:, :], axis=1) * inv2).astype(jnp.bfloat16)

        # dense (split-K over the two pooled halves) + tanh, f32 accumulate.
        h1 = (jnp.dot(t1, w1a_ref[...], preferred_element_type=jnp.float32)
              + jnp.dot(t2, w1b_ref[...], preferred_element_type=jnp.float32)
              + b1_ref[...])
        h1 = jnp.tanh(h1)

        # dense2 + relu
        h2 = jnp.dot(h1.astype(jnp.bfloat16), w2_ref[...],
                     preferred_element_type=jnp.float32) + b2_ref[...]
        h2 = jnp.maximum(h2, 0.0)

        # cls_header, lane-dense padded 2 -> 128 outputs, stored as bf16.
        logits = jnp.dot(h2.astype(jnp.bfloat16), w3_ref[...],
                         preferred_element_type=jnp.float32) + b3_ref[...]
        o_ref[...] = logits.astype(o_ref.dtype)

    return kernel


@functools.partial(jax.jit, static_argnames=("pos1", "pos2"))
def cls_shot_head_forward(hidden_states, prepared, pos1=(0,), pos2=(0,)):
    """hidden_states: [B, S, 768] f32.  prepared: output of prepare_params().

    pos1 / pos2 are static Python tuples (changing them retraces/recompiles).
    Returns [B, 2] f32 logits.
    """
    w1a, w1b, b1, w2b, b2, w3p, b3p = prepared
    pos1 = tuple(int(p) for p in pos1)
    pos2 = tuple(int(p) for p in pos2)
    n1, n2 = len(pos1), len(pos2)
    npos = n1 + n2
    p_all = jnp.asarray(pos1 + pos2, dtype=jnp.int32)

    B = hidden_states.shape[0]
    # Tiny static position gather; mean + bf16 cast happen inside the kernel.
    hs_sel = jnp.take(hidden_states, p_all, axis=1).astype(jnp.float32)  # [B, npos, H]

    tm = min(TM_CAP, _round_up(B, 16))      # multiple of 16: dense bf16 sublanes
    b_pad = _round_up(B, tm)
    if b_pad != B:
        hs_sel = jnp.pad(hs_sel, ((0, b_pad - B), (0, 0), (0, 0)))

    grid = (b_pad // tm,)

    def const_spec(shape):
        return pl.BlockSpec(shape, lambda i: (0, 0))

    out = pl.pallas_call(
        _make_kernel(n1, n2),
        out_shape=jax.ShapeDtypeStruct((b_pad, NPAD), jnp.bfloat16),
        grid=grid,
        in_specs=[
            pl.BlockSpec((tm, npos, H_IN), lambda i: (i, 0, 0)),  # selected hidden
            const_spec((H_IN, D1)),      # w1a (VMEM-resident)
            const_spec((H_IN, D1)),      # w1b
            const_spec((1, D1)),         # b1
            const_spec((D1, D2)),        # w2
            const_spec((1, D2)),         # b2
            const_spec((D2, NPAD)),      # w3 (padded)
            const_spec((1, NPAD)),       # b3 (padded)
        ],
        out_specs=pl.BlockSpec((tm, NPAD), lambda i: (i, 0)),
        compiler_params=pltpu.CompilerParams(
            dimension_semantics=("parallel",)),
    )(hs_sel, w1a, w1b, b1, w2b, b2, w3p, b3p)

    return out[:B, :NCLS].astype(jnp.float32)


def _reference(hidden_states, params, pos1=(0,), pos2=(0,)):
    """Pure-JAX reference mirroring the kernel's bf16/f32 mixed-precision math."""
    w1, b1, w2, b2, w3, b3 = params
    p1 = jnp.asarray(pos1, dtype=jnp.int32)
    p2 = jnp.asarray(pos2, dtype=jnp.int32)
    t1 = jnp.take(hidden_states, p1, axis=1).mean(axis=1).astype(jnp.bfloat16)
    t2 = jnp.take(hidden_states, p2, axis=1).mean(axis=1).astype(jnp.bfloat16)
    w1a = w1[:H_IN].astype(jnp.bfloat16)
    w1b = w1[H_IN:].astype(jnp.bfloat16)
    h1 = jnp.tanh(jnp.dot(t1, w1a, preferred_element_type=jnp.float32)
                  + jnp.dot(t2, w1b, preferred_element_type=jnp.float32) + b1)
    h2 = jax.nn.relu(jnp.dot(h1.astype(jnp.bfloat16), w2.astype(jnp.bfloat16),
                             preferred_element_type=jnp.float32) + b2)
    logits = jnp.dot(h2.astype(jnp.bfloat16), w3.astype(jnp.bfloat16),
                     preferred_element_type=jnp.float32) + b3
    # Kernel stores the logits slab in bf16; mirror that quantization.
    return logits.astype(jnp.bfloat16).astype(jnp.float32)


if __name__ == "__main__":
    key = jax.random.PRNGKey(0)
    k_param, k_x = jax.random.split(key)
    params = init_params(k_param)
    prepared = prepare_params(params)          # one-time weight prep (hoisted)

    B, S = 2, 8
    hidden_states = jax.random.normal(k_x, (B, S, H_IN), dtype=jnp.float32)

    out = cls_shot_head_forward(hidden_states, prepared, pos1=(0,), pos2=(0,))
    out = jax.block_until_ready(out)

    ref = _reference(hidden_states, params, pos1=(0,), pos2=(0,))
    assert out.shape == (B, NCLS)
    assert jnp.allclose(out, ref, atol=2e-3, rtol=2e-3), (out, ref)
    print("KERNEL_OK")
</pallas_src>

<mosaic_0001>
module attributes {stable_mosaic.version = 11 : i64} {
  func.func @kernel(%arg0: i32, %arg1: memref<16x2x768xf32, #tpu.memory_space<vmem>>, %arg2: memref<768x768xbf16, #tpu.memory_space<vmem>>, %arg3: memref<768x768xbf16, #tpu.memory_space<vmem>>, %arg4: memref<1x768xf32, #tpu.memory_space<vmem>>, %arg5: memref<768x512xbf16, #tpu.memory_space<vmem>>, %arg6: memref<1x512xf32, #tpu.memory_space<vmem>>, %arg7: memref<512x128xbf16, #tpu.memory_space<vmem>>, %arg8: memref<1x128xf32, #tpu.memory_space<vmem>>, %arg9: memref<16x128xbf16, #tpu.memory_space<vmem>>) attributes {dimension_semantics = [#tpu.dimension_semantics<parallel>], iteration_bounds = array<i64: 1>, scalar_prefetch = 0 : i64, scratch_operands = 0 : i64, tpu.core_type = #tpu.core_type<tc>, window_params = [{transform_indices = @transform_0, window_bounds = array<i64: 16, 2, 768>}, {pipeline_mode = #tpu.pipeline_mode<synchronous>, transform_indices = @transform_1, window_bounds = array<i64: 768, 768>}, {pipeline_mode = #tpu.pipeline_mode<synchronous>, transform_indices = @transform_2, window_bounds = array<i64: 768, 768>}, {pipeline_mode = #tpu.pipeline_mode<synchronous>, transform_indices = @transform_3, window_bounds = array<i64: 1, 768>}, {pipeline_mode = #tpu.pipeline_mode<synchronous>, transform_indices = @transform_4, window_bounds = array<i64: 768, 512>}, {pipeline_mode = #tpu.pipeline_mode<synchronous>, transform_indices = @transform_5, window_bounds = array<i64: 1, 512>}, {pipeline_mode = #tpu.pipeline_mode<synchronous>, transform_indices = @transform_6, window_bounds = array<i64: 512, 128>}, {pipeline_mode = #tpu.pipeline_mode<synchronous>, transform_indices = @transform_7, window_bounds = array<i64: 1, 128>}, {transform_indices = @transform_8, window_bounds = array<i64: 16, 128>}]} {
    %c0 = arith.constant 0 : index
    %c0_0 = arith.constant 0 : index
    %c0_1 = arith.constant 0 : index
    %0 = vector.load %arg1[%c0, %c0_0, %c0_1] : memref<16x2x768xf32, #tpu.memory_space<vmem>>, vector<16x2x768xf32>
    %1 = vector.extract_strided_slice %0 {offsets = [0, 0, 0], sizes = [16, 1, 768], strides = [1, 1, 1]} : vector<16x2x768xf32> to vector<16x1x768xf32>
    %cst = arith.constant dense<0.000000e+00> : vector<16x768xf32>
    %2 = vector.multi_reduction <add>, %1, %cst [1] : vector<16x1x768xf32> to vector<16x768xf32>
    %cst_2 = arith.constant 1.000000e+00 : f32
    %3 = vector.broadcast %cst_2 : f32 to vector<16x768xf32>
    %4 = arith.mulf %2, %3 : vector<16x768xf32>
    %5 = arith.truncf %4 : vector<16x768xf32> to vector<16x768xbf16>
    %6 = vector.extract_strided_slice %0 {offsets = [0, 1, 0], sizes = [16, 1, 768], strides = [1, 1, 1]} : vector<16x2x768xf32> to vector<16x1x768xf32>
    %cst_3 = arith.constant dense<0.000000e+00> : vector<16x768xf32>
    %7 = vector.multi_reduction <add>, %6, %cst_3 [1] : vector<16x1x768xf32> to vector<16x768xf32>
    %cst_4 = arith.constant 1.000000e+00 : f32
    %8 = vector.broadcast %cst_4 : f32 to vector<16x768xf32>
    %9 = arith.mulf %7, %8 : vector<16x768xf32>
    %10 = arith.truncf %9 : vector<16x768xf32> to vector<16x768xbf16>
    %c0_5 = arith.constant 0 : index
    %c0_6 = arith.constant 0 : index
    %11 = vector.load %arg2[%c0_5, %c0_6] : memref<768x768xbf16, #tpu.memory_space<vmem>>, vector<768x768xbf16>
    %cst_7 = arith.constant dense<0.000000e+00> : vector<16x768xf32>
    %12 = tpu.matmul %5, %11, %cst_7 {dimension_numbers = #tpu.dot_dimension_numbers<[1], [0], [0], [1], [0, 0, 1, 1], [], []>} : vector<16x768xbf16>, vector<768x768xbf16>, vector<16x768xf32> -> vector<16x768xf32>
    %c0_8 = arith.constant 0 : index
    %c0_9 = arith.constant 0 : index
    %13 = vector.load %arg3[%c0_8, %c0_9] : memref<768x768xbf16, #tpu.memory_space<vmem>>, vector<768x768xbf16>
    %cst_10 = arith.constant dense<0.000000e+00> : vector<16x768xf32>
    %14 = tpu.matmul %10, %13, %cst_10 {dimension_numbers = #tpu.dot_dimension_numbers<[1], [0], [0], [1], [0, 0, 1, 1], [], []>} : vector<16x768xbf16>, vector<768x768xbf16>, vector<16x768xf32> -> vector<16x768xf32>
    %15 = arith.addf %12, %14 : vector<16x768xf32>
    %c0_11 = arith.constant 0 : index
    %c0_12 = arith.constant 0 : index
    %16 = vector.load %arg4[%c0_11, %c0_12] : memref<1x768xf32, #tpu.memory_space<vmem>>, vector<1x768xf32>
    %17 = vector.broadcast %16 : vector<1x768xf32> to vector<16x768xf32>
    %18 = arith.addf %15, %17 : vector<16x768xf32>
    %19 = math.tanh %18 : vector<16x768xf32>
    %20 = arith.truncf %19 : vector<16x768xf32> to vector<16x768xbf16>
    %c0_13 = arith.constant 0 : index
    %c0_14 = arith.constant 0 : index
    %21 = vector.load %arg5[%c0_13, %c0_14] : memref<768x512xbf16, #tpu.memory_space<vmem>>, vector<768x512xbf16>
    %cst_15 = arith.constant dense<0.000000e+00> : vector<16x512xf32>
    %22 = tpu.matmul %20, %21, %cst_15 {dimension_numbers = #tpu.dot_dimension_numbers<[1], [0], [0], [1], [0, 0, 1, 1], [], []>} : vector<16x768xbf16>, vector<768x512xbf16>, vector<16x512xf32> -> vector<16x512xf32>
    %c0_16 = arith.constant 0 : index
    %c0_17 = arith.constant 0 : index
    %23 = vector.load %arg6[%c0_16, %c0_17] : memref<1x512xf32, #tpu.memory_space<vmem>>, vector<1x512xf32>
    %24 = vector.broadcast %23 : vector<1x512xf32> to vector<16x512xf32>
    %25 = arith.addf %22, %24 : vector<16x512xf32>
    %cst_18 = arith.constant 0.000000e+00 : f32
    %26 = vector.broadcast %cst_18 : f32 to vector<16x512xf32>
    %27 = arith.maximumf %25, %26 : vector<16x512xf32>
    %28 = arith.truncf %27 : vector<16x512xf32> to vector<16x512xbf16>
    %c0_19 = arith.constant 0 : index
    %c0_20 = arith.constant 0 : index
    %29 = vector.load %arg7[%c0_19, %c0_20] : memref<512x128xbf16, #tpu.memory_space<vmem>>, vector<512x128xbf16>
    %cst_21 = arith.constant dense<0.000000e+00> : vector<16x128xf32>
    %30 = tpu.matmul %28, %29, %cst_21 {dimension_numbers = #tpu.dot_dimension_numbers<[1], [0], [0], [1], [0, 0, 1, 1], [], []>} : vector<16x512xbf16>, vector<512x128xbf16>, vector<16x128xf32> -> vector<16x128xf32>
    %c0_22 = arith.constant 0 : index
    %c0_23 = arith.constant 0 : index
    %31 = vector.load %arg8[%c0_22, %c0_23] : memref<1x128xf32, #tpu.memory_space<vmem>>, vector<1x128xf32>
    %32 = vector.broadcast %31 : vector<1x128xf32> to vector<16x128xf32>
    %33 = arith.addf %30, %32 : vector<16x128xf32>
    %34 = arith.truncf %33 : vector<16x128xf32> to vector<16x128xbf16>
    %c0_24 = arith.constant 0 : index
    %c0_25 = arith.constant 0 : index
    %35 = vector.load %arg9[%c0_24, %c0_25] : memref<16x128xbf16, #tpu.memory_space<vmem>>, vector<16x128xbf16>
    tpu.vector_store %arg9[%c0_24, %c0_25], %34 {strides = array<i32>} : memref<16x128xbf16, #tpu.memory_space<vmem>>, vector<16x128xbf16>,
    return
  }
  func.func @transform_0(%arg0: i32) -> (i32, i32, i32) {
    %c0_i32 = arith.constant 0 : i32
    %c0_i32_0 = arith.constant 0 : i32
    %c0_i32_1 = arith.constant 0 : i32
    return %arg0, %c0_i32, %c0_i32_0 : i32, i32, i32
  }
  func.func @transform_1(%arg0: i32) -> (i32, i32) {
    %c0_i32 = arith.constant 0 : i32
    %c0_i32_0 = arith.constant 0 : i32
    %c0_i32_1 = arith.constant 0 : i32
    return %c0_i32, %c0_i32_0 : i32, i32
  }
  func.func @transform_2(%arg0: i32) -> (i32, i32) {
    %c0_i32 = arith.constant 0 : i32
    %c0_i32_0 = arith.constant 0 : i32
    %c0_i32_1 = arith.constant 0 : i32
    return %c0_i32, %c0_i32_0 : i32, i32
  }
  func.func @transform_3(%arg0: i32) -> (i32, i32) {
    %c0_i32 = arith.constant 0 : i32
    %c0_i32_0 = arith.constant 0 : i32
    %c0_i32_1 = arith.constant 0 : i32
    return %c0_i32, %c0_i32_0 : i32, i32
  }
  func.func @transform_4(%arg0: i32) -> (i32, i32) {
    %c0_i32 = arith.constant 0 : i32
    %c0_i32_0 = arith.constant 0 : i32
    %c0_i32_1 = arith.constant 0 : i32
    return %c0_i32, %c0_i32_0 : i32, i32
  }
  func.func @transform_5(%arg0: i32) -> (i32, i32) {
    %c0_i32 = arith.constant 0 : i32
    %c0_i32_0 = arith.constant 0 : i32
    %c0_i32_1 = arith.constant 0 : i32
    return %c0_i32, %c0_i32_0 : i32, i32
  }
  func.func @transform_6(%arg0: i32) -> (i32, i32) {
    %c0_i32 = arith.constant 0 : i32
    %c0_i32_0 = arith.constant 0 : i32
    %c0_i32_1 = arith.constant 0 : i32
    return %c0_i32, %c0_i32_0 : i32, i32
  }
  func.func @transform_7(%arg0: i32) -> (i32, i32) {
    %c0_i32 = arith.constant 0 : i32
    %c0_i32_0 = arith.constant 0 : i32
    %c0_i32_1 = arith.constant 0 : i32
    return %c0_i32, %c0_i32_0 : i32, i32
  }
  func.func @transform_8(%arg0: i32) -> (i32, i32) {
    %c0_i32 = arith.constant 0 : i32
    %c0_i32_0 = arith.constant 0 : i32
    return %arg0, %c0_i32 : i32, i32
  }
}

</mosaic_0001>

<bundles_post_ra>
// kernel: cls_shot_head_forward.1
= control target key start
LH: loop header
LB: loop body
LE: loop exit
PB: predicated region body
PF: predicated region fallthrough
CT: control target
= control target key end

     0   :  { %13 = vsyncpa [#allocation3], 0  ;;  %s12004_s0 = inlined_call_operand.vmem [shape: f32[16,2,768], index: 0, kind: input, shape index: {}]   ;;  %s12005_s1 = inlined_call_operand.hbm [shape: bf16[768,768], index: 1, kind: input, shape index: {}]   ;;  %s12006_s2 = inlined_call_operand.hbm [shape: bf16[768,768], index: 2, kind: input, shape index: {}]   ;;  %s12007_s3 = inlined_call_operand.hbm [shape: f32[1,768], index: 3, kind: input, shape index: {}]   ;;  %s12008_s4 = inlined_call_operand.hbm [shape: bf16[768,512], index: 4, kind: input, shape index: {}]   ;;  %s12009_s5 = inlined_call_operand.hbm [shape: f32[1,512], index: 5, kind: input, shape index: {}]   ;;  %s12010_s6 = inlined_call_operand.hbm [shape: bf16[512,128], index: 6, kind: input, shape index: {}]   ;;  %s12011_s7 = inlined_call_operand.hbm [shape: f32[1,128], index: 7, kind: input, shape index: {}]   ;;  %s12012_s8 = inlined_call_operand.vmem [shape: bf16[16,128], index: 8, kind: output, shape index: {}]  }
   0x1   :  { %14 = vsyncpa [#allocation5], 0 }
   0x2   :  { %15 = vsyncpa [#allocation8], 0 }
   0x3   :  { %16 = vsyncpa [#allocation11], 0  ;;  %s10586_s27 = smov [#allocation4]   ;;  %s10587_s29 = smov [#allocation7]  }
   0x4   :  { %s36_s28 = sshll.u32 %s10586_s27, 4  ;;  %s58_s30 = sshll.u32 %s10587_s29, 4  ;;  %s37_s28 = int_to_ptr.vmem [resolvable:$true] %s36_s28  ;;  %s10644_s30 = int_to_ptr.vmem [resolvable:$true] %s58_s30 }
   0x5   :  { %s10424_s11 = scalar_lea.hbm %s12006_s2, 36864 }
   0x6   :  { %p10425_p0 = scmp.ne.s32.totalorder %s12006_s2, %s10424_s11  ;;  %p10428_p1 = scmp.lt.u32.totalorder %s10424_s11, %s12006_s2 }
   0x8   :  { %p10430_p2 = pnand %p10428_p1, %p10425_p0 }
   0xa   :  { %10433 = shalt.err (!%p10430_p2)
}
   0xb   :  { %s10434_s16 = scalar_lea.vmem %s37_s28, 36864  ;;  %p10439_p4 = scmp.lt.s32.totalorder %s37_s28, %s37_s28 }
   0xc   :  { %p10435_p3 = scmp.ne.s32.totalorder %s37_s28, %s10434_s16  ;;  %p10440_p5 = scmp.lt.s32.totalorder %s10434_s16, %s10434_s16 }
   0xe   :  { %p10441_p6 = por %p10440_p5, %p10439_p4 }
  0x10   :  { %p10442_p7 = pnand %p10441_p6, %p10435_p3 }
  0x12   :  { %10445 = shalt.err (!%p10442_p7)
}
  0x13   :  { %s10588_s17 = smov 384   ;;  %s10589_s18 = smov 24  }
  0x14   :  { %42 = dma.hbm_to_vmem [thread:$0]  %s12006_s2, 36864, %s37_s28, [#allocation5], %s10588_s17, %s10588_s17, %s10589_s18  }
  0x15   :  { %s10446_s23 = scalar_lea.hbm %s12008_s4, 24576 }
  0x16   :  { %p10447_p8 = scmp.ne.s32.totalorder %s12008_s4, %s10446_s23  ;;  %p10450_p9 = scmp.lt.u32.totalorder %s10446_s23, %s12008_s4 }
  0x18   :  { %p10452_p10 = pnand %p10450_p9, %p10447_p8 }
  0x1a   :  { %10455 = shalt.err (!%p10452_p10)
}
  0x1b   :  { %s10456_s29 = scalar_lea.vmem %s10644_s30, 24576  ;;  %p10461_p12 = scmp.lt.s32.totalorder %s10644_s30, %s10644_s30 }
  0x1c   :  { %p10457_p11 = scmp.ne.s32.totalorder %s10644_s30, %s10456_s29  ;;  %p10462_p13 = scmp.lt.s32.totalorder %s10456_s29, %s10456_s29 }
  0x1e   :  { %p10463_p0 = por %p10462_p13, %p10461_p12 }
  0x20   :  { %p10464_p1 = pnand %p10463_p0, %p10457_p11 }
  0x22   :  { %10467 = shalt.err (!%p10464_p1)
}
  0x23   :  { %s10590_s2 = smov 256   ;;  %s10591_s28 = smov 16  }
  0x24   :  { %64 = dma.hbm_to_vmem [thread:$0]  %s12008_s4, 24576, %s10644_s30, [#allocation8], %s10590_s2, %s10590_s2, %s10591_s28  }
  0x25   :  { %s10592_s11 = smov [#allocation10]   ;;  %s10468_s15 = scalar_lea.hbm %s12010_s6, 4096 }
  0x26   :  { %s80_s12 = sshll.u32 %s10592_s11, 4  ;;  %p10469_p2 = scmp.ne.s32.totalorder %s12010_s6, %s10468_s15  ;;  %s81_s12 = int_to_ptr.vmem [resolvable:$true] %s80_s12 }
  0x27   :  { %p10472_p3 = scmp.lt.u32.totalorder %s10468_s15, %s12010_s6 }
  0x29   :  { %p10474_p4 = pnand %p10472_p3, %p10469_p2 }
  0x2b   :  { %10477 = shalt.err (!%p10474_p4)
}
  0x2c   :  { %s10478_s22 = scalar_lea.vmem %s81_s12, 4096  ;;  %p10483_p6 = scmp.lt.s32.totalorder %s81_s12, %s81_s12 }
  0x2d   :  { %p10479_p5 = scmp.ne.s32.totalorder %s81_s12, %s10478_s22  ;;  %p10484_p7 = scmp.lt.s32.totalorder %s10478_s22, %s10478_s22 }
  0x2f   :  { %p10485_p8 = por %p10484_p7, %p10483_p6 }
  0x31   :  { %p10486_p9 = pnand %p10485_p8, %p10479_p5 }
  0x33   :  { %10489 = shalt.err (!%p10486_p9)
}
  0x34   :  { %s10593_s4 = smov 64   ;;  %s10594_s30 = smov 4  }
  0x35   :  { %86 = dma.hbm_to_vmem [thread:$0]  %s12010_s6, 4096, %s81_s12, [#allocation11], %s10593_s4, %s10593_s4, %s10594_s30  }
  0x36   :  { %s10595_s25 = smov [#allocation2]   ;;  %s10596_s27 = smov [#allocation6]  }
  0x37   :  { %s24_s26 = sshll.u32 %s10595_s25, 4  ;;  %s49_s29 = sshll.u32 %s10596_s27, 4  ;;  %s25_s26 = int_to_ptr.vmem [resolvable:$true] %s24_s26  ;;  %s50_s29 = int_to_ptr.vmem [resolvable:$true] %s49_s29 }
  0x38   :  { %s10490_s9 = scalar_lea.hbm %s12005_s1, 36864 }
  0x39   :  { %p10491_p10 = scmp.ne.s32.totalorder %s12005_s1, %s10490_s9  ;;  %p10494_p11 = scmp.lt.u32.totalorder %s10490_s9, %s12005_s1 }
  0x3b   :  { %p10496_p12 = pnand %p10494_p11, %p10491_p10 }
  0x3d   :  { %10499 = shalt.err (!%p10496_p12)
}
  0x3e   :  { %s10500_s6 = scalar_lea.vmem %s25_s26, 36864  ;;  %p10505_p0 = scmp.lt.s32.totalorder %s25_s26, %s25_s26 }
  0x3f   :  { %p10501_p13 = scmp.ne.s32.totalorder %s25_s26, %s10500_s6  ;;  %p10506_p1 = scmp.lt.s32.totalorder %s10500_s6, %s10500_s6 }
  0x41   :  { %p10507_p2 = por %p10506_p1, %p10505_p0 }
  0x43   :  { %p10508_p3 = pnand %p10507_p2, %p10501_p13 }
  0x45   :  { %10511 = shalt.err (!%p10508_p3)
}
  0x46   :  { %30 = dma.hbm_to_vmem [thread:$0]  %s12005_s1, 36864, %s25_s26, [#allocation3], %s10588_s17, %s10588_s17, %s10589_s18  }
  0x47   :  { %s10512_s20 = scalar_lea.hbm %s12007_s3, 96 }
  0x48   :  { %p10513_p4 = scmp.ne.s32.totalorder %s12007_s3, %s10512_s20  ;;  %p10516_p5 = scmp.lt.u32.totalorder %s10512_s20, %s12007_s3 }
  0x4a   :  { %p10518_p6 = pnand %p10516_p5, %p10513_p4 }
  0x4c   :  { %10521 = shalt.err (!%p10518_p6)
}
  0x4d   :  { %s10522_s23 = scalar_lea.vmem %s50_s29, 96  ;;  %p10527_p8 = scmp.lt.s32.totalorder %s50_s29, %s50_s29 }
  0x4e   :  { %p10523_p7 = scmp.ne.s32.totalorder %s50_s29, %s10522_s23  ;;  %p10528_p9 = scmp.lt.s32.totalorder %s10522_s23, %s10522_s23 }
  0x50   :  { %p10529_p10 = por %p10528_p9, %p10527_p8 }
  0x52   :  { %p10530_p11 = pnand %p10529_p10, %p10523_p7 }
  0x54   :  { %10533 = shalt.err (!%p10530_p11)
}
  0x55   :  { %52 = dma.hbm_to_vmem [thread:$0]  %s12007_s3, 96, %s50_s29, [#allocation5]  }
  0x56   :  { %s10597_s18 = smov [#allocation9]   ;;  %s10598_s25 = smov [#allocation12]  }
  0x57   :  { %s71_s24 = sshll.u32 %s10597_s18, 4  ;;  %s93_s26 = sshll.u32 %s10598_s25, 4  ;;  %s72_s24 = int_to_ptr.vmem [resolvable:$true] %s71_s24  ;;  %s94_s26 = int_to_ptr.vmem [resolvable:$true] %s93_s26 }
  0x58   :  { %s10534_s28 = scalar_lea.hbm %s12009_s5, 64 }
  0x59   :  { %p10535_p12 = scmp.ne.s32.totalorder %s12009_s5, %s10534_s28  ;;  %p10538_p13 = scmp.lt.u32.totalorder %s10534_s28, %s12009_s5 }
  0x5b   :  { %p10540_p0 = pnand %p10538_p13, %p10535_p12 }
  0x5d   :  { %10543 = shalt.err (!%p10540_p0)
}
  0x5e   :  { %s10544_s3 = scalar_lea.vmem %s72_s24, 64  ;;  %p10549_p2 = scmp.lt.s32.totalorder %s72_s24, %s72_s24 }
  0x5f   :  { %p10545_p1 = scmp.ne.s32.totalorder %s72_s24, %s10544_s3  ;;  %p10550_p3 = scmp.lt.s32.totalorder %s10544_s3, %s10544_s3 }
  0x61   :  { %p10551_p4 = por %p10550_p3, %p10549_p2 }
  0x63   :  { %p10552_p5 = pnand %p10551_p4, %p10545_p1 }
  0x65   :  { %10555 = shalt.err (!%p10552_p5)
}
  0x66   :  { %74 = dma.hbm_to_vmem [thread:$0]  %s12009_s5, 64, %s72_s24, [#allocation8]  }
  0x67   :  { %s10556_s15 = scalar_lea.hbm %s12011_s7, 16 }
  0x68   :  { %p10557_p6 = scmp.ne.s32.totalorder %s12011_s7, %s10556_s15  ;;  %p10560_p7 = scmp.lt.u32.totalorder %s10556_s15, %s12011_s7 }
  0x6a   :  { %p10562_p8 = pnand %p10560_p7, %p10557_p6 }
  0x6c   :  { %10565 = shalt.err (!%p10562_p8)
}
  0x6d   :  { %s10566_s22 = scalar_lea.vmem %s94_s26, 16  ;;  %s10570_s4 = scalar_lea.vmem %s94_s26, 32 }
  0x6e   :  { %p10567_p9 = scmp.ne.s32.totalorder %s94_s26, %s10566_s22  ;;  %p10571_p10 = scmp.lt.s32.totalorder %s94_s26, %s94_s26 }
  0x6f   :  { %p10572_p11 = scmp.lt.s32.totalorder %s10570_s4, %s10566_s22 }
  0x71   :  { %p10573_p12 = por %p10572_p11, %p10571_p10 }
  0x73   :  { %p10574_p13 = pnand %p10573_p12, %p10567_p9 }
  0x75   :  { %10577 = shalt.err (!%p10574_p13)
}
  0x76   :  { %96 = dma.hbm_to_vmem [thread:$0]  %s12011_s7, 16, %s94_s26, [#allocation11]  }
  0x77   :  { %10578 = dma.done.wait [#allocation3], 36864  }
  0x78   :  { %10579 = vsyncadd [#allocation3], 4294930432 }
  0x79   :  { %10580 = dma.done.wait [#allocation5], 36960  }
  0x7a   :  { %10581 = vsyncadd [#allocation5], 4294930336 }
  0x7b   :  { %10582 = dma.done.wait [#allocation8], 24640  }
  0x7c   :  { %10583 = vsyncadd [#allocation8], 4294942656 }
  0x7d   :  { %10584 = dma.done.wait [#allocation11], 4112  }
  0x7e   :  { %10585 = vsyncadd [#allocation11], 4294963184  ;;  %v9168_v0 = vld [vmem:[#allocation4 + $0x4] ss:$24 sps:$4 sm:$0xff]   ;;  %v9172_v2 = vld [vmem:[#allocation4] ss:$24 sps:$4 sm:$0xff]   ;;  %v215_v34 = vlaneseq }
  0x7f   :  { %v9170_v1 = vld [vmem:[#allocation4 + $0xc] ss:$24 sps:$4 sm:$0xff]   ;;  %3762 = vmatprep.subr.bf16.mxu0 %v9168_v0  ;;  %v9173_v3 = vld [vmem:[#allocation4 + $0x8] ss:$24 sps:$4 sm:$0xff]   ;;  %v9176_v5 = vld [vmem:[#allocation4 + $0x3c] ss:$24 sps:$4 sm:$0xff]  }
  0x80   :  { %3891 = vmatprep.subr.bf16.mxu1 %v9170_v1  ;;  %v9174_v4 = vld [vmem:[#allocation4 + $0x34] ss:$24 sps:$4 sm:$0xff]   ;;  %3763 = vmatpush1.bf16.msra.mxu0 %v9172_v2  ;;  %v9178_v6 = vld [vmem:[#allocation4 + $0x30] ss:$24 sps:$4 sm:$0xff]   ;;  %v9180_v8 = vld [vmem:[#allocation4 + $0x64] ss:$24 sps:$4 sm:$0xff]  }
  0x81   :  { %3892 = vmatpush1.bf16.msra.mxu1 %v9173_v3  ;;  %3764 = vmatprep.subr.bf16.mxu0 %v9174_v4  ;;  %v9179_v7 = vld [vmem:[#allocation4 + $0x38] ss:$24 sps:$4 sm:$0xff]   ;;  %v9182_v9 = vld [vmem:[#allocation4 + $0x6c] ss:$24 sps:$4 sm:$0xff]   ;;  %v9185_v11 = vld [vmem:[#allocation4 + $0x68] ss:$24 sps:$4 sm:$0xff]  }
  0x82   :  { %3893 = vmatprep.subr.bf16.mxu1 %v9176_v5  ;;  %v9184_v10 = vld [vmem:[#allocation4 + $0x60] ss:$24 sps:$4 sm:$0xff]   ;;  %v9186_v12 = vld [vmem:[#allocation4 + $0x94] ss:$24 sps:$4 sm:$0xff]   ;;  %v9190_v14 = vld [vmem:[#allocation4 + $0x90] ss:$24 sps:$4 sm:$0xff]  }
  0x83   :  { %v9188_v13 = vld [vmem:[#allocation4 + $0x9c] ss:$24 sps:$4 sm:$0xff]   ;;  %v9191_v15 = vld [vmem:[#allocation4 + $0x98] ss:$24 sps:$4 sm:$0xff]   ;;  %v9194_v17 = vld [vmem:[#allocation4 + $0xcc] ss:$24 sps:$4 sm:$0xff]  }
  0x84   :  { %3765 = vmatpush1.bf16.msra.mxu0 %v9178_v6  ;;  %v9192_v16 = vld [vmem:[#allocation4 + $0xc4] ss:$24 sps:$4 sm:$0xff]   ;;  %v9196_v18 = vld [vmem:[#allocation4 + $0xc0] ss:$24 sps:$4 sm:$0xff]   ;;  %v9198_v20 = vld [vmem:[#allocation4 + $0xf4] ss:$24 sps:$4 sm:$0xff]  }
  0x85   :  { %3894 = vmatpush1.bf16.msra.mxu1 %v9179_v7  ;;  %3766 = vmatprep.subr.bf16.mxu0 %v9180_v8  ;;  %v9197_v19 = vld [vmem:[#allocation4 + $0xc8] ss:$24 sps:$4 sm:$0xff]   ;;  %v9200_v21 = vld [vmem:[#allocation4 + $0xfc] ss:$24 sps:$4 sm:$0xff]   ;;  %v9203_v23 = vld [vmem:[#allocation4 + $0xf8] ss:$24 sps:$4 sm:$0xff]  }
  0x86   :  { %3895 = vmatprep.subr.bf16.mxu1 %v9182_v9  ;;  %v9202_v22 = vld [vmem:[#allocation4 + $0xf0] ss:$24 sps:$4 sm:$0xff]   ;;  %v9204_v24 = vld [vmem:[#allocation4 + $0x124] ss:$24 sps:$4 sm:$0xff]   ;;  %v9208_v26 = vld [vmem:[#allocation4 + $0x120] ss:$24 sps:$4 sm:$0xff]  }
  0x87   :  { %v9206_v25 = vld [vmem:[#allocation4 + $0x12c] ss:$24 sps:$4 sm:$0xff]   ;;  %v9209_v27 = vld [vmem:[#allocation4 + $0x128] ss:$24 sps:$4 sm:$0xff]   ;;  %v9212_v29 = vld [vmem:[#allocation4 + $0x15c] ss:$24 sps:$4 sm:$0xff]  }
  0x88   :  { %3767 = vmatpush1.bf16.msra.mxu0 %v9184_v10  ;;  %v9210_v28 = vld [vmem:[#allocation4 + $0x154] ss:$24 sps:$4 sm:$0xff]   ;;  %v9214_v30 = vld [vmem:[#allocation4 + $0x150] ss:$24 sps:$4 sm:$0xff]   ;;  %v9216_v32 = vld [vmem:[#allocation4 + $0x184] ss:$24 sps:$4 sm:$0xff]  }
  0x89   :  { %3896 = vmatpush1.bf16.msra.mxu1 %v9185_v11  ;;  %3768 = vmatprep.subr.bf16.mxu0 %v9186_v12  ;;  %v9215_v31 = vld [vmem:[#allocation4 + $0x158] ss:$24 sps:$4 sm:$0xff]   ;;  %v9218_v33 = vld [vmem:[#allocation4 + $0x18c] ss:$24 sps:$4 sm:$0xff]   ;;  %v9221_v36 = vld [vmem:[#allocation4 + $0x188] ss:$24 sps:$4 sm:$0xff]  }
  0x8a   :  { %3897 = vmatprep.subr.bf16.mxu1 %v9188_v13  ;;  %v9220_v35 = vld [vmem:[#allocation4 + $0x180] ss:$24 sps:$4 sm:$0xff]   ;;  %v9222_v37 = vld [vmem:[#allocation4 + $0x1b4] ss:$24 sps:$4 sm:$0xff]   ;;  %v10741_v39 = vshrl.u32 %v215_v34, 7  ;;  %v10770_v58 = vld [vmem:[%s12004_s0 + $0x24] sm:$0xff] }
  0x8b   :  { %v9224_v38 = vld [vmem:[#allocation4 + $0x1bc] ss:$24 sps:$4 sm:$0xff]   ;;  %v9226_v40 = vld [vmem:[#allocation4 + $0x1b0] ss:$24 sps:$4 sm:$0xff]   ;;  %v9230_v43 = vld [vmem:[#allocation4 + $0x1ec] ss:$24 sps:$4 sm:$0xff]  }
  0x8c   :  { %3769 = vmatpush1.bf16.msra.mxu0 %v9190_v14  ;;  %v9227_v41 = vld [vmem:[#allocation4 + $0x1b8] ss:$24 sps:$4 sm:$0xff]   ;;  %v9228_v42 = vld [vmem:[#allocation4 + $0x1e4] ss:$24 sps:$4 sm:$0xff]   ;;  %v10744_v44 = vsub.s32 3, %v10741_v39  ;;  %v10747_v47 = vsub.s32 1, %v10741_v39 }
  0x8d   :  { %3898 = vmatpush1.bf16.msra.mxu1 %v9191_v15  ;;  %3770 = vmatprep.subr.bf16.mxu0 %v9192_v16  ;;  %v9232_v45 = vld [vmem:[#allocation4 + $0x1e0] ss:$24 sps:$4 sm:$0xff]   ;;  %v10750_v48 = vsub.s32 7, %v10741_v39  ;;  %v9234_v49 = vld [vmem:[#allocation4 + $0x214] ss:$24 sps:$4 sm:$0xff]   ;;  %v10836_v13 = vld [vmem:[%s12004_s0 + $0x84] sm:$0xff] }
  0x8e   :  { %3899 = vmatprep.subr.bf16.mxu1 %v9194_v17  ;;  %12023 = vst [vmem:[#allocation17_spill] sm:$0xff] %v10744_v44  ;;  %v9233_v46 = vld [vmem:[#allocation4 + $0x1e8] ss:$24 sps:$4 sm:$0xff]   ;;  %12024 = vst [vmem:[#allocation18_spill] sm:$0xff] %v10747_v47  ;;  %v9236_v50 = vld [vmem:[#allocation4 + $0x21c] ss:$24 sps:$4 sm:$0xff]   ;;  %v10805_v3 = vrot.slane %v10770_v58, %v10744_v44 }
  0x8f   :  { %v9238_v51 = vld [vmem:[#allocation4 + $0x210] ss:$24 sps:$4 sm:$0xff]   ;;  %v10755_v53 = vld [vmem:[%s12004_s0] sm:$0xff]  ;;  %v10765_v57 = vld [vmem:[%s12004_s0 + $0x18] sm:$0xff]  ;;  %vm2136_vm0 = vcmask 1041409   ;;  %vm2139_vm1 = vcmask 1042434  }
  0x90   :  { %3771 = vmatpush1.bf16.msra.mxu0 %v9196_v18  ;;  %v9239_v52 = vld [vmem:[#allocation4 + $0x218] ss:$24 sps:$4 sm:$0xff]   ;;  %v9240_v54 = vld [vmem:[#allocation4 + $0x244] ss:$24 sps:$4 sm:$0xff]   ;;  %v798_v59 = vrot.slane %v10755_v53, %v10744_v44  ;;  %v10776_v60 = vrot.slane %v10755_v53, %v10747_v47  ;;  %v10780_v61 = vrot.slane %v10755_v53, %v10750_v48  ;;  %v10795_v0 = vld [vmem:[%s12004_s0 + $0x48] sm:$0xff]  ;;  %v846_v2 = vrot.slane %v10765_v57, %v10744_v44 }
  0x91   :  { %3900 = vmatpush1.bf16.msra.mxu1 %v9197_v19  ;;  %3772 = vmatprep.subr.bf16.mxu0 %v9198_v20  ;;  %v9242_v55 = vld [vmem:[#allocation4 + $0x24c] ss:$24 sps:$4 sm:$0xff]   ;;  %v10785_v62 = vld [vmem:[%s12004_s0 + $0x30] sm:$0xff]  ;;  %v10790_v63 = vld [vmem:[%s12004_s0 + $0x3c] sm:$0xff]  ;;  %v942_v9 = vrot.slane %v10795_v0, %v10744_v44  ;;  %vm2142_vm2 = vcmask 1043459   ;;  %vm2145_vm3 = vcmask 1044484  }
  0x92   :  { %3901 = vmatprep.subr.bf16.mxu1 %v9200_v21  ;;  %v10760_v56 = vld [vmem:[%s12004_s0 + $0xc] sm:$0xff]  ;;  %v10810_v4 = vld [vmem:[%s12004_s0 + $0x54] sm:$0xff]  ;;  %v10815_v5 = vld [vmem:[%s12004_s0 + $0x60] sm:$0xff]  ;;  %v894_v7 = vrot.slane %v10785_v62, %v10744_v44  ;;  %v918_v8 = vrot.slane %v10790_v63, %v10744_v44  ;;  %v1272_v18 = vpack.c.bf16 %v798_v59, %v798_v59  ;;  %vm2148_vm4 = vcmask 1045509  }
  0x93   :  { %v10799_v1 = vrot.slane %v10760_v56, %v10744_v44  ;;  %v10820_v6 = vld [vmem:[%s12004_s0 + $0x6c] sm:$0xff]  ;;  %v9244_v10 = vld [vmem:[#allocation4 + $0x240] ss:$24 sps:$4 sm:$0xff]   ;;  %v966_v15 = vrot.slane %v10810_v4, %v10744_v44  ;;  %v990_v16 = vrot.slane %v10815_v5, %v10744_v44  ;;  %vm2151_vm5 = vcmask 1046534  }
  0x94   :  { %3773 = vmatpush1.bf16.msra.mxu0 %v9202_v22  ;;  %v9245_v11 = vld [vmem:[#allocation4 + $0x248] ss:$24 sps:$4 sm:$0xff]   ;;  %v10831_v12 = vld [vmem:[%s12004_s0 + $0x78] sm:$0xff]  ;;  %v10841_v14 = vld [vmem:[%s12004_s0 + $0x90] sm:$0xff]  ;;  %v1014_v17 = vrot.slane %v10820_v6, %v10744_v44  ;;  %v2040_v34 = vunpack.c.l.b16 %v1272_v18  ;;  %vm2154_vm6 = vcmask 1047559  }
  0x95   :  { %3902 = vmatpush1.bf16.msra.mxu1 %v9203_v23  ;;  %3774 = vmatprep.subr.bf16.mxu0 %v9204_v24  ;;  %v10852_v19 = vld [vmem:[%s12004_s0 + $0x9c] sm:$0xff]  ;;  %v10857_v20 = vld [vmem:[%s12004_s0 + $0xa8] sm:$0xff]  ;;  %v10862_v21 = vld [vmem:[%s12004_s0 + $0xb4] sm:$0xff]  ;;  %v1038_v22 = vrot.slane %v10831_v12, %v10744_v44  ;;  %v1062_v23 = vrot.slane %v10836_v13, %v10744_v44  ;;  %v1086_v24 = vrot.slane %v10841_v14, %v10744_v44 }
  0x96   :  { %3903 = vmatprep.subr.bf16.mxu1 %v9206_v25  ;;  %v1278_v25 = vpack.c.bf16 %v10799_v1, %v10799_v1 }
  0x98   :  { %3775 = vmatpush1.bf16.msra.mxu0 %v9208_v26  ;;  %v9246_v26 = vld [vmem:[#allocation4 + $0x274] ss:$24 sps:$4 sm:$0xff]  }
  0x99   :  { %3904 = vmatpush1.bf16.msra.mxu1 %v9209_v27  ;;  %3776 = vmatprep.subr.bf16.mxu0 %v9210_v28  ;;  %v1110_v27 = vrot.slane %v10852_v19, %v10744_v44  ;;  %v1134_v28 = vrot.slane %v10857_v20, %v10744_v44 }
  0x9a   :  { %3905 = vmatprep.subr.bf16.mxu1 %v9212_v29  ;;  %v1158_v29 = vrot.slane %v10862_v21, %v10744_v44 }
  0x9c   :  { %3777 = vmatpush1.bf16.msra.mxu0 %v9214_v30  ;;  %v9248_v30 = vld [vmem:[#allocation4 + $0x27c] ss:$24 sps:$4 sm:$0xff]  }
  0x9d   :  { %3906 = vmatpush1.bf16.msra.mxu1 %v9215_v31  ;;  %3778 = vmatprep.subr.bf16.mxu0 %v9216_v32  ;;  %v1284_v31 = vpack.c.bf16 %v846_v2, %v846_v2  ;;  %v1290_v32 = vpack.c.bf16 %v10805_v3, %v10805_v3 }
  0x9e   :  { %3907 = vmatprep.subr.bf16.mxu1 %v9218_v33  ;;  %v1296_v33 = vpack.c.bf16 %v894_v7, %v894_v7  ;;  %v9256_v7 = vld [vmem:[#allocation4 + $0x2a0] ss:$24 sps:$4 sm:$0xff]  }
  0x9f   :  { %v2058_v59 = vunpack.c.l.b16 %v1290_v32 }
  0xa0   :  { %3779 = vmatpush1.bf16.msra.mxu0 %v9220_v35  ;;  %v1302_v35 = vpack.c.bf16 %v918_v8, %v918_v8  ;;  %v2064_v1 = vunpack.c.l.b16 %v1296_v33  ;;  %v2046_v8 = vunpack.c.l.b16 %v1278_v25 }
  0xa1   :  { %3908 = vmatpush1.bf16.msra.mxu1 %v9221_v36  ;;  %3780 = vmatprep.subr.bf16.mxu0 %v9222_v37  ;;  %v1308_v36 = vpack.c.bf16 %v942_v9, %v942_v9  ;;  %v1314_v37 = vpack.c.bf16 %v966_v15, %v966_v15 }
  0xa2   :  { %3909 = vmatprep.subr.bf16.mxu1 %v9224_v38  ;;  %v1320_v38 = vpack.c.bf16 %v990_v16, %v990_v16  ;;  %v2070_v2 = vunpack.c.l.b16 %v1302_v35  ;;  %v9258_v16 = vld [vmem:[#allocation4 + $0x2d4] ss:$24 sps:$4 sm:$0xff]   ;;  %v2162_v25 = vrot.slane %v2064_v1, 5  ;;  %v842_v1 = vrot.slane %v10765_v57, %v10747_v47 }
  0xa3   :  { %v2076_v3 = vunpack.c.l.b16 %v1308_v36  ;;  %v2082_v9 = vunpack.c.l.b16 %v1314_v37 }
  0xa4   :  { %3781 = vmatpush1.bf16.msra.mxu0 %v9226_v40  ;;  %v9250_v40 = vld [vmem:[#allocation4 + $0x270] ss:$24 sps:$4 sm:$0xff]   ;;  %v2088_v15 = vunpack.c.l.b16 %v1320_v38 }
  0xa5   :  { %3910 = vmatpush1.bf16.msra.mxu1 %v9227_v41  ;;  %3782 = vmatprep.subr.bf16.mxu0 %v9228_v42  ;;  %v9251_v41 = vld [vmem:[#allocation4 + $0x278] ss:$24 sps:$4 sm:$0xff]   ;;  %v1326_v42 = vpack.c.bf16 %v1014_v17, %v1014_v17  ;;  %v2166_v32 = vrot.slane %v2076_v3, 3 }
  0xa6   :  { %3911 = vmatprep.subr.bf16.mxu1 %v9230_v43  ;;  %v1332_v43 = vpack.c.bf16 %v1038_v22, %v1038_v22  ;;  %v2240_v35 = vrot.slane %v2088_v15, 1  ;;  %v9262_v38 = vld [vmem:[#allocation4 + $0x2d0] ss:$24 sps:$4 sm:$0xff]  }
  0xa7   :  { %v2094_v17 = vunpack.c.l.b16 %v1326_v42 }
  0xa8   :  { %3783 = vmatpush1.bf16.msra.mxu0 %v9232_v45  ;;  %v1338_v45 = vpack.c.bf16 %v1062_v23, %v1062_v23 }
  0xa9   :  { %3912 = vmatpush1.bf16.msra.mxu1 %v9233_v46  ;;  %3784 = vmatprep.subr.bf16.mxu0 %v9234_v49  ;;  %v1344_v46 = vpack.c.bf16 %v1086_v24, %v1086_v24  ;;  %v9252_v49 = vld [vmem:[#allocation4 + $0x2a4] ss:$24 sps:$4 sm:$0xff]  }
  0xaa   :  { %3913 = vmatprep.subr.bf16.mxu1 %v9236_v50  ;;  %v1350_v50 = vpack.c.bf16 %v1110_v27, %v1110_v27  ;;  %v2106_v18 = vunpack.c.l.b16 %v1338_v45 }
  0xab   :  { %v2112_v22 = vunpack.c.l.b16 %v1344_v46  ;;  %v2241_v46 = vsel %vm2136_vm0, %v2094_v17, %v2240_v35 }
  0xac   :  { %3785 = vmatpush1.bf16.msra.mxu0 %v9238_v51  ;;  %v1356_v51 = vpack.c.bf16 %v1134_v28, %v1134_v28  ;;  %v2118_v23 = vunpack.c.l.b16 %v1350_v50  ;;  %v2160_v28 = vrot.slane %v2058_v59, 6  ;;  %v2244_v37 = vrot.slane %v2106_v18, 6  ;;  %v9266_v50 = vld [vmem:[#allocation4 + $0x304] ss:$24 sps:$4 sm:$0xff]  }
  0xad   :  { %3914 = vmatpush1.bf16.msra.mxu1 %v9239_v52  ;;  %3786 = vmatprep.subr.bf16.mxu0 %v9240_v54  ;;  %v1362_v52 = vpack.c.bf16 %v1158_v29, %v1158_v29  ;;  %v2052_v54 = vunpack.c.l.b16 %v1284_v31  ;;  %v9260_v29 = vld [vmem:[#allocation4 + $0x2dc] ss:$24 sps:$4 sm:$0xff]   ;;  %v2164_v31 = vrot.slane %v2070_v2, 4  ;;  %v2246_v42 = vrot.slane %v2112_v22, 5  ;;  %v9269_v59 = vld [vmem:[#allocation4 + $0x30c] ss:$24 sps:$4 sm:$0xff]  }
  0xae   :  { %3915 = vmatprep.subr.bf16.mxu1 %v9242_v55  ;;  %v9254_v55 = vld [vmem:[#allocation4 + $0x2ac] ss:$24 sps:$4 sm:$0xff]   ;;  %v2124_v24 = vunpack.c.l.b16 %v1356_v51  ;;  %v818_v51 = vrot.slane %v10760_v56, %v10747_v47  ;;  %v962_v18 = vrot.slane %v10810_v4, %v10747_v47 }
  0xaf   :  { %v2158_v27 = vrot.slane %v2052_v54, 7 }
  0xb0   :  { %3787 = vmatpush1.bf16.msra.mxu0 %v9244_v10  ;;  %v2100_v10 = vunpack.c.l.b16 %v1332_v43  ;;  %v9263_v43 = vld [vmem:[#allocation4 + $0x2d8] ss:$24 sps:$4 sm:$0xff]   ;;  %v1277_v35 = vpack.c.bf16 %v818_v51, %v818_v51 }
  0xb1   :  { %3916 = vmatpush1.bf16.msra.mxu1 %v9245_v11  ;;  %3788 = vmatprep.subr.bf16.mxu0 %v9246_v26  ;;  %v9257_v11 = vld [vmem:[#allocation4 + $0x2a8] ss:$24 sps:$4 sm:$0xff]   ;;  %v2156_v26 = vrot.slane %v2040_v34, 1  ;;  %v2248_v34 = vrot.slane %v2118_v23, 4  ;;  %v986_v23 = vrot.slane %v10815_v5, %v10747_v47 }
  0xb2   :  { %3917 = vmatprep.subr.bf16.mxu1 %v9248_v30  ;;  %v2130_v30 = vunpack.c.l.b16 %v1362_v52  ;;  %v2242_v36 = vrot.slane %v2100_v10, 7  ;;  %v914_v10 = vrot.slane %v10790_v63, %v10747_v47  ;;  %v2045_v51 = vunpack.c.l.b16 %v1277_v35 }
  0xb3   :  { %v2157_v33 = vsel %vm2136_vm0, %v2046_v8, %v2156_v26  ;;  %v890_v8 = vrot.slane %v10785_v62, %v10747_v47 }
  0xb4   :  { %3789 = vmatpush1.bf16.msra.mxu0 %v9250_v40  ;;  %v2159_v40 = vsel %vm2139_vm1, %v2158_v27, %v2157_v33  ;;  %v2243_v54 = vsel %vm2139_vm1, %v2242_v36, %v2241_v46  ;;  %v1034_v27 = vrot.slane %v10831_v12, %v10747_v47  ;;  %v1271_v33 = vpack.c.bf16 %v10776_v60, %v10776_v60 }
  0xb5   :  { %3918 = vmatpush1.bf16.msra.mxu1 %v9251_v41  ;;  %3790 = vmatprep.subr.bf16.mxu0 %v9252_v49  ;;  %v2168_v41 = vrot.slane %v2082_v9, 2  ;;  %v2161_v45 = vsel %vm2142_vm2, %v2160_v28, %v2159_v40  ;;  %v2250_v49 = vrot.slane %v2124_v24, 3  ;;  %v2245_v3 = vsel %vm2142_vm2, %v2244_v37, %v2243_v54 }
  0xb6   :  { %3919 = vmatprep.subr.bf16.mxu1 %v9254_v55  ;;  %v2163_v52 = vsel %vm2145_vm3, %v2162_v25, %v2161_v45  ;;  %v2252_v55 = vrot.slane %v2130_v30, 2  ;;  %v2247_v15 = vsel %vm2145_vm3, %v2246_v42, %v2245_v3  ;;  %v1010_v24 = vrot.slane %v10820_v6, %v10747_v47 }
  0xb7   :  { %v2165_v2 = vsel %vm2148_vm4, %v2164_v31, %v2163_v52  ;;  %v2249_v17 = vsel %vm2148_vm4, %v2248_v34, %v2247_v15  ;;  %v1058_v28 = vrot.slane %v10836_v13, %v10747_v47  ;;  %v1106_v25 = vrot.slane %v10852_v19, %v10747_v47 }
  0xb8   :  { %3791 = vmatpush1.bf16.msra.mxu0 %v9256_v7  ;;  %v866_v7 = vrot.slane %v10770_v58, %v10747_v47  ;;  %v2167_v9 = vsel %vm2151_vm5, %v2166_v32, %v2165_v2  ;;  %v2251_v22 = vsel %vm2151_vm5, %v2250_v49, %v2249_v17  ;;  %v1130_v31 = vrot.slane %v10857_v20, %v10747_v47 }
  0xb9   :  { %3920 = vmatpush1.bf16.msra.mxu1 %v9257_v11  ;;  %3792 = vmatprep.subr.bf16.mxu0 %v9258_v16  ;;  %v938_v11 = vrot.slane %v10795_v0, %v10747_v47  ;;  %v2169_v16 = vsel %vm2154_vm6, %v2168_v41, %v2167_v9  ;;  %v2253_v26 = vsel %vm2154_vm6, %v2252_v55, %v2251_v22  ;;  %v2039_v60 = vunpack.c.l.b16 %v1271_v33 }
  0xba   :  { %3921 = vmatprep.subr.bf16.mxu1 %v9260_v29  ;;  %v1082_v29 = vrot.slane %v10841_v14, %v10747_v47  ;;  %v10918_v30 = vpack.c.b16 %v2253_v26, %v2169_v16  ;;  %v1154_v32 = vrot.slane %v10862_v21, %v10747_v47  ;;  %v1283_v36 = vpack.c.bf16 %v842_v1, %v842_v1 }
  0xbb   :  { %v1289_v37 = vpack.c.bf16 %v866_v7, %v866_v7  ;;  %v1301_v40 = vpack.c.bf16 %v914_v10, %v914_v10  ;;  %v1307_v41 = vpack.c.bf16 %v938_v11, %v938_v11  ;;  %v1313_v42 = vpack.c.bf16 %v962_v18, %v962_v18 }
  0xbc   :  { %3793 = vmatpush1.bf16.msra.mxu0 %v9262_v38  ;;  %3794 = vmatprep.mubr.bf16.mxu0 %v10918_v30  ;;  %v1295_v38 = vpack.c.bf16 %v890_v8, %v890_v8  ;;  %v1319_v34 = vpack.c.bf16 %v986_v23, %v986_v23  ;;  %v1331_v45 = vpack.c.bf16 %v1034_v27, %v1034_v27  ;;  %v2051_v55 = vunpack.c.l.b16 %v1283_v36 }
  0xbd   :  { %3922 = vmatpush1.bf16.msra.mxu1 %v9263_v43  ;;  %3805 = vmatprep.subr.bf16.mxu0 %v9266_v50  ;;  %v1325_v43 = vpack.c.bf16 %v1010_v24, %v1010_v24  ;;  %v1337_v46 = vpack.c.bf16 %v1058_v28, %v1058_v28  ;;  %v1343_v49 = vpack.c.bf16 %v1082_v29, %v1082_v29  ;;  %v2069_v2 = vunpack.c.l.b16 %v1301_v40 }
  0xbe   :  { %3934 = vmatprep.subr.bf16.mxu1 %v9269_v59  ;;  %3923 = vmatprep.mubr.bf16.mxu1 %v10918_v30  ;;  %v1349_v50 = vpack.c.bf16 %v1106_v25, %v1106_v25  ;;  %v1355_v52 = vpack.c.bf16 %v1130_v31, %v1130_v31  ;;  %v1361_v54 = vpack.c.bf16 %v1154_v32, %v1154_v32  ;;  %v2057_v59 = vunpack.c.l.b16 %v1289_v37 }
  0xbf   :  { %v2063_v1 = vunpack.c.l.b16 %v1295_v38  ;;  %v2075_v3 = vunpack.c.l.b16 %v1307_v41  ;;  %v2081_v7 = vunpack.c.l.b16 %v1313_v42  ;;  %v2087_v8 = vunpack.c.l.b16 %v1319_v34 }
  0xc0   :  { %v2093_v9 = vunpack.c.l.b16 %v1325_v43  ;;  %v2099_v15 = vunpack.c.l.b16 %v1331_v45  ;;  %v2105_v10 = vunpack.c.l.b16 %v1337_v46  ;;  %v2111_v11 = vunpack.c.l.b16 %v1343_v49 }
  0xc1   :  { %v2117_v16 = vunpack.c.l.b16 %v1349_v50  ;;  %v2123_v17 = vunpack.c.l.b16 %v1355_v52  ;;  %v2129_v18 = vunpack.c.l.b16 %v1361_v54  ;;  %v2135_v22 = vrot.slane %v2039_v60, 1 }
  0xc2   :  { %v2138_v23 = vrot.slane %v2051_v55, 7  ;;  %v2141_v24 = vrot.slane %v2057_v59, 6  ;;  %v2144_v26 = vrot.slane %v2063_v1, 5  ;;  %v2147_v27 = vrot.slane %v2069_v2, 4 }
  0xc3   :  { %v2150_v28 = vrot.slane %v2075_v3, 3  ;;  %v2153_v29 = vrot.slane %v2081_v7, 2  ;;  %v2137_v25 = vsel %vm2136_vm0, %v2045_v51, %v2135_v22  ;;  %v2226_v31 = vrot.slane %v2087_v8, 1 }
  0xc4   :  { %v2228_v32 = vrot.slane %v2099_v15, 7  ;;  %v2230_v33 = vrot.slane %v2105_v10, 6  ;;  %v2140_v35 = vsel %vm2139_vm1, %v2138_v23, %v2137_v25  ;;  %v2232_v36 = vrot.slane %v2111_v11, 5 }
  0xc5   :  { %v2234_v37 = vrot.slane %v2117_v16, 4  ;;  %v2236_v38 = vrot.slane %v2123_v17, 3  ;;  %v2143_v40 = vsel %vm2142_vm2, %v2141_v24, %v2140_v35  ;;  %v2227_v41 = vsel %vm2136_vm0, %v2093_v9, %v2226_v31  ;;  %v9264_v16 = vld [vmem:[#allocation4 + $0x300] ss:$24 sps:$4 sm:$0xff]  }
  0xc6   :  { %v2238_v42 = vrot.slane %v2129_v18, 2  ;;  %v830_v34 = vrot.slane %v10760_v56, %v10750_v48  ;;  %v2146_v43 = vsel %vm2145_vm3, %v2144_v26, %v2143_v40  ;;  %v2229_v45 = vsel %vm2139_vm1, %v2228_v32, %v2227_v41  ;;  %v9267_v17 = vld [vmem:[#allocation4 + $0x308] ss:$24 sps:$4 sm:$0xff]   ;;  %v9273_v41 = vld [vmem:[#allocation4 + $0x338] ss:$24 sps:$4 sm:$0xff]  }
  0xc7   :  { %v854_v46 = vrot.slane %v10765_v57, %v10750_v48  ;;  %v878_v49 = vrot.slane %v10770_v58, %v10750_v48  ;;  %v2149_v50 = vsel %vm2148_vm4, %v2147_v27, %v2146_v43  ;;  %v2231_v52 = vsel %vm2142_vm2, %v2230_v33, %v2229_v45  ;;  %v9272_v27 = vld [vmem:[#allocation4 + $0x334] ss:$24 sps:$4 sm:$0xff]   ;;  %v9270_v40 = vld [vmem:[#allocation4 + $0x330] ss:$24 sps:$4 sm:$0xff]  }
  0xc8   :  { %v902_v54 = vrot.slane %v10785_v62, %v10750_v48  ;;  %v926_v60 = vrot.slane %v10790_v63, %v10750_v48  ;;  %v2152_v51 = vsel %vm2151_vm5, %v2150_v28, %v2149_v50  ;;  %v2233_v55 = vsel %vm2145_vm3, %v2232_v36, %v2231_v52  ;;  %v9275_v28 = vld [vmem:[#allocation4 + $0x33c] ss:$24 sps:$4 sm:$0xff]   ;;  %v9281_v45 = vld [vmem:[#allocation4 + $0x36c] ss:$24 sps:$4 sm:$0xff]  }
  0xc9   :  { %v950_v59 = vrot.slane %v10795_v0, %v10750_v48  ;;  %v974_v1 = vrot.slane %v10810_v4, %v10750_v48  ;;  %v2155_v2 = vsel %vm2154_vm6, %v2153_v29, %v2152_v51  ;;  %v2235_v3 = vsel %vm2148_vm4, %v2234_v37, %v2233_v55 }
  0xca   :  { %v998_v7 = vrot.slane %v10815_v5, %v10750_v48  ;;  %v1022_v8 = vrot.slane %v10820_v6, %v10750_v48  ;;  %v2237_v9 = vsel %vm2151_vm5, %v2236_v38, %v2235_v3  ;;  %v1046_v15 = vrot.slane %v10831_v12, %v10750_v48 }
  0xcb   :  { %v1070_v10 = vrot.slane %v10836_v13, %v10750_v48  ;;  %v1094_v11 = vrot.slane %v10841_v14, %v10750_v48  ;;  %v2239_v18 = vsel %vm2154_vm6, %v2238_v42, %v2237_v9  ;;  %v1118_v22 = vrot.slane %v10852_v19, %v10750_v48  ;;  %v9284_v9 = vld [vmem:[#allocation4 + $0x394] ss:$24 sps:$4 sm:$0xff]  }
  0xcc   :  { %v1142_v23 = vrot.slane %v10857_v20, %v10750_v48  ;;  %v1166_v24 = vrot.slane %v10862_v21, %v10750_v48  ;;  %v10974_v26 = vpack.c.b16 %v2239_v18, %v2155_v2  ;;  %v1274_v29 = vpack.c.bf16 %v10780_v61, %v10780_v61 }
  0xcd   :  { %v1280_v25 = vpack.c.bf16 %v830_v34, %v830_v34  ;;  %v1286_v31 = vpack.c.bf16 %v854_v46, %v854_v46  ;;  %v1292_v32 = vpack.c.bf16 %v878_v49, %v878_v49  ;;  %v1298_v33 = vpack.c.bf16 %v902_v54, %v902_v54  ;;  %v9278_v34 = vld [vmem:[#allocation4 + $0x364] ss:$24 sps:$4 sm:$0xff]  }
  0xce   :  { %v1304_v35 = vpack.c.bf16 %v926_v60, %v926_v60  ;;  %v1310_v36 = vpack.c.bf16 %v950_v59, %v950_v59  ;;  %3795 = vmatmul.mubr.bf16.vlgmr.msra.gmra.mrb[0].mxu0 %v10974_v26  ;;  %3924 = vmatmul.mubr.bf16.vlgmr.msra.gmra.mrb[0].mxu1 %v10974_v26  ;;  %v1316_v37 = vpack.c.bf16 %v974_v1, %v974_v1  ;;  %v2042_v50 = vunpack.c.l.b16 %v1274_v29  ;;  %v9276_v59 = vld [vmem:[#allocation4 + $0x360] ss:$24 sps:$4 sm:$0xff]  }
  0xcf   :  { %v1322_v38 = vpack.c.bf16 %v998_v7, %v998_v7  ;;  %v1328_v48 = vpack.c.bf16 %v1022_v8, %v1022_v8  ;;  %3806 = vmatpush1.bf16.msra.mxu0 %v9264_v16  ;;  %3935 = vmatpush1.bf16.msra.mxu1 %v9267_v17  ;;  %v1334_v42 = vpack.c.bf16 %v1046_v15, %v1046_v15  ;;  %v2054_v52 = vunpack.c.l.b16 %v1286_v31  ;;  %v9279_v8 = vld [vmem:[#allocation4 + $0x368] ss:$24 sps:$4 sm:$0xff]   ;;  %v9287_v17 = vld [vmem:[#allocation4 + $0x39c] ss:$24 sps:$4 sm:$0xff]  }
  0xd0   :  { %v1340_v43 = vpack.c.bf16 %v1070_v10, %v1070_v10  ;;  %v1346_v61 = vpack.c.bf16 %v1094_v11, %v1094_v11  ;;  %3807 = vmatprep.subr.bf16.mxu0 %v9272_v27  ;;  %3936 = vmatprep.subr.bf16.mxu1 %v9275_v28  ;;  %v1352_v46 = vpack.c.bf16 %v1118_v22, %v1118_v22  ;;  %v2060_v60 = vunpack.c.l.b16 %v1292_v32  ;;  %v9282_v27 = vld [vmem:[#allocation4 + $0x390] ss:$24 sps:$4 sm:$0xff]  }
  0xd1   :  { %v1358_v49 = vpack.c.bf16 %v1142_v23, %v1142_v23  ;;  %v1364_v54 = vpack.c.bf16 %v1166_v24, %v1166_v24  ;;  %v2066_v51 = vunpack.c.l.b16 %v1298_v33  ;;  %v2072_v55 = vunpack.c.l.b16 %v1304_v35  ;;  %v9285_v28 = vld [vmem:[#allocation4 + $0x398] ss:$24 sps:$4 sm:$0xff]  }
  0xd2   :  { %v2048_v1 = vunpack.c.l.b16 %v1280_v25  ;;  %v2078_v2 = vunpack.c.l.b16 %v1310_v36  ;;  %v2090_v3 = vunpack.c.l.b16 %v1322_v38  ;;  %v2102_v7 = vunpack.c.l.b16 %v1334_v42  ;;  %v9290_v38 = vld [vmem:[#allocation4 + $0x3c4] ss:$24 sps:$4 sm:$0xff]  }
  0xd3   :  { %3808 = vmatpush1.bf16.msra.mxu0 %v9270_v40  ;;  %3937 = vmatpush1.bf16.msra.mxu1 %v9273_v41  ;;  %v2084_v15 = vunpack.c.l.b16 %v1316_v37  ;;  %v2096_v10 = vunpack.c.l.b16 %v1328_v48  ;;  %v2108_v11 = vunpack.c.l.b16 %v1340_v43  ;;  %v2114_v16 = vunpack.c.l.b16 %v1346_v61  ;;  %v9293_v43 = vld [vmem:[#allocation4 + $0x3cc] ss:$24 sps:$4 sm:$0xff]  }
  0xd4   :  { %3809 = vmatprep.subr.bf16.mxu0 %v9278_v34  ;;  %3938 = vmatprep.subr.bf16.mxu1 %v9281_v45  ;;  %v2120_v18 = vunpack.c.l.b16 %v1352_v46  ;;  %v2184_v22 = vrot.slane %v2042_v50, 1  ;;  %v2186_v23 = vrot.slane %v2054_v52, 7  ;;  %v2188_v24 = vrot.slane %v2060_v60, 6 }
  0xd5   :  { %v2126_v29 = vunpack.c.l.b16 %v1358_v49  ;;  %v2132_v25 = vunpack.c.l.b16 %v1364_v54  ;;  %v2190_v31 = vrot.slane %v2066_v51, 5  ;;  %v2192_v32 = vrot.slane %v2072_v55, 4  ;;  %v9288_v55 = vld [vmem:[#allocation4 + $0x3c0] ss:$24 sps:$4 sm:$0xff]  }
  0xd6   :  { %v2185_v33 = vsel %vm2136_vm0, %v2048_v1, %v2184_v22  ;;  %v2268_v35 = vrot.slane %v2090_v3, 1  ;;  %v2270_v36 = vrot.slane %v2102_v7, 7  ;;  %v2272_v37 = vrot.slane %v2108_v11, 6  ;;  %v9296_v3 = vld [vmem:[#allocation4 + $0x3f4] ss:$24 sps:$4 sm:$0xff]  }
  0xd7   :  { %3810 = vmatpush1.bf16.msra.mxu0 %v9276_v59  ;;  %3939 = vmatpush1.bf16.msra.mxu1 %v9279_v8  ;;  %v2187_v48 = vsel %vm2139_vm1, %v2186_v23, %v2185_v33  ;;  %v2194_v40 = vrot.slane %v2078_v2, 3  ;;  %v2274_v41 = vrot.slane %v2114_v16, 5  ;;  %v10983_v42 = vsub.s32 5, %v10741_v39  ;;  %v9291_v59 = vld [vmem:[#allocation4 + $0x3c8] ss:$24 sps:$4 sm:$0xff]  }
  0xd8   :  { %3811 = vmatprep.subr.bf16.mxu0 %v9284_v9  ;;  %3940 = vmatprep.subr.bf16.mxu1 %v9287_v17  ;;  %v2189_v61 = vsel %vm2142_vm2, %v2188_v24, %v2187_v48  ;;  %v2196_v34 = vrot.slane %v2084_v15, 2  ;;  %v2269_v45 = vsel %vm2136_vm0, %v2096_v10, %v2268_v35  ;;  %v2276_v46 = vrot.slane %v2120_v18, 4  ;;  %v9299_v7 = vld [vmem:[#allocation4 + $0x3fc] ss:$24 sps:$4 sm:$0xff]   ;;  %v9294_v17 = vld [vmem:[#allocation4 + $0x3f0] ss:$24 sps:$4 sm:$0xff]  }
  0xd9   :  { %12025 = vst [vmem:[#allocation19_spill] sm:$0xff] %v10983_v42  ;;  %v2191_v49 = vsel %vm2145_vm3, %v2190_v31, %v2189_v61  ;;  %v2271_v50 = vsel %vm2139_vm1, %v2270_v36, %v2269_v45  ;;  %v2278_v52 = vrot.slane %v2126_v29, 3  ;;  %v2280_v51 = vrot.slane %v2132_v25, 2  ;;  %v9297_v18 = vld [vmem:[#allocation4 + $0x3f8] ss:$24 sps:$4 sm:$0xff]  }
  0xda   :  { %v2193_v54 = vsel %vm2148_vm4, %v2192_v32, %v2191_v49  ;;  %v2273_v60 = vsel %vm2142_vm2, %v2272_v37, %v2271_v50  ;;  %v802_v15 = vrot.slane %v10755_v53, %v10983_v42  ;;  %v994_v16 = vrot.slane %v10815_v5, %v10983_v42  ;;  %v9302_v53 = vld [vmem:[#allocation4 + $0x424] ss:$24 sps:$4 sm:$0xff]   ;;  %v9300_v31 = vld [vmem:[#allocation4 + $0x420] ss:$24 sps:$4 sm:$0xff]   ;;  %v9306_v48 = vld [vmem:[#allocation4 + $0x450] ss:$24 sps:$4 sm:$0xff]  }
  0xdb   :  { %3812 = vmatpush1.bf16.msra.mxu0 %v9282_v27  ;;  %3941 = vmatpush1.bf16.msra.mxu1 %v9285_v28  ;;  %v2195_v1 = vsel %vm2151_vm5, %v2194_v40, %v2193_v54  ;;  %v2275_v2 = vsel %vm2145_vm3, %v2274_v41, %v2273_v60  ;;  %v850_v23 = vrot.slane %v10765_v57, %v10983_v42  ;;  %v9305_v27 = vld [vmem:[#allocation4 + $0x42c] ss:$24 sps:$4 sm:$0xff]   ;;  %v9303_v32 = vld [vmem:[#allocation4 + $0x428] ss:$24 sps:$4 sm:$0xff]   ;;  %v9311_v35 = vld [vmem:[#allocation4 + $0x45c] ss:$24 sps:$4 sm:$0xff]  }
  0xdc   :  { %3813 = vmatprep.subr.bf16.mxu0 %v9290_v38  ;;  %3942 = vmatprep.subr.bf16.mxu1 %v9293_v43  ;;  %v2197_v8 = vsel %vm2154_vm6, %v2196_v34, %v2195_v1  ;;  %v2277_v9 = vsel %vm2148_vm4, %v2276_v46, %v2275_v2  ;;  %v1042_v24 = vrot.slane %v10831_v12, %v10983_v42  ;;  %v9309_v61 = vld [vmem:[#allocation4 + $0x458] ss:$24 sps:$4 sm:$0xff]   ;;  %v9314_v34 = vld [vmem:[#allocation4 + $0x484] ss:$24 sps:$4 sm:$0xff]  }
  0xdd   :  { %v2279_v10 = vsel %vm2151_vm5, %v2278_v52, %v2277_v9  ;;  %v826_v28 = vrot.slane %v10760_v56, %v10983_v42  ;;  %v1018_v5 = vrot.slane %v10820_v6, %v10983_v42  ;;  %v1273_v29 = vpack.c.bf16 %v802_v15, %v802_v15  ;;  %v9308_v6 = vld [vmem:[#allocation4 + $0x454] ss:$24 sps:$4 sm:$0xff]  }
  0xde   :  { %v2281_v11 = vsel %vm2154_vm6, %v2280_v51, %v2279_v10  ;;  %v874_v57 = vrot.slane %v10770_v58, %v10983_v42  ;;  %v1066_v12 = vrot.slane %v10836_v13, %v10983_v42  ;;  %v1321_v25 = vpack.c.bf16 %v994_v16, %v994_v16  ;;  %v9317_v50 = vld [vmem:[#allocation4 + $0x48c] ss:$24 sps:$4 sm:$0xff]   ;;  %v9323_v10 = vld [vmem:[#allocation4 + $0x4bc] ss:$24 sps:$4 sm:$0xff]  }
  0xdf   :  { %3814 = vmatpush1.bf16.msra.mxu0 %v9288_v55  ;;  %3943 = vmatpush1.bf16.msra.mxu1 %v9291_v59  ;;  %v11001_v22 = vpack.c.b16 %v2281_v11, %v2197_v8  ;;  %v1285_v56 = vpack.c.bf16 %v850_v23, %v850_v23  ;;  %v1333_v33 = vpack.c.bf16 %v1042_v24, %v1042_v24  ;;  %v2041_v38 = vunpack.c.l.b16 %v1273_v29  ;;  %v9312_v55 = vld [vmem:[#allocation4 + $0x480] ss:$24 sps:$4 sm:$0xff]  }
  0xe0   :  { %3815 = vmatprep.subr.bf16.mxu0 %v9296_v3  ;;  %3944 = vmatprep.subr.bf16.mxu1 %v9299_v7  ;;  %v1279_v36 = vpack.c.bf16 %v826_v28, %v826_v28  ;;  %v1327_v37 = vpack.c.bf16 %v1018_v5, %v1018_v5  ;;  %v898_v58 = vrot.slane %v10785_v62, %v10983_v42  ;;  %v2089_v43 = vunpack.c.l.b16 %v1321_v25  ;;  %v9315_v59 = vld [vmem:[#allocation4 + $0x488] ss:$24 sps:$4 sm:$0xff]   ;;  %v9320_v7 = vld [vmem:[#allocation4 + $0x4b4] ss:$24 sps:$4 sm:$0xff]   ;;  %v9321_v5 = vld [vmem:[#allocation4 + $0x4b8] ss:$24 sps:$4 sm:$0xff]  }
  0xe1   :  { %3837 = vmatprep.mubr.bf16.mxu0 %v11001_v22  ;;  %3966 = vmatprep.mubr.bf16.mxu1 %v11001_v22  ;;  %v1090_v13 = vrot.slane %v10841_v14, %v10983_v42  ;;  %v1291_v40 = vpack.c.bf16 %v874_v57, %v874_v57  ;;  %v1339_v41 = vpack.c.bf16 %v1066_v12, %v1066_v12  ;;  %v2053_v46 = vunpack.c.l.b16 %v1285_v56  ;;  %v9318_v28 = vld [vmem:[#allocation4 + $0x4b0] ss:$24 sps:$4 sm:$0xff]   ;;  %v9329_v25 = vld [vmem:[#allocation4 + $0x4ec] ss:$24 sps:$4 sm:$0xff]  }
  0xe2   :  { %v922_v45 = vrot.slane %v10790_v63, %v10983_v42  ;;  %v2101_v49 = vunpack.c.l.b16 %v1333_v33  ;;  %v1114_v62 = vrot.slane %v10852_v19, %v10983_v42  ;;  %v2047_v14 = vunpack.c.l.b16 %v1279_v36  ;;  %v9324_v33 = vld [vmem:[#allocation4 + $0x4e0] ss:$24 sps:$4 sm:$0xff]  }
  0xe3   :  { %3816 = vmatpush1.bf16.msra.mxu0 %v9294_v17  ;;  %3945 = vmatpush1.bf16.msra.mxu1 %v9297_v18  ;;  %v2095_v52 = vunpack.c.l.b16 %v1327_v37  ;;  %v2170_v54 = vrot.slane %v2041_v38, 1  ;;  %v1297_v60 = vpack.c.bf16 %v898_v58, %v898_v58  ;;  %v1345_v51 = vpack.c.bf16 %v1090_v13, %v1090_v13  ;;  %v9327_v38 = vld [vmem:[#allocation4 + $0x4e8] ss:$24 sps:$4 sm:$0xff]   ;;  %v9332_v58 = vld [vmem:[#allocation4 + $0x514] ss:$24 sps:$4 sm:$0xff]  }
  0xe4   :  { %3817 = vmatprep.subr.bf16.mxu0 %v9302_v53  ;;  %3946 = vmatprep.subr.bf16.mxu1 %v9305_v27  ;;  %v946_v1 = vrot.slane %v10795_v0, %v10983_v42  ;;  %v2059_v2 = vunpack.c.l.b16 %v1291_v40  ;;  %v2107_v63 = vunpack.c.l.b16 %v1339_v41  ;;  %v2254_v3 = vrot.slane %v2089_v43, 1  ;;  %v9335_v40 = vld [vmem:[#allocation4 + $0x51c] ss:$24 sps:$4 sm:$0xff]  }
  0xe5   :  { %v1138_v8 = vrot.slane %v10857_v20, %v10983_v42  ;;  %v1303_v19 = vpack.c.bf16 %v922_v45, %v922_v45  ;;  %v2172_v9 = vrot.slane %v2053_v46, 7  ;;  %v2256_v15 = vrot.slane %v2101_v49, 7  ;;  %v9330_v45 = vld [vmem:[#allocation4 + $0x510] ss:$24 sps:$4 sm:$0xff]  }
  0xe6   :  { %v1351_v11 = vpack.c.bf16 %v1114_v62, %v1114_v62  ;;  %v2171_v16 = vsel %vm2136_vm0, %v2047_v14, %v2170_v54  ;;  %v2255_v0 = vsel %vm2136_vm0, %v2095_v52, %v2254_v3  ;;  %v970_v17 = vrot.slane %v10810_v4, %v10983_v42  ;;  %v9326_v4 = vld [vmem:[#allocation4 + $0x4e4] ss:$24 sps:$4 sm:$0xff]  }
  0xe7   :  { %3818 = vmatpush1.bf16.msra.mxu0 %v9300_v31  ;;  %3947 = vmatpush1.bf16.msra.mxu1 %v9303_v32  ;;  %v2065_v18 = vunpack.c.l.b16 %v1297_v60  ;;  %v2113_v23 = vunpack.c.l.b16 %v1345_v51  ;;  %v1162_v24 = vrot.slane %v10862_v21, %v10983_v42  ;;  %v1309_v20 = vpack.c.bf16 %v946_v1, %v946_v1  ;;  %v9338_v52 = vld [vmem:[#allocation4 + $0x544] ss:$24 sps:$4 sm:$0xff]   ;;  %v9336_v1 = vld [vmem:[#allocation4 + $0x540] ss:$24 sps:$4 sm:$0xff]  }
  0xe8   :  { %3819 = vmatprep.subr.bf16.mxu0 %v9308_v6  ;;  %3948 = vmatprep.subr.bf16.mxu1 %v9311_v35  ;;  %v2174_v53 = vrot.slane %v2059_v2, 6  ;;  %v2258_v27 = vrot.slane %v2107_v63, 6  ;;  %v1357_v29 = vpack.c.bf16 %v1138_v8, %v1138_v8  ;;  %v2173_v57 = vsel %vm2139_vm1, %v2172_v9, %v2171_v16  ;;  %v9341_v54 = vld [vmem:[#allocation4 + $0x54c] ss:$24 sps:$4 sm:$0xff]   ;;  %v9339_v2 = vld [vmem:[#allocation4 + $0x548] ss:$24 sps:$4 sm:$0xff]  }
  0xe9   :  { %v2257_v12 = vsel %vm2139_vm1, %v2256_v15, %v2255_v0  ;;  %v2071_v31 = vunpack.c.l.b16 %v1303_v19  ;;  %v2119_v32 = vunpack.c.l.b16 %v1351_v11  ;;  %v2176_v56 = vrot.slane %v2065_v18, 5  ;;  %v9347_v8 = vld [vmem:[#allocation4 + $0x57c] ss:$24 sps:$4 sm:$0xff]   ;;  %v9342_v19 = vld [vmem:[#allocation4 + $0x570] ss:$24 sps:$4 sm:$0xff]  }
  0xea   :  { %v2260_v21 = vrot.slane %v2113_v23, 5  ;;  %v1315_v6 = vpack.c.bf16 %v970_v17, %v970_v17  ;;  %v1363_v35 = vpack.c.bf16 %v1162_v24, %v1162_v24  ;;  %v2175_v36 = vsel %vm2142_vm2, %v2174_v53, %v2173_v57  ;;  %v9345_v9 = vld [vmem:[#allocation4 + $0x578] ss:$24 sps:$4 sm:$0xff]   ;;  %v9350_v11 = vld [vmem:[#allocation4 + $0x5a4] ss:$24 sps:$4 sm:$0xff]  }
  0xeb   :  { %3820 = vmatpush1.bf16.msra.mxu0 %v9306_v48  ;;  %3949 = vmatpush1.bf16.msra.mxu1 %v9309_v61  ;;  %v2259_v37 = vsel %vm2142_vm2, %v2258_v27, %v2257_v12  ;;  %v2077_v13 = vunpack.c.l.b16 %v1309_v20  ;;  %v2125_v48 = vunpack.c.l.b16 %v1357_v29  ;;  %v2178_v41 = vrot.slane %v2071_v31, 4  ;;  %v9353_v16 = vld [vmem:[#allocation4 + $0x5ac] ss:$24 sps:$4 sm:$0xff]   ;;  %v11050_v0 = vld [vmem:[%s12004_s0 + $0x8] sm:$0xf] }
  0xec   :  { %3821 = vmatprep.subr.bf16.mxu0 %v9314_v34  ;;  %3950 = vmatprep.subr.bf16.mxu1 %v9317_v50  ;;  %v2262_v43 = vrot.slane %v2119_v32, 4  ;;  %v2177_v61 = vsel %vm2145_vm3, %v2176_v56, %v2175_v36  ;;  %v2261_v34 = vsel %vm2145_vm3, %v2260_v21, %v2259_v37  ;;  %v2083_v46 = vunpack.c.l.b16 %v1315_v6  ;;  %v9333_v50 = vld [vmem:[#allocation4 + $0x518] ss:$24 sps:$4 sm:$0xff]   ;;  %v11055_v17 = vld [vmem:[%s12004_s0 + $0x14] sm:$0xf] }
  0xed   :  { %v2131_v49 = vunpack.c.l.b16 %v1363_v35  ;;  %v2180_v62 = vrot.slane %v2077_v13, 3  ;;  %v2264_v14 = vrot.slane %v2125_v48, 3  ;;  %v2179_v60 = vsel %vm2148_vm4, %v2178_v41, %v2177_v61  ;;  %v11060_v18 = vld [vmem:[%s12004_s0 + $0x20] sm:$0xf]  ;;  %v11065_v23 = vld [vmem:[%s12004_s0 + $0x2c] sm:$0xf] }
  0xee   :  { %v2263_v51 = vsel %vm2148_vm4, %v2262_v43, %v2261_v34  ;;  %v814_v24 = vrot.slane %v11050_v0, %v10744_v44  ;;  %v9348_v20 = vld [vmem:[#allocation4 + $0x5a0] ss:$24 sps:$4 sm:$0xff]   ;;  %v11084_v29 = vld [vmem:[%s12004_s0 + $0x50] sm:$0xf]  ;;  %v11088_v57 = vrot.slane %v11055_v17, %v10744_v44  ;;  %v862_v12 = vrot.slane %v11060_v18, %v10744_v44  ;;  %v9359_v31 = vld [vmem:[#allocation4 + $0x5dc] ss:$24 sps:$4 sm:$0xff]  }
  0xef   :  { %3822 = vmatpush1.bf16.msra.mxu0 %v9312_v55  ;;  %3951 = vmatpush1.bf16.msra.mxu1 %v9315_v59  ;;  %v2182_v55 = vrot.slane %v2083_v46, 2  ;;  %v2266_v59 = vrot.slane %v2131_v49, 2  ;;  %v2181_v63 = vsel %vm2151_vm5, %v2180_v62, %v2179_v60  ;;  %v2265_v3 = vsel %vm2151_vm5, %v2264_v14, %v2263_v51  ;;  %v9351_v53 = vld [vmem:[#allocation4 + $0x5a8] ss:$24 sps:$4 sm:$0xff]   ;;  %v11097_v32 = vld [vmem:[%s12004_s0 + $0x5c] sm:$0xf] }
  0xf0   :  { %3823 = vmatprep.subr.bf16.mxu0 %v9320_v7  ;;  %3952 = vmatprep.subr.bf16.mxu1 %v9323_v10  ;;  %v9344_v7 = vld [vmem:[#allocation4 + $0x574] ss:$24 sps:$4 sm:$0xff]   ;;  %v11102_v56 = vld [vmem:[%s12004_s0 + $0x68] sm:$0xf]  ;;  %v958_v35 = vrot.slane %v11084_v29, %v10744_v44  ;;  %v1276_v36 = vpack.c.bf16 %v814_v24, %v814_v24  ;;  %v11118_v37 = vld [vmem:[%s12004_s0 + $0x80] sm:$0xf]  ;;  %v982_v13 = vrot.slane %v11097_v32, %v10744_v44 }
  0xf1   :  { %v2183_v15 = vsel %vm2154_vm6, %v2182_v55, %v2181_v63  ;;  %v2267_v10 = vsel %vm2154_vm6, %v2266_v59, %v2265_v3  ;;  %v11107_v21 = vld [vmem:[%s12004_s0 + $0x74] sm:$0xf]  ;;  %v1006_v48 = vrot.slane %v11102_v56, %v10744_v44  ;;  %v11139_v41 = vld [vmem:[%s12004_s0 + $0xa4] sm:$0xf]  ;;  %v11144_v43 = vld [vmem:[%s12004_s0 + $0xb0] sm:$0xf]  ;;  %v1054_v34 = vrot.slane %v11118_v37, %v10744_v44 }
  0xf2   :  { %v11069_v27 = vpack.c.b16 %v2267_v10, %v2183_v15  ;;  %v11149_v61 = vld [vmem:[%s12004_s0 + $0xbc] sm:$0xf]  ;;  %v1126_v49 = vrot.slane %v11139_v41, %v10744_v44  ;;  %v1282_v14 = vpack.c.bf16 %v11088_v57, %v11088_v57  ;;  %v9354_v55 = vld [vmem:[#allocation4 + $0x5d0] ss:$24 sps:$4 sm:$0xff]   ;;  %v2044_v15 = vunpack.c.l.b16 %v1276_v36 }
  0xf3   :  { %3824 = vmatpush1.bf16.msra.mxu0 %v9318_v28  ;;  %3953 = vmatpush1.bf16.msra.mxu1 %v9321_v5  ;;  %v11074_v28 = vld [vmem:[%s12004_s0 + $0x38] sm:$0xf]  ;;  %v11079_v5 = vld [vmem:[%s12004_s0 + $0x44] sm:$0xf]  ;;  %v1174_v62 = vrot.slane %v11149_v61, %v10744_v44  ;;  %v1324_v63 = vpack.c.bf16 %v1006_v48, %v1006_v48  ;;  %v9371_v36 = vld [vmem:[#allocation4 + $0x63c] ss:$24 sps:$4 sm:$0xff]  }
  0xf4   :  { %3825 = vmatprep.subr.bf16.mxu0 %v9326_v4  ;;  %3954 = vmatprep.subr.bf16.mxu1 %v9329_v25  ;;  %v886_v4 = vrot.slane %v11065_v23, %v10744_v44  ;;  %v9356_v25 = vld [vmem:[#allocation4 + $0x5d4] ss:$24 sps:$4 sm:$0xff]   ;;  %v934_v6 = vrot.slane %v11079_v5, %v10744_v44  ;;  %v9357_v59 = vld [vmem:[#allocation4 + $0x5d8] ss:$24 sps:$4 sm:$0xff]   ;;  %v9362_v3 = vld [vmem:[#allocation4 + $0x604] ss:$24 sps:$4 sm:$0xff]  }
  0xf5   :  { %v1366_v57 = vpack.c.bf16 %v1174_v62, %v1174_v62 }
  0xf6   :  { %v1306_v51 = vpack.c.bf16 %v934_v6, %v934_v6  ;;  %v2092_v6 = vunpack.c.l.b16 %v1324_v63 }
  0xf7   :  { %3826 = vmatpush1.bf16.msra.mxu0 %v9324_v33  ;;  %3955 = vmatpush1.bf16.msra.mxu1 %v9327_v38  ;;  %v910_v33 = vrot.slane %v11074_v28, %v10744_v44  ;;  %v11123_v38 = vld [vmem:[%s12004_s0 + $0x8c] sm:$0xf] }
  0xf8   :  { %3827 = vmatprep.subr.bf16.mxu0 %v9332_v58  ;;  %3956 = vmatprep.subr.bf16.mxu1 %v9335_v40  ;;  %v11128_v58 = vld [vmem:[%s12004_s0 + $0x98] sm:$0xf]  ;;  %v1030_v40 = vrot.slane %v11107_v21, %v10744_v44 }
  0xf9   :  { %v1102_v46 = vrot.slane %v11128_v58, %v10744_v44  ;;  %v1300_v60 = vpack.c.bf16 %v910_v33, %v910_v33  ;;  %v9363_v33 = vld [vmem:[#allocation4 + $0x608] ss:$24 sps:$4 sm:$0xff]  }
  0xfb   :  { %3828 = vmatpush1.bf16.msra.mxu0 %v9330_v45  ;;  %3957 = vmatpush1.bf16.msra.mxu1 %v9333_v50  ;;  %v1078_v45 = vrot.slane %v11123_v38, %v10744_v44  ;;  %v1150_v50 = vrot.slane %v11144_v43, %v10744_v44  ;;  %v1348_v10 = vpack.c.bf16 %v1102_v46, %v1102_v46 }
  0xfc   :  { %3829 = vmatprep.subr.bf16.mxu0 %v9338_v52  ;;  %3958 = vmatprep.subr.bf16.mxu1 %v9341_v54  ;;  %v1288_v52 = vpack.c.bf16 %v862_v12, %v862_v12  ;;  %v1294_v54 = vpack.c.bf16 %v886_v4, %v886_v4  ;;  %v2074_v12 = vunpack.c.l.b16 %v1306_v51  ;;  %v9360_v4 = vld [vmem:[#allocation4 + $0x600] ss:$24 sps:$4 sm:$0xff]  }
  0xfe   :  { %v2056_v24 = vunpack.c.l.b16 %v1288_v52  ;;  %v9369_v52 = vld [vmem:[#allocation4 + $0x638] ss:$24 sps:$4 sm:$0xff]  }
  0xff   :  { %3830 = vmatpush1.bf16.msra.mxu0 %v9336_v1  ;;  %3959 = vmatpush1.bf16.msra.mxu1 %v9339_v2  ;;  %v1312_v1 = vpack.c.bf16 %v958_v35, %v958_v35  ;;  %v1318_v2 = vpack.c.bf16 %v982_v13, %v982_v13  ;;  %v9368_v13 = vld [vmem:[#allocation4 + $0x634] ss:$24 sps:$4 sm:$0xff]  }
 0x100   :  { %3831 = vmatprep.subr.bf16.mxu0 %v9344_v7  ;;  %3960 = vmatprep.subr.bf16.mxu1 %v9347_v8  ;;  %v9365_v7 = vld [vmem:[#allocation4 + $0x60c] ss:$24 sps:$4 sm:$0xff]   ;;  %v1330_v8 = vpack.c.bf16 %v1030_v40, %v1030_v40 }
 0x101   :  { %v2086_v48 = vunpack.c.l.b16 %v1318_v2  ;;  %v2296_v2 = vrot.slane %v2092_v6, 1  ;;  %v9383_v6 = vld [vmem:[#allocation4 + $0x69c] ss:$24 sps:$4 sm:$0xff]  }
 0x102   :  { %v2098_v40 = vunpack.c.l.b16 %v1330_v8 }
 0x103   :  { %3832 = vmatpush1.bf16.msra.mxu0 %v9342_v19  ;;  %3961 = vmatpush1.bf16.msra.mxu1 %v9345_v9  ;;  %v1336_v19 = vpack.c.bf16 %v1054_v34, %v1054_v34  ;;  %v1342_v9 = vpack.c.bf16 %v1078_v45, %v1078_v45  ;;  %v2116_v45 = vunpack.c.l.b16 %v1348_v10  ;;  %v2224_v10 = vrot.slane %v2086_v48, 2 }
 0x104   :  { %3833 = vmatprep.subr.bf16.mxu0 %v9350_v11  ;;  %3962 = vmatprep.subr.bf16.mxu1 %v9353_v16  ;;  %v1354_v11 = vpack.c.bf16 %v1126_v49, %v1126_v49  ;;  %v1360_v16 = vpack.c.bf16 %v1150_v50, %v1150_v50  ;;  %v2212_v49 = vrot.slane %v2044_v15, 1  ;;  %v2214_v50 = vrot.slane %v2056_v24, 7 }
 0x105   :  { %v2104_v35 = vunpack.c.l.b16 %v1336_v19  ;;  %v2110_v34 = vunpack.c.l.b16 %v1342_v9  ;;  %v2302_v9 = vrot.slane %v2116_v45, 5  ;;  %v9381_v45 = vld [vmem:[#allocation4 + $0x698] ss:$24 sps:$4 sm:$0xff]  }
 0x106   :  { %v2122_v46 = vunpack.c.l.b16 %v1354_v11  ;;  %v2297_v11 = vsel %vm2136_vm0, %v2098_v40, %v2296_v2  ;;  %v11193_v2 = vld [vmem:[%s12004_s0 + $0xc] sm:$0xff] }
 0x107   :  { %3834 = vmatpush1.bf16.msra.mxu0 %v9348_v20  ;;  %3963 = vmatpush1.bf16.msra.mxu1 %v9351_v53  ;;  %v2062_v20 = vunpack.c.l.b16 %v1294_v54  ;;  %v2068_v53 = vunpack.c.l.b16 %v1300_v60  ;;  %v2128_v54 = vunpack.c.l.b16 %v1360_v16  ;;  %v2134_v60 = vunpack.c.l.b16 %v1366_v57 }
 0x108   :  { %3835 = vmatprep.subr.bf16.mxu0 %v9356_v25  ;;  %3964 = vmatprep.subr.bf16.mxu1 %v9359_v31  ;;  %v2050_v25 = vunpack.c.l.b16 %v1282_v14  ;;  %v2080_v31 = vunpack.c.l.b16 %v1312_v1  ;;  %v9366_v14 = vld [vmem:[#allocation4 + $0x630] ss:$24 sps:$4 sm:$0xff]   ;;  %v2298_v63 = vrot.slane %v2104_v35, 7  ;;  %v2304_v16 = vrot.slane %v2122_v46, 4 }
 0x109   :  { %v2216_v62 = vrot.slane %v2062_v20, 6  ;;  %v2218_v51 = vrot.slane %v2068_v53, 5  ;;  %v2306_v20 = vrot.slane %v2128_v54, 3  ;;  %v9372_v53 = vld [vmem:[#allocation4 + $0x660] ss:$24 sps:$4 sm:$0xff]   ;;  %v11186_v54 = vsub.s32 2, %v10741_v39 }
 0x10a   :  { %v2213_v1 = vsel %vm2136_vm0, %v2050_v25, %v2212_v49  ;;  %v2222_v19 = vrot.slane %v2080_v31, 3  ;;  %v2299_v57 = vsel %vm2139_vm1, %v2298_v63, %v2297_v11  ;;  %v2308_v25 = vrot.slane %v2134_v60, 2  ;;  %v9380_v31 = vld [vmem:[#allocation4 + $0x694] ss:$24 sps:$4 sm:$0xff]   ;;  %v9386_v49 = vld [vmem:[#allocation4 + $0x6c4] ss:$24 sps:$4 sm:$0xff]  }
 0x10b   :  { %3836 = vmatpush1.bf16.msra.mxu0 %v9354_v55  ;;  %3965 = vmatpush1.bf16.msra.mxu1 %v9357_v59  ;;  %v2220_v55 = vrot.slane %v2074_v12, 4  ;;  %v9374_v59 = vld [vmem:[#allocation4 + $0x664] ss:$24 sps:$4 sm:$0xff]   ;;  %v2215_v8 = vsel %vm2139_vm1, %v2214_v50, %v2213_v1  ;;  %v9375_v12 = vld [vmem:[#allocation4 + $0x668] ss:$24 sps:$4 sm:$0xff]   ;;  %12026 = vst [vmem:[#allocation20_spill] sm:$0xff] %v11186_v54  ;;  %v810_v1 = vrot.slane %v11050_v0, %v10747_v47 }
 0x10c   :  { %3848 = vmatprep.subr.bf16.mxu0 %v9362_v3  ;;  %3977 = vmatprep.subr.bf16.mxu1 %v9365_v7  ;;  %v2300_v3 = vrot.slane %v2110_v34, 6  ;;  %v9377_v7 = vld [vmem:[#allocation4 + $0x66c] ss:$24 sps:$4 sm:$0xff]   ;;  %v2217_v15 = vsel %vm2142_vm2, %v2216_v62, %v2215_v8  ;;  %v9378_v34 = vld [vmem:[#allocation4 + $0x690] ss:$24 sps:$4 sm:$0xff]   ;;  %v11197_v63 = vrot.slane %v11193_v2, %v11186_v54  ;;  %v11229_v11 = vld [vmem:[%s12004_s0 + $0x78] sm:$0xff] }
 0x10d   :  { %v2219_v24 = vsel %vm2145_vm3, %v2218_v51, %v2217_v15  ;;  %v9389_v50 = vld [vmem:[#allocation4 + $0x6cc] ss:$24 sps:$4 sm:$0xff]   ;;  %v9395_v51 = vld [vmem:[#allocation4 + $0x6fc] ss:$24 sps:$4 sm:$0xff]  }
 0x10e   :  { %3838 = vmatmul.mubr.bf16.vlgmr.msra.gmra.mrb[0].mxu0 %v11069_v27  ;;  %3967 = vmatmul.mubr.bf16.vlgmr.msra.gmra.mrb[0].mxu1 %v11069_v27  ;;  %v9392_v60 = vld [vmem:[#allocation4 + $0x6f4] ss:$24 sps:$4 sm:$0xff]   ;;  %v9398_v0 = vld [vmem:[#allocation4 + $0x724] ss:$24 sps:$4 sm:$0xff]  }
 0x10f   :  { %3849 = vmatpush1.bf16.msra.mxu0 %v9360_v4  ;;  %3978 = vmatpush1.bf16.msra.mxu1 %v9363_v33  ;;  %v2221_v4 = vsel %vm2148_vm4, %v2220_v55, %v2219_v24  ;;  %v2301_v33 = vsel %vm2142_vm2, %v2300_v3, %v2299_v57  ;;  %v9390_v55 = vld [vmem:[#allocation4 + $0x6f0] ss:$24 sps:$4 sm:$0xff]   ;;  %v9401_v8 = vld [vmem:[#allocation4 + $0x72c] ss:$24 sps:$4 sm:$0xff]   ;;  %v11220_v15 = vld [vmem:[%s12004_s0 + $0x18] sm:$0xff]  ;;  %v834_v24 = vrot.slane %v11055_v17, %v10747_v47 }
 0x110   :  { %3850 = vmatprep.subr.bf16.mxu0 %v9368_v13  ;;  %3979 = vmatprep.subr.bf16.mxu1 %v9371_v36  ;;  %v2223_v35 = vsel %vm2151_vm5, %v2222_v19, %v2221_v4  ;;  %v2303_v13 = vsel %vm2145_vm3, %v2302_v9, %v2301_v33  ;;  %v11202_v3 = vld [vmem:[%s12004_s0 + $0x6c] sm:$0xff]  ;;  %v11211_v19 = vld [vmem:[%s12004_s0] sm:$0xff]  ;;  %v858_v33 = vrot.slane %v11060_v18, %v10747_v47 }
 0x111   :  { %v2225_v36 = vsel %vm2154_vm6, %v2224_v10, %v2223_v35  ;;  %v2305_v48 = vsel %vm2148_vm4, %v2304_v16, %v2303_v13  ;;  %v11215_v9 = vrot.slane %v11211_v19, %v11186_v54  ;;  %v11224_v10 = vrot.slane %v11220_v15, %v11186_v54  ;;  %v11240_v57 = vld [vmem:[%s12004_s0 + $0x24] sm:$0xff]  ;;  %v9396_v35 = vld [vmem:[#allocation4 + $0x720] ss:$24 sps:$4 sm:$0xff]  }
 0x112   :  { %v2307_v40 = vsel %vm2151_vm5, %v2306_v20, %v2305_v48  ;;  %v11233_v16 = vrot.slane %v11229_v11, %v11186_v54  ;;  %v11244_v20 = vrot.slane %v11240_v57, %v11186_v54  ;;  %v11258_v17 = vld [vmem:[%s12004_s0 + $0x60] sm:$0xff]  ;;  %v1002_v48 = vrot.slane %v11102_v56, %v10747_v47 }
 0x113   :  { %3851 = vmatpush1.bf16.msra.mxu0 %v9366_v14  ;;  %3980 = vmatpush1.bf16.msra.mxu1 %v9369_v52  ;;  %v2309_v46 = vsel %vm2154_vm6, %v2308_v25, %v2307_v40  ;;  %v9384_v14 = vld [vmem:[#allocation4 + $0x6c0] ss:$24 sps:$4 sm:$0xff]   ;;  %v11262_v4 = vrot.slane %v11258_v17, %v11186_v54  ;;  %v882_v25 = vrot.slane %v11065_v23, %v10747_v47  ;;  %v9404_v23 = vld [vmem:[#allocation4 + $0x754] ss:$24 sps:$4 sm:$0xff]  }
 0x114   :  { %3852 = vmatprep.subr.bf16.mxu0 %v9374_v59  ;;  %3981 = vmatprep.subr.bf16.mxu1 %v9377_v7  ;;  %v11181_v62 = vpack.c.b16 %v2309_v46, %v2225_v36  ;;  %v9387_v52 = vld [vmem:[#allocation4 + $0x6c8] ss:$24 sps:$4 sm:$0xff]   ;;  %v9393_v59 = vld [vmem:[#allocation4 + $0x6f8] ss:$24 sps:$4 sm:$0xff]   ;;  %v11206_v7 = vrot.slane %v11202_v3, %v11186_v54  ;;  %v954_v36 = vrot.slane %v11084_v29, %v10747_v47  ;;  %v9407_v40 = vld [vmem:[#allocation4 + $0x75c] ss:$24 sps:$4 sm:$0xff]  }
 0x115   :  { %v9399_v13 = vld [vmem:[#allocation4 + $0x728] ss:$24 sps:$4 sm:$0xff]   ;;  %v1275_v18 = vpack.c.bf16 %v810_v1, %v810_v1  ;;  %v1074_v29 = vrot.slane %v11123_v38, %v10747_v47  ;;  %v1098_v56 = vrot.slane %v11128_v58, %v10747_v47  ;;  %v1281_v46 = vpack.c.bf16 %v834_v24, %v834_v24 }
 0x116   :  { %3880 = vmatprep.mubr.bf16.mxu0 %v11181_v62  ;;  %4009 = vmatprep.mubr.bf16.mxu1 %v11181_v62  ;;  %v9402_v38 = vld [vmem:[#allocation4 + $0x750] ss:$24 sps:$4 sm:$0xff]  }
 0x117   :  { %3853 = vmatpush1.bf16.msra.mxu0 %v9372_v53  ;;  %3982 = vmatpush1.bf16.msra.mxu1 %v9375_v12  ;;  %v11249_v53 = vld [vmem:[%s12004_s0 + $0x30] sm:$0xff] }
 0x118   :  { %3854 = vmatprep.subr.bf16.mxu0 %v9380_v31  ;;  %3983 = vmatprep.subr.bf16.mxu1 %v9383_v6  ;;  %v11253_v12 = vrot.slane %v11249_v53, %v11186_v54  ;;  %v906_v31 = vrot.slane %v11074_v28, %v10747_v47  ;;  %v930_v6 = vrot.slane %v11079_v5, %v10747_v47 }
 0x119   :  { %v978_v28 = vrot.slane %v11097_v32, %v10747_v47  ;;  %v1026_v5 = vrot.slane %v11107_v21, %v10747_v47  ;;  %v11294_v32 = vrot.slane %v11149_v61, %v10747_v47  ;;  %v1287_v21 = vpack.c.bf16 %v858_v33, %v858_v33  ;;  %v11389_v33 = vld [vmem:[%s12004_s0 + $0x54] sm:$0xff] }
 0x11a   :  { %v1305_v58 = vpack.c.bf16 %v930_v6, %v930_v6  ;;  %v1341_v61 = vpack.c.bf16 %v1074_v29, %v1074_v29  ;;  %v9408_v6 = vld [vmem:[#allocation4 + $0x780] ss:$24 sps:$4 sm:$0xff]   ;;  %v702_v29 = vpack.c.bf16 %v11197_v63, %v11197_v63 }
 0x11b   :  { %3855 = vmatpush1.bf16.msra.mxu0 %v9378_v34  ;;  %3984 = vmatpush1.bf16.msra.mxu1 %v9381_v45  ;;  %v1050_v34 = vrot.slane %v11118_v37, %v10747_v47  ;;  %v1122_v45 = vrot.slane %v11139_v41, %v10747_v47  ;;  %v1293_v37 = vpack.c.bf16 %v882_v25, %v882_v25  ;;  %v9410_v41 = vld [vmem:[#allocation4 + $0x784] ss:$24 sps:$4 sm:$0xff]  }
 0x11c   :  { %3856 = vmatprep.subr.bf16.mxu0 %v9386_v49  ;;  %3985 = vmatprep.subr.bf16.mxu1 %v9389_v50  ;;  %v11290_v49 = vrot.slane %v11144_v43, %v10747_v47  ;;  %v9405_v50 = vld [vmem:[#allocation4 + $0x758] ss:$24 sps:$4 sm:$0xff]   ;;  %v1311_v43 = vpack.c.bf16 %v954_v36, %v954_v36  ;;  %v9437_v25 = vld [vmem:[#allocation4 + $0x84c] ss:$24 sps:$4 sm:$0xff]   ;;  %v9443_v47 = vld [vmem:[#allocation4 + $0x87c] ss:$24 sps:$4 sm:$0xff]  }
 0x11d   :  { %v1335_v1 = vpack.c.bf16 %v1050_v34, %v1050_v34  ;;  %v1353_v24 = vpack.c.bf16 %v1122_v45, %v1122_v45 }
 0x11f   :  { %3857 = vmatpush1.bf16.msra.mxu0 %v9384_v14  ;;  %3986 = vmatpush1.bf16.msra.mxu1 %v9387_v52  ;;  %v1299_v14 = vpack.c.bf16 %v906_v31, %v906_v31  ;;  %v1323_v52 = vpack.c.bf16 %v1002_v48, %v1002_v48  ;;  %v2055_v31 = vunpack.c.l.b16 %v1287_v21  ;;  %v2103_v45 = vunpack.c.l.b16 %v1335_v1 }
 0x120   :  { %3858 = vmatprep.subr.bf16.mxu0 %v9392_v60  ;;  %3987 = vmatprep.subr.bf16.mxu1 %v9395_v51  ;;  %v2043_v60 = vunpack.c.l.b16 %v1275_v18  ;;  %v9413_v51 = vld [vmem:[#allocation4 + $0x78c] ss:$24 sps:$4 sm:$0xff]   ;;  %v750_v21 = vpack.c.bf16 %v11206_v7, %v11206_v7  ;;  %v696_v1 = vpack.c.bf16 %v11215_v9, %v11215_v9 }
 0x121   :  { %v11302_v36 = vunpack.c.l.b16 %v1299_v14  ;;  %v2091_v48 = vunpack.c.l.b16 %v1323_v52  ;;  %v11323_v14 = vld [vmem:[%s12004_s0 + $0x84] sm:$0xff]  ;;  %v9417_v52 = vld [vmem:[#allocation4 + $0x7b8] ss:$24 sps:$4 sm:$0xff]  }
 0x122   :  { %v2198_v18 = vrot.slane %v2043_v60, 1  ;;  %v486_v63 = vrot.slane %v11323_v14, %v11186_v54 }
 0x123   :  { %3859 = vmatpush1.bf16.msra.mxu0 %v9390_v55  ;;  %3988 = vmatpush1.bf16.msra.mxu1 %v9393_v59  ;;  %v1317_v55 = vpack.c.bf16 %v978_v28, %v978_v28  ;;  %v1329_v59 = vpack.c.bf16 %v1026_v5, %v1026_v5  ;;  %v11304_v28 = vunpack.c.l.b16 %v1305_v58  ;;  %v11306_v5 = vunpack.c.l.b16 %v1311_v43  ;;  %v9414_v58 = vld [vmem:[#allocation4 + $0x7b0] ss:$24 sps:$4 sm:$0xff]   ;;  %v9422_v43 = vld [vmem:[#allocation4 + $0x7e4] ss:$24 sps:$4 sm:$0xff]  }
 0x124   :  { %3860 = vmatprep.subr.bf16.mxu0 %v9398_v0  ;;  %3989 = vmatprep.subr.bf16.mxu1 %v9401_v8  ;;  %v1347_v0 = vpack.c.bf16 %v1098_v56, %v1098_v56  ;;  %v2049_v8 = vunpack.c.l.b16 %v1281_v46  ;;  %v11312_v46 = vunpack.c.l.b16 %v1341_v61  ;;  %v2282_v7 = vrot.slane %v2091_v48, 1  ;;  %v9423_v48 = vld [vmem:[#allocation4 + $0x7e8] ss:$24 sps:$4 sm:$0xff]  }
 0x125   :  { %v11308_v34 = vunpack.c.l.b16 %v1317_v55  ;;  %v2097_v56 = vunpack.c.l.b16 %v1329_v59  ;;  %v9425_v55 = vld [vmem:[#allocation4 + $0x7ec] ss:$24 sps:$4 sm:$0xff]   ;;  %v744_v61 = vpack.c.bf16 %v11262_v4, %v11262_v4  ;;  %v714_v4 = vpack.c.bf16 %v11244_v20, %v11244_v20  ;;  %v9431_v20 = vld [vmem:[#allocation4 + $0x81c] ss:$24 sps:$4 sm:$0xff]  }
 0x126   :  { %v2199_v60 = vsel %vm2136_vm0, %v2049_v8, %v2198_v18  ;;  %v2286_v9 = vrot.slane %v11312_v46, 6  ;;  %v9428_v18 = vld [vmem:[#allocation4 + $0x814] ss:$24 sps:$4 sm:$0xff]  }
 0x127   :  { %3861 = vmatpush1.bf16.msra.mxu0 %v9396_v35  ;;  %3990 = vmatpush1.bf16.msra.mxu1 %v9399_v13  ;;  %v9411_v35 = vld [vmem:[#allocation4 + $0x788] ss:$24 sps:$4 sm:$0xff]   ;;  %v11300_v13 = vunpack.c.l.b16 %v1293_v37  ;;  %v11316_v37 = vunpack.c.l.b16 %v1347_v0  ;;  %v4252_v0 = vunpack.c.l.b16 %v702_v29 }
 0x128   :  { %3862 = vmatprep.subr.bf16.mxu0 %v9404_v23  ;;  %3991 = vmatprep.subr.bf16.mxu1 %v9407_v40  ;;  %v9416_v23 = vld [vmem:[#allocation4 + $0x7b4] ss:$24 sps:$4 sm:$0xff]  }
 0x129   :  { %v9419_v40 = vld [vmem:[#allocation4 + $0x7bc] ss:$24 sps:$4 sm:$0xff]   ;;  %v2202_v59 = vrot.slane %v11300_v13, 6  ;;  %v9420_v13 = vld [vmem:[#allocation4 + $0x7e0] ss:$24 sps:$4 sm:$0xff]  }
 0x12b   :  { %3863 = vmatpush1.bf16.msra.mxu0 %v9402_v38  ;;  %3992 = vmatpush1.bf16.msra.mxu1 %v9405_v50  ;;  %v11318_v38 = vunpack.c.l.b16 %v1353_v24  ;;  %v2200_v50 = vrot.slane %v2055_v31, 7  ;;  %v2284_v24 = vrot.slane %v2103_v45, 7  ;;  %v4300_v31 = vunpack.c.l.b16 %v750_v21  ;;  %v11360_v21 = vld [vmem:[%s12004_s0 + $0x9c] sm:$0xff] }
 0x12c   :  { %3864 = vmatprep.subr.bf16.mxu0 %v9410_v41  ;;  %3993 = vmatprep.subr.bf16.mxu1 %v9413_v51  ;;  %v708_v41 = vpack.c.bf16 %v11224_v10, %v11224_v10  ;;  %v756_v51 = vpack.c.bf16 %v11233_v16, %v11233_v16  ;;  %v11341_v10 = vld [vmem:[%s12004_s0 + $0x90] sm:$0xff] }
 0x12d   :  { %v510_v16 = vrot.slane %v11341_v10, %v11186_v54 }
 0x12e   :  { %v4258_v45 = vunpack.c.l.b16 %v708_v41  ;;  %v4306_v46 = vunpack.c.l.b16 %v756_v51  ;;  %v4439_v41 = vrot.slane %v4300_v31, 7  ;;  %v9426_v51 = vld [vmem:[#allocation4 + $0x810] ss:$24 sps:$4 sm:$0xff]  }
 0x12f   :  { %3865 = vmatpush1.bf16.msra.mxu0 %v9408_v6  ;;  %3994 = vmatpush1.bf16.msra.mxu1 %v9411_v35  ;;  %v2201_v6 = vsel %vm2139_vm1, %v2200_v50, %v2199_v60  ;;  %v762_v35 = vpack.c.bf16 %v486_v63, %v486_v63  ;;  %v4246_v50 = vunpack.c.l.b16 %v696_v1  ;;  %v4294_v63 = vunpack.c.l.b16 %v744_v61 }
 0x130   :  { %3866 = vmatprep.subr.bf16.mxu0 %v9416_v23  ;;  %3995 = vmatprep.subr.bf16.mxu1 %v9419_v40  ;;  %v2283_v23 = vsel %vm2136_vm0, %v2097_v56, %v2282_v7  ;;  %v11353_v40 = vld [vmem:[%s12004_s0 + $0x3c] sm:$0xff]  ;;  %v534_v56 = vrot.slane %v11360_v21, %v11186_v54  ;;  %v720_v60 = vpack.c.bf16 %v11253_v12, %v11253_v12  ;;  %v4264_v61 = vunpack.c.l.b16 %v714_v4  ;;  %v11378_v12 = vld [vmem:[%s12004_s0 + $0xa8] sm:$0xff] }
 0x131   :  { %v342_v29 = vrot.slane %v11353_v40, %v11186_v54  ;;  %v768_v7 = vpack.c.bf16 %v510_v16, %v510_v16  ;;  %v4357_v31 = vrot.slane %v4258_v45, 6  ;;  %v2288_v4 = vrot.slane %v11316_v37, 5  ;;  %v11396_v37 = vld [vmem:[%s12004_s0 + $0xb4] sm:$0xff] }
 0x133   :  { %3867 = vmatpush1.bf16.msra.mxu0 %v9414_v58  ;;  %3996 = vmatpush1.bf16.msra.mxu1 %v9417_v52  ;;  %v4355_v58 = vrot.slane %v4252_v0, 7  ;;  %v2203_v52 = vsel %vm2142_vm2, %v2202_v59, %v2201_v6  ;;  %v4312_v0 = vunpack.c.l.b16 %v762_v35  ;;  %v9429_v59 = vld [vmem:[#allocation4 + $0x818] ss:$24 sps:$4 sm:$0xff]   ;;  %v9434_v6 = vld [vmem:[#allocation4 + $0x844] ss:$24 sps:$4 sm:$0xff]   ;;  %v726_v16 = vpack.c.bf16 %v342_v29, %v342_v29 }
 0x134   :  { %3868 = vmatprep.subr.bf16.mxu0 %v9422_v43  ;;  %3997 = vmatprep.subr.bf16.mxu1 %v9425_v55  ;;  %v2285_v43 = vsel %vm2139_vm1, %v2284_v24, %v2283_v23  ;;  %v11371_v55 = vld [vmem:[%s12004_s0 + $0x48] sm:$0xff]  ;;  %v558_v24 = vrot.slane %v11378_v12, %v11186_v54  ;;  %v4441_v23 = vrot.slane %v4306_v46, 6  ;;  %v774_v35 = vpack.c.bf16 %v534_v56, %v534_v56  ;;  %v9432_v46 = vld [vmem:[#allocation4 + $0x840] ss:$24 sps:$4 sm:$0xff]  }
 0x135   :  { %v366_v1 = vrot.slane %v11371_v55, %v11186_v54  ;;  %v2287_v8 = vsel %vm2142_vm2, %v2286_v9, %v2285_v43  ;;  %v390_v29 = vrot.slane %v11389_v33, %v11186_v54  ;;  %v4318_v45 = vunpack.c.l.b16 %v768_v7 }
 0x136   :  { %v4359_v56 = vrot.slane %v4264_v61, 5  ;;  %v2290_v61 = vrot.slane %v11318_v38, 4  ;;  %v9446_v38 = vld [vmem:[#allocation4 + $0x8a4] ss:$24 sps:$4 sm:$0xff]  }
 0x137   :  { %3869 = vmatpush1.bf16.msra.mxu0 %v9420_v13  ;;  %3998 = vmatpush1.bf16.msra.mxu1 %v9423_v48  ;;  %v4356_v13 = vsel %vm2136_vm0, %v4355_v58, %v4246_v50  ;;  %v4440_v48 = vsel %vm2136_vm0, %v4439_v41, %v4294_v63  ;;  %v732_v9 = vpack.c.bf16 %v366_v1, %v366_v1  ;;  %v4443_v50 = vrot.slane %v4312_v0, 5  ;;  %v9435_v63 = vld [vmem:[#allocation4 + $0x848] ss:$24 sps:$4 sm:$0xff]   ;;  %v9440_v58 = vld [vmem:[#allocation4 + $0x874] ss:$24 sps:$4 sm:$0xff]  }
 0x138   :  { %3870 = vmatprep.subr.bf16.mxu0 %v9428_v18  ;;  %3999 = vmatprep.subr.bf16.mxu1 %v9431_v20  ;;  %v4270_v18 = vunpack.c.l.b16 %v720_v60  ;;  %v582_v20 = vrot.slane %v11396_v37, %v11186_v54  ;;  %v12027_v60 = vpack.c.bf16 %v11290_v49, %v11290_v49  ;;  %v780_v41 = vpack.c.bf16 %v558_v24, %v558_v24 }
 0x139   :  { %v4358_v43 = vsel %vm2139_vm1, %v4357_v31, %v4356_v13  ;;  %v4442_v42 = vsel %vm2139_vm1, %v4441_v23, %v4440_v48  ;;  %v2206_v1 = vrot.slane %v11304_v28, 4  ;;  %v4324_v0 = vunpack.c.l.b16 %v774_v35  ;;  %v9438_v31 = vld [vmem:[#allocation4 + $0x870] ss:$24 sps:$4 sm:$0xff]  }
 0x13a   :  { %v2127_v7 = vunpack.c.l.b16 %v12027_v60  ;;  %v2289_v49 = vsel %vm2145_vm3, %v2288_v4, %v2287_v8  ;;  %v4361_v24 = vrot.slane %v4270_v18, 4  ;;  %v4445_v60 = vrot.slane %v4318_v45, 4  ;;  %v9441_v13 = vld [vmem:[#allocation4 + $0x878] ss:$24 sps:$4 sm:$0xff]  }
 0x13b   :  { %3871 = vmatpush1.bf16.msra.mxu0 %v9426_v51  ;;  %4000 = vmatpush1.bf16.msra.mxu1 %v9429_v59  ;;  %v4276_v51 = vunpack.c.l.b16 %v726_v16  ;;  %v12028_v59 = vrot.slane %v11302_v36, 5  ;;  %v738_v23 = vpack.c.bf16 %v390_v29, %v390_v29  ;;  %v4444_v28 = vsel %vm2142_vm2, %v4443_v50, %v4442_v42  ;;  %v9449_v16 = vld [vmem:[#allocation4 + $0x8ac] ss:$24 sps:$4 sm:$0xff]  }
 0x13c   :  { %3872 = vmatprep.subr.bf16.mxu0 %v9434_v6  ;;  %4001 = vmatprep.subr.bf16.mxu1 %v9437_v25  ;;  %v786_v6 = vpack.c.bf16 %v582_v20, %v582_v20  ;;  %v4360_v25 = vsel %vm2142_vm2, %v4359_v56, %v4358_v43  ;;  %v12029_v36 = vpack.c.bf16 %v11294_v32, %v11294_v32  ;;  %v2208_v8 = vrot.slane %v11306_v5, 3  ;;  %v9444_v56 = vld [vmem:[#allocation4 + $0x8a0] ss:$24 sps:$4 sm:$0xff]  }
 0x13d   :  { %v2205_v44 = vsel %vm2145_vm3, %v12028_v59, %v2203_v52  ;;  %v4282_v4 = vunpack.c.l.b16 %v732_v9  ;;  %v4330_v35 = vunpack.c.l.b16 %v780_v41  ;;  %v2292_v29 = vrot.slane %v2127_v7, 3  ;;  %v9447_v32 = vld [vmem:[#allocation4 + $0x8a8] ss:$24 sps:$4 sm:$0xff]   ;;  %v9455_v41 = vld [vmem:[#allocation4 + $0x8dc] ss:$24 sps:$4 sm:$0xff]  }
 0x13e   :  { %v2133_v52 = vunpack.c.l.b16 %v12029_v36  ;;  %v2207_v48 = vsel %vm2148_vm4, %v2206_v1, %v2205_v44  ;;  %v4363_v18 = vrot.slane %v4276_v51, 3  ;;  %v4447_v45 = vrot.slane %v4324_v0, 3  ;;  %v9464_v36 = vld [vmem:[#allocation4 + $0x44] ss:$24 sps:$4 sm:$0xff]  }
 0x13f   :  { %3873 = vmatpush1.bf16.msra.mxu0 %v9432_v46  ;;  %4002 = vmatpush1.bf16.msra.mxu1 %v9435_v63  ;;  %v2291_v42 = vsel %vm2148_vm4, %v2290_v61, %v2289_v49  ;;  %v4362_v46 = vsel %vm2145_vm3, %v4361_v24, %v4360_v25  ;;  %v4446_v20 = vsel %vm2145_vm3, %v4445_v60, %v4444_v28  ;;  %v2210_v50 = vrot.slane %v11308_v34, 2  ;;  %v9450_v34 = vld [vmem:[#allocation4 + $0x8d0] ss:$24 sps:$4 sm:$0xff]  }
 0x140   :  { %3874 = vmatprep.subr.bf16.mxu0 %v9440_v58  ;;  %4003 = vmatprep.subr.bf16.mxu1 %v9443_v47  ;;  %v4288_v5 = vunpack.c.l.b16 %v738_v23  ;;  %v4336_v9 = vunpack.c.l.b16 %v786_v6  ;;  %v9452_v47 = vld [vmem:[#allocation4 + $0x8d4] ss:$24 sps:$4 sm:$0xff]   ;;  %v2209_v44 = vsel %vm2151_vm5, %v2208_v8, %v2207_v48  ;;  %v2294_v63 = vrot.slane %v2133_v52, 2  ;;  %v9453_v49 = vld [vmem:[#allocation4 + $0x8d8] ss:$24 sps:$4 sm:$0xff]  }
 0x141   :  { %v4365_v58 = vrot.slane %v4282_v4, 2  ;;  %v4449_v7 = vrot.slane %v4330_v35, 2  ;;  %v2293_v43 = vsel %vm2151_vm5, %v2292_v29, %v2291_v42  ;;  %v4364_v1 = vsel %vm2148_vm4, %v4363_v18, %v4362_v46  ;;  %v9461_v23 = vld [vmem:[#allocation2 + $0xc] ss:$24 sps:$4 sm:$0xff]   ;;  %v9456_v6 = vld [vmem:[#allocation4 + $0x10] ss:$24 sps:$4 sm:$0xff]  }
 0x142   :  { %v4448_v61 = vsel %vm2148_vm4, %v4447_v45, %v4446_v20  ;;  %v2211_v51 = vsel %vm2154_vm6, %v2210_v50, %v2209_v44  ;;  %v4367_v0 = vrot.slane %v4288_v5, 1  ;;  %v4451_v59 = vrot.slane %v4336_v9, 1  ;;  %v9459_v25 = vld [vmem:[#allocation2 + $0x8] ss:$24 sps:$4 sm:$0xff]   ;;  %v9467_v52 = vld [vmem:[#allocation2 + $0x3c] ss:$24 sps:$4 sm:$0xff]  }
 0x143   :  { %3875 = vmatpush1.bf16.msra.mxu0 %v9438_v31  ;;  %4004 = vmatpush1.bf16.msra.mxu1 %v9441_v13  ;;  %v2295_v24 = vsel %vm2154_vm6, %v2294_v63, %v2293_v43  ;;  %v4366_v60 = vsel %vm2151_vm5, %v4365_v58, %v4364_v1  ;;  %v4450_v31 = vsel %vm2151_vm5, %v4449_v7, %v4448_v61  ;;  %v9458_v13 = vld [vmem:[#allocation4 + $0x14] ss:$24 sps:$4 sm:$0xff]   ;;  %v9462_v4 = vld [vmem:[#allocation4 + $0x40] ss:$24 sps:$4 sm:$0xff]   ;;  %v9468_v18 = vld [vmem:[#allocation4 + $0x70] ss:$24 sps:$4 sm:$0xff]  }
 0x144   :  { %3876 = vmatprep.subr.bf16.mxu0 %v9446_v38  ;;  %4005 = vmatprep.subr.bf16.mxu1 %v9449_v16  ;;  %v11430_v28 = vpack.c.b16 %v2295_v24, %v2211_v51  ;;  %v4368_v38 = vsel %vm2154_vm6, %v4367_v0, %v4366_v60  ;;  %v4452_v16 = vsel %vm2154_vm6, %v4451_v59, %v4450_v31  ;;  %v9465_v35 = vld [vmem:[#allocation2 + $0x38] ss:$24 sps:$4 sm:$0xff]   ;;  %v9470_v48 = vld [vmem:[#allocation4 + $0x74] ss:$24 sps:$4 sm:$0xff]   ;;  %v9471_v45 = vld [vmem:[#allocation2 + $0x68] ss:$24 sps:$4 sm:$0xff]  }
 0x145   :  { %v11434_v8 = vpack.c.b16 %v4452_v16, %v4368_v38  ;;  %v9473_v29 = vld [vmem:[#allocation2 + $0x6c] ss:$24 sps:$4 sm:$0xff]   ;;  %v9479_v46 = vld [vmem:[#allocation2 + $0x9c] ss:$24 sps:$4 sm:$0xff]   ;;  %v9474_v20 = vld [vmem:[#allocation4 + $0xa0] ss:$24 sps:$4 sm:$0xff]  }
 0x146   :  { %v9476_v42 = vld [vmem:[#allocation4 + $0xa4] ss:$24 sps:$4 sm:$0xff]   ;;  %v9480_v5 = vld [vmem:[#allocation4 + $0xd0] ss:$24 sps:$4 sm:$0xff]   ;;  %v9486_v63 = vld [vmem:[#allocation4 + $0x100] ss:$24 sps:$4 sm:$0xff]  }
 0x147   :  { %3877 = vmatpush1.bf16.msra.mxu0 %v9444_v56  ;;  %4006 = vmatpush1.bf16.msra.mxu1 %v9447_v32  ;;  %v9477_v56 = vld [vmem:[#allocation2 + $0x98] ss:$24 sps:$4 sm:$0xff]   ;;  %v9482_v32 = vld [vmem:[#allocation4 + $0xd4] ss:$24 sps:$4 sm:$0xff]   ;;  %v9488_v9 = vld [vmem:[#allocation4 + $0x104] ss:$24 sps:$4 sm:$0xff]  }
 0x148   :  { %3878 = vmatprep.subr.bf16.mxu0 %v9452_v47  ;;  %4007 = vmatprep.subr.bf16.mxu1 %v9455_v41  ;;  %v9485_v50 = vld [vmem:[#allocation2 + $0xcc] ss:$24 sps:$4 sm:$0xff]   ;;  %v11441_v47 = vsub.s32 0, %v10741_v39  ;;  %v9491_v44 = vld [vmem:[#allocation2 + $0xfc] ss:$24 sps:$4 sm:$0xff]  }
 0x149   :  { %v9489_v58 = vld [vmem:[#allocation2 + $0xf8] ss:$24 sps:$4 sm:$0xff]   ;;  %v9494_v7 = vld [vmem:[#allocation4 + $0x134] ss:$24 sps:$4 sm:$0xff]  }
 0x14a   :  { %v242_v41 = vrot.slane %v11193_v2, %v11441_v47  ;;  %v434_v43 = vrot.slane %v11202_v3, %v11441_v47  ;;  %v9497_v1 = vld [vmem:[#allocation2 + $0x12c] ss:$24 sps:$4 sm:$0xff]   ;;  %v218_v61 = vrot.slane %v11211_v19, %v11441_v47  ;;  %v290_v51 = vrot.slane %v11240_v57, %v11441_v47  ;;  %v9492_v60 = vld [vmem:[#allocation4 + $0x130] ss:$24 sps:$4 sm:$0xff]  }
 0x14b   :  { %3879 = vmatpush1.bf16.msra.mxu0 %v9450_v34  ;;  %4008 = vmatpush1.bf16.msra.mxu1 %v9453_v49  ;;  %v266_v34 = vrot.slane %v11220_v15, %v11441_v47  ;;  %v314_v0 = vrot.slane %v11249_v53, %v11441_v47  ;;  %v338_v59 = vrot.slane %v11353_v40, %v11441_v47 }
 0x14c   :  { %4020 = vmatprep.subr.bf16.mxu0 %v9458_v13  ;;  %6090 = vmatprep.subr.bf16.mxu1 %v9461_v23  ;;  %v362_v49 = vrot.slane %v11371_v55, %v11441_v47  ;;  %v386_v24 = vrot.slane %v11389_v33, %v11441_v47  ;;  %v410_v31 = vrot.slane %v11258_v17, %v11441_v47 }
 0x14d   :  { %v11465_v13 = vrot.slane %v11229_v11, %v11441_v47  ;;  %v11469_v23 = vrot.slane %v11323_v14, %v11441_v47  ;;  %v530_v38 = vrot.slane %v11360_v21, %v11441_v47  ;;  %v11479_v16 = vrot.slane %v11378_v12, %v11441_v47 }
 0x14e   :  { %3881 = vmatmul.mubr.bf16.vlgmr.msra.gmra.mrb[0].mxu0 %v11430_v28  ;;  %4010 = vmatmul.mubr.bf16.vlgmr.msra.gmra.mrb[0].mxu1 %v11430_v28 }
 0x14f   :  { %4021 = vmatpush1.bf16.msra.mxu0 %v9456_v6  ;;  %6091 = vmatpush1.bf16.msra.mxu1 %v9459_v25  ;;  %v11473_v6 = vrot.slane %v11341_v10, %v11441_v47  ;;  %v9495_v25 = vld [vmem:[#allocation2 + $0x128] ss:$24 sps:$4 sm:$0xff]  }
 0x150   :  { %4022 = vmatprep.subr.bf16.mxu0 %v9464_v36  ;;  %6092 = vmatprep.subr.bf16.mxu1 %v9467_v52  ;;  %v701_v36 = vpack.c.bf16 %v242_v41, %v242_v41  ;;  %v9500_v52 = vld [vmem:[#allocation4 + $0x164] ss:$24 sps:$4 sm:$0xff]   ;;  %v9506_v41 = vld [vmem:[#allocation4 + $0x194] ss:$24 sps:$4 sm:$0xff]  }
 0x151   :  { %4052 = vmatprep.mubr.bf16.mxu0 %v10918_v30  ;;  %6122 = vmatprep.mubr.bf16.mxu1 %v11434_v8  ;;  %v9483_v30 = vld [vmem:[#allocation2 + $0xc8] ss:$24 sps:$4 sm:$0xff]  }
 0x153   :  { %4023 = vmatpush1.bf16.msra.mxu0 %v9462_v4  ;;  %6093 = vmatpush1.bf16.msra.mxu1 %v9465_v35  ;;  %v9503_v4 = vld [vmem:[#allocation2 + $0x15c] ss:$24 sps:$4 sm:$0xff]   ;;  %v11483_v35 = vrot.slane %v11396_v37, %v11441_v47 }
 0x154   :  { %4024 = vmatprep.subr.bf16.mxu0 %v9470_v48  ;;  %6094 = vmatprep.subr.bf16.mxu1 %v9473_v29  ;;  %v695_v48 = vpack.c.bf16 %v218_v61, %v218_v61  ;;  %v707_v29 = vpack.c.bf16 %v266_v34, %v266_v34 }
 0x156   :  { %v4245_v61 = vunpack.c.l.b16 %v695_v48 }
 0x157   :  { %4025 = vmatpush1.bf16.msra.mxu0 %v9468_v18  ;;  %6095 = vmatpush1.bf16.msra.mxu1 %v9471_v45  ;;  %v11486_v18 = vsub.s32 6, %v10741_v39  ;;  %v713_v45 = vpack.c.bf16 %v290_v51, %v290_v51 }
 0x158   :  { %4026 = vmatprep.subr.bf16.mxu0 %v9476_v42  ;;  %6096 = vmatprep.subr.bf16.mxu1 %v9479_v46  ;;  %v719_v42 = vpack.c.bf16 %v314_v0, %v314_v0  ;;  %v725_v46 = vpack.c.bf16 %v338_v59, %v338_v59  ;;  %v785_v0 = vpack.c.bf16 %v11483_v35, %v11483_v35  ;;  %v4257_v59 = vunpack.c.l.b16 %v707_v29 }
 0x159   :  { %v254_v34 = vrot.slane %v11193_v2, %v11486_v18  ;;  %v446_v51 = vrot.slane %v11202_v3, %v11486_v18  ;;  %v9507_v2 = vld [vmem:[#allocation2 + $0x188] ss:$24 sps:$4 sm:$0xff]   ;;  %v422_v29 = vrot.slane %v11258_v17, %v11486_v18  ;;  %v9513_v17 = vld [vmem:[#allocation2 + $0x1b8] ss:$24 sps:$4 sm:$0xff]  }
 0x15b   :  { %4027 = vmatpush1.bf16.msra.mxu0 %v9474_v20  ;;  %6097 = vmatpush1.bf16.msra.mxu1 %v9477_v56  ;;  %v731_v20 = vpack.c.bf16 %v362_v49, %v362_v49  ;;  %v9498_v56 = vld [vmem:[#allocation4 + $0x160] ss:$24 sps:$4 sm:$0xff]   ;;  %v11502_v49 = vunpack.c.l.b16 %v713_v45  ;;  %v704_v45 = vpack.c.bf16 %v254_v34, %v254_v34 }
 0x15c   :  { %4028 = vmatprep.subr.bf16.mxu0 %v9482_v32  ;;  %6098 = vmatprep.subr.bf16.mxu1 %v9485_v50  ;;  %v737_v32 = vpack.c.bf16 %v386_v24, %v386_v24  ;;  %v743_v50 = vpack.c.bf16 %v410_v31, %v410_v31  ;;  %v11504_v24 = vunpack.c.l.b16 %v719_v42  ;;  %v11506_v31 = vunpack.c.l.b16 %v725_v46 }
 0x15d   :  { %v752_v42 = vpack.c.bf16 %v446_v51, %v446_v51  ;;  %v4254_v34 = vunpack.c.l.b16 %v704_v45 }
 0x15e   :  { %v4293_v48 = vunpack.c.l.b16 %v743_v50  ;;  %v494_v50 = vrot.slane %v11323_v14, %v11486_v18  ;;  %v4347_v51 = vrot.slane %v11504_v24, 4  ;;  %v4335_v24 = vunpack.c.l.b16 %v785_v0  ;;  %v9543_v0 = vld [vmem:[#allocation2 + $0x2a8] ss:$24 sps:$4 sm:$0xff]  }
 0x15f   :  { %4029 = vmatpush1.bf16.msra.mxu0 %v9480_v5  ;;  %6099 = vmatpush1.bf16.msra.mxu1 %v9483_v30  ;;  %v749_v5 = vpack.c.bf16 %v434_v43, %v434_v43  ;;  %v755_v30 = vpack.c.bf16 %v11465_v13, %v11465_v13  ;;  %v779_v43 = vpack.c.bf16 %v11479_v16, %v11479_v16  ;;  %v11508_v13 = vunpack.c.l.b16 %v731_v20 }
 0x160   :  { %4030 = vmatprep.subr.bf16.mxu0 %v9488_v9  ;;  %6100 = vmatprep.subr.bf16.mxu1 %v9491_v44  ;;  %v9501_v9 = vld [vmem:[#allocation2 + $0x158] ss:$24 sps:$4 sm:$0xff]   ;;  %v761_v44 = vpack.c.bf16 %v11469_v23, %v11469_v23  ;;  %v11510_v23 = vunpack.c.l.b16 %v737_v32  ;;  %v4343_v32 = vrot.slane %v4257_v59, 6  ;;  %v326_v59 = vrot.slane %v11249_v53, %v11486_v18 }
 0x161   :  { %v4305_v46 = vunpack.c.l.b16 %v755_v30  ;;  %v542_v53 = vrot.slane %v11360_v21, %v11486_v18  ;;  %v374_v21 = vrot.slane %v11371_v55, %v11486_v18 }
 0x162   :  { %v11520_v20 = vunpack.c.l.b16 %v761_v44 }
 0x163   :  { %4031 = vmatpush1.bf16.msra.mxu0 %v9486_v63  ;;  %6101 = vmatpush1.bf16.msra.mxu1 %v9489_v58  ;;  %v767_v63 = vpack.c.bf16 %v11473_v6, %v11473_v6  ;;  %v773_v58 = vpack.c.bf16 %v530_v38, %v530_v38  ;;  %v4299_v6 = vunpack.c.l.b16 %v749_v5  ;;  %v278_v38 = vrot.slane %v11220_v15, %v11486_v18  ;;  %v9510_v15 = vld [vmem:[#allocation4 + $0x1c0] ss:$24 sps:$4 sm:$0xff]  }
 0x164   :  { %4032 = vmatprep.subr.bf16.mxu0 %v9494_v7  ;;  %6102 = vmatprep.subr.bf16.mxu1 %v9497_v1  ;;  %v4251_v7 = vunpack.c.l.b16 %v701_v36  ;;  %v9509_v1 = vld [vmem:[#allocation2 + $0x18c] ss:$24 sps:$4 sm:$0xff]   ;;  %v470_v36 = vrot.slane %v11229_v11, %v11486_v18  ;;  %v302_v5 = vrot.slane %v11240_v57, %v11486_v18  ;;  %v4302_v57 = vunpack.c.l.b16 %v752_v42 }
 0x165   :  { %v4425_v11 = vrot.slane %v4299_v6, 7  ;;  %v710_v44 = vpack.c.bf16 %v278_v38, %v278_v38  ;;  %v4427_v14 = vrot.slane %v4305_v46, 6  ;;  %v9524_v38 = vld [vmem:[#allocation4 + $0x224] ss:$24 sps:$4 sm:$0xff]   ;;  %v4383_v42 = vrot.slane %v4254_v34, 7 }
 0x166   :  { %v4341_v3 = vrot.slane %v4251_v7, 7  ;;  %v9521_v7 = vld [vmem:[#allocation2 + $0x1ec] ss:$24 sps:$4 sm:$0xff]  }
 0x167   :  { %4033 = vmatpush1.bf16.msra.mxu0 %v9492_v60  ;;  %6103 = vmatpush1.bf16.msra.mxu1 %v9495_v25  ;;  %v9504_v60 = vld [vmem:[#allocation4 + $0x190] ss:$24 sps:$4 sm:$0xff]   ;;  %v230_v25 = vrot.slane %v11211_v19, %v11486_v18  ;;  %v11522_v19 = vunpack.c.l.b16 %v767_v63  ;;  %v758_v63 = vpack.c.bf16 %v470_v36, %v470_v36  ;;  %v350_v36 = vrot.slane %v11353_v40, %v11486_v18 }
 0x168   :  { %4034 = vmatprep.subr.bf16.mxu0 %v9500_v52  ;;  %6104 = vmatprep.subr.bf16.mxu1 %v9503_v4  ;;  %v9512_v52 = vld [vmem:[#allocation4 + $0x1c4] ss:$24 sps:$4 sm:$0xff]   ;;  %v4342_v30 = vsel %vm2136_vm0, %v4341_v3, %v4245_v61  ;;  %v518_v61 = vrot.slane %v11341_v10, %v11486_v18  ;;  %v716_v3 = vpack.c.bf16 %v302_v5, %v302_v5  ;;  %v9522_v5 = vld [vmem:[#allocation4 + $0x220] ss:$24 sps:$4 sm:$0xff]  }
 0x169   :  { %v9515_v4 = vld [vmem:[#allocation2 + $0x1bc] ss:$24 sps:$4 sm:$0xff]   ;;  %v4344_v6 = vsel %vm2139_vm1, %v4343_v32, %v4342_v30  ;;  %v722_v32 = vpack.c.bf16 %v326_v59, %v326_v59  ;;  %v9525_v30 = vld [vmem:[#allocation2 + $0x218] ss:$24 sps:$4 sm:$0xff]  }
 0x16a   :  { %v9527_v10 = vld [vmem:[#allocation2 + $0x21c] ss:$24 sps:$4 sm:$0xff]  }
 0x16b   :  { %4035 = vmatpush1.bf16.msra.mxu0 %v9498_v56  ;;  %6105 = vmatpush1.bf16.msra.mxu1 %v9501_v9  ;;  %v11524_v56 = vunpack.c.l.b16 %v773_v58  ;;  %v4345_v9 = vrot.slane %v11502_v49, 5  ;;  %v9518_v58 = vld [vmem:[#allocation4 + $0x1f4] ss:$24 sps:$4 sm:$0xff]   ;;  %v9516_v49 = vld [vmem:[#allocation4 + $0x1f0] ss:$24 sps:$4 sm:$0xff]   ;;  %v4272_v59 = vunpack.c.l.b16 %v722_v32 }
 0x16c   :  { %4036 = vmatprep.subr.bf16.mxu0 %v9506_v41  ;;  %6106 = vmatprep.subr.bf16.mxu1 %v9509_v1  ;;  %v698_v41 = vpack.c.bf16 %v230_v25, %v230_v25  ;;  %v746_v1 = vpack.c.bf16 %v422_v29, %v422_v29  ;;  %v764_v25 = vpack.c.bf16 %v494_v50, %v494_v50  ;;  %v4266_v50 = vunpack.c.l.b16 %v716_v3  ;;  %v9536_v3 = vld [vmem:[#allocation4 + $0x284] ss:$24 sps:$4 sm:$0xff]  }
 0x16d   :  { %v4346_v46 = vsel %vm2142_vm2, %v4345_v9, %v4344_v6  ;;  %v734_v6 = vpack.c.bf16 %v374_v21, %v374_v21 }
 0x16e   :  { %v4248_v29 = vunpack.c.l.b16 %v698_v41  ;;  %v4296_v45 = vunpack.c.l.b16 %v746_v1  ;;  %v4431_v41 = vrot.slane %v11522_v19, 4  ;;  %v776_v1 = vpack.c.bf16 %v542_v53, %v542_v53  ;;  %v9539_v53 = vld [vmem:[#allocation2 + $0x27c] ss:$24 sps:$4 sm:$0xff]  }
 0x16f   :  { %4037 = vmatpush1.bf16.msra.mxu0 %v9504_v60  ;;  %6107 = vmatpush1.bf16.msra.mxu1 %v9507_v2  ;;  %v9519_v60 = vld [vmem:[#allocation2 + $0x1e8] ss:$24 sps:$4 sm:$0xff]   ;;  %v4426_v2 = vsel %vm2136_vm0, %v4425_v11, %v4293_v48  ;;  %v4467_v48 = vrot.slane %v4302_v57, 7  ;;  %v770_v11 = vpack.c.bf16 %v518_v61, %v518_v61  ;;  %v4348_v16 = vsel %vm2145_vm3, %v4347_v51, %v4346_v46 }
 0x170   :  { %4038 = vmatprep.subr.bf16.mxu0 %v9512_v52  ;;  %6108 = vmatprep.subr.bf16.mxu1 %v9515_v4  ;;  %v4260_v52 = vunpack.c.l.b16 %v710_v44  ;;  %v4308_v4 = vunpack.c.l.b16 %v758_v63  ;;  %v4428_v40 = vsel %vm2139_vm1, %v4427_v14, %v4426_v2  ;;  %v566_v44 = vrot.slane %v11378_v12, %v11486_v18  ;;  %v9528_v57 = vld [vmem:[#allocation4 + $0x250] ss:$24 sps:$4 sm:$0xff]  }
 0x171   :  { %v728_v63 = vpack.c.bf16 %v350_v36, %v350_v36  ;;  %v4384_v55 = vsel %vm2136_vm0, %v4383_v42, %v4248_v29  ;;  %v4468_v34 = vsel %vm2136_vm0, %v4467_v48, %v4296_v45  ;;  %v398_v12 = vrot.slane %v11389_v33, %v11486_v18  ;;  %v9537_v42 = vld [vmem:[#allocation2 + $0x278] ss:$24 sps:$4 sm:$0xff]  }
 0x172   :  { %v4385_v9 = vrot.slane %v4260_v52, 6  ;;  %v4320_v61 = vunpack.c.l.b16 %v770_v11  ;;  %v4387_v2 = vrot.slane %v4266_v50, 5  ;;  %v4389_v29 = vrot.slane %v4272_v59, 4 }
 0x173   :  { %4039 = vmatpush1.bf16.msra.mxu0 %v9510_v15  ;;  %6109 = vmatpush1.bf16.msra.mxu1 %v9513_v17  ;;  %v4429_v15 = vrot.slane %v11520_v20, 5  ;;  %v4314_v17 = vunpack.c.l.b16 %v764_v25  ;;  %v9530_v20 = vld [vmem:[#allocation4 + $0x254] ss:$24 sps:$4 sm:$0xff]   ;;  %v4329_v25 = vunpack.c.l.b16 %v779_v43  ;;  %v4278_v52 = vunpack.c.l.b16 %v728_v63 }
 0x174   :  { %4040 = vmatprep.subr.bf16.mxu0 %v9518_v58  ;;  %6110 = vmatprep.subr.bf16.mxu1 %v9521_v7  ;;  %v4469_v58 = vrot.slane %v4308_v4, 6  ;;  %v9533_v7 = vld [vmem:[#allocation2 + $0x24c] ss:$24 sps:$4 sm:$0xff]   ;;  %v4386_v36 = vsel %vm2139_vm1, %v4385_v9, %v4384_v55  ;;  %v4326_v4 = vunpack.c.l.b16 %v776_v1  ;;  %v4473_v45 = vrot.slane %v4320_v61, 4 }
 0x175   :  { %v4430_v14 = vsel %vm2142_vm2, %v4429_v15, %v4428_v40  ;;  %v4471_v19 = vrot.slane %v4314_v17, 5  ;;  %v740_v48 = vpack.c.bf16 %v398_v12, %v398_v12  ;;  %v4388_v32 = vsel %vm2142_vm2, %v4387_v2, %v4386_v36  ;;  %v9548_v55 = vld [vmem:[#allocation4 + $0x2e4] ss:$24 sps:$4 sm:$0xff]  }
 0x176   :  { %v4470_v33 = vsel %vm2139_vm1, %v4469_v58, %v4468_v34  ;;  %v4432_v43 = vsel %vm2145_vm3, %v4431_v41, %v4430_v14  ;;  %v4351_v51 = vrot.slane %v11508_v13, 2  ;;  %v4284_v46 = vunpack.c.l.b16 %v734_v6  ;;  %v9551_v34 = vld [vmem:[#allocation2 + $0x2dc] ss:$24 sps:$4 sm:$0xff]  }
 0x177   :  { %4041 = vmatpush1.bf16.msra.mxu0 %v9516_v49  ;;  %6111 = vmatpush1.bf16.msra.mxu1 %v9519_v60  ;;  %v9531_v49 = vld [vmem:[#allocation2 + $0x248] ss:$24 sps:$4 sm:$0xff]   ;;  %v590_v60 = vrot.slane %v11396_v37, %v11486_v18  ;;  %v4349_v37 = vrot.slane %v11506_v31, 3  ;;  %v4433_v18 = vrot.slane %v11524_v56, 3  ;;  %v4472_v31 = vsel %vm2142_vm2, %v4471_v19, %v4470_v33  ;;  %v9542_v56 = vld [vmem:[#allocation4 + $0x2b4] ss:$24 sps:$4 sm:$0xff]  }
 0x178   :  { %4042 = vmatprep.subr.bf16.mxu0 %v9524_v38  ;;  %6112 = vmatprep.subr.bf16.mxu1 %v9527_v10  ;;  %v782_v38 = vpack.c.bf16 %v566_v44, %v566_v44  ;;  %v9534_v10 = vld [vmem:[#allocation4 + $0x280] ss:$24 sps:$4 sm:$0xff]   ;;  %v4435_v21 = vrot.slane %v4329_v25, 2  ;;  %v4391_v50 = vrot.slane %v4278_v52, 3  ;;  %v4475_v17 = vrot.slane %v4326_v4, 3 }
 0x179   :  { %v788_v15 = vpack.c.bf16 %v590_v60, %v590_v60  ;;  %v4350_v40 = vsel %vm2148_vm4, %v4349_v37, %v4348_v16  ;;  %v4434_v44 = vsel %vm2148_vm4, %v4433_v18, %v4432_v43  ;;  %v4390_v63 = vsel %vm2145_vm3, %v4389_v29, %v4388_v32  ;;  %v9549_v60 = vld [vmem:[#allocation2 + $0x2d8] ss:$24 sps:$4 sm:$0xff]   ;;  %v9557_v25 = vld [vmem:[#allocation2 + $0x30c] ss:$24 sps:$4 sm:$0xff]   ;;  %v9555_v37 = vld [vmem:[#allocation2 + $0x308] ss:$24 sps:$4 sm:$0xff]  }
 0x17a   :  { %v4332_v11 = vunpack.c.l.b16 %v782_v38  ;;  %v4474_v35 = vsel %vm2145_vm3, %v4473_v45, %v4472_v31  ;;  %v4353_v13 = vrot.slane %v11510_v23, 1  ;;  %v4290_v9 = vunpack.c.l.b16 %v740_v48  ;;  %v9546_v23 = vld [vmem:[#allocation4 + $0x2e0] ss:$24 sps:$4 sm:$0xff]   ;;  %v9552_v38 = vld [vmem:[#allocation4 + $0x310] ss:$24 sps:$4 sm:$0xff]  }
 0x17b   :  { %4043 = vmatpush1.bf16.msra.mxu0 %v9522_v5  ;;  %6113 = vmatpush1.bf16.msra.mxu1 %v9525_v30  ;;  %v9545_v5 = vld [vmem:[#allocation2 + $0x2ac] ss:$24 sps:$4 sm:$0xff]   ;;  %v9540_v30 = vld [vmem:[#allocation4 + $0x2b0] ss:$24 sps:$4 sm:$0xff]   ;;  %v4338_v58 = vunpack.c.l.b16 %v788_v15  ;;  %v4393_v41 = vrot.slane %v4284_v46, 2  ;;  %v4392_v14 = vsel %vm2148_vm4, %v4391_v50, %v4390_v63  ;;  %v4476_v12 = vsel %vm2148_vm4, %v4475_v17, %v4474_v35 }
 0x17c   :  { %4044 = vmatprep.subr.bf16.mxu0 %v9530_v20  ;;  %6114 = vmatprep.subr.bf16.mxu1 %v9533_v7  ;;  %v4352_v20 = vsel %vm2151_vm5, %v4351_v51, %v4350_v40  ;;  %v4437_v7 = vrot.slane %v4335_v24, 1  ;;  %v4477_v1 = vrot.slane %v4332_v11, 2  ;;  %v4395_v61 = vrot.slane %v4290_v9, 1  ;;  %v9560_v18 = vld [vmem:[#allocation4 + $0x344] ss:$24 sps:$4 sm:$0xff]   ;;  %v10396_v9 = vld [vmem:[%s12004_s0 + $0x30] sm:$0xff] }
 0x17d   :  { %v4354_v59 = vsel %vm2154_vm6, %v4353_v13, %v4352_v20  ;;  %v4394_v2 = vsel %vm2151_vm5, %v4393_v41, %v4392_v14  ;;  %v9563_v52 = vld [vmem:[#allocation2 + $0x33c] ss:$24 sps:$4 sm:$0xff]   ;;  %v9561_v16 = vld [vmem:[#allocation2 + $0x338] ss:$24 sps:$4 sm:$0xff]   ;;  %v9569_v29 = vld [vmem:[#allocation2 + $0x36c] ss:$24 sps:$4 sm:$0xff]  }
 0x17e   :  { %v4478_v19 = vsel %vm2151_vm5, %v4477_v1, %v4476_v12  ;;  %v4396_v33 = vsel %vm2154_vm6, %v4395_v61, %v4394_v2  ;;  %v9566_v43 = vld [vmem:[#allocation4 + $0x374] ss:$24 sps:$4 sm:$0xff]   ;;  %v9564_v45 = vld [vmem:[#allocation4 + $0x370] ss:$24 sps:$4 sm:$0xff]   ;;  %v9572_v48 = vld [vmem:[#allocation4 + $0x3a4] ss:$24 sps:$4 sm:$0xff]  }
 0x17f   :  { %4045 = vmatpush1.bf16.msra.mxu0 %v9528_v57  ;;  %6115 = vmatpush1.bf16.msra.mxu1 %v9531_v49  ;;  %v4436_v57 = vsel %vm2151_vm5, %v4435_v21, %v4434_v44  ;;  %v4479_v49 = vrot.slane %v4338_v58, 1  ;;  %v9570_v15 = vld [vmem:[#allocation4 + $0x3a0] ss:$24 sps:$4 sm:$0xff]   ;;  %v9578_v31 = vld [vmem:[#allocation4 + $0x3d4] ss:$24 sps:$4 sm:$0xff]  }
 0x180   :  { %4046 = vmatprep.subr.bf16.mxu0 %v9536_v3  ;;  %6116 = vmatprep.subr.bf16.mxu1 %v9539_v53  ;;  %v4438_v6 = vsel %vm2154_vm6, %v4437_v7, %v4436_v57  ;;  %v9554_v3 = vld [vmem:[#allocation4 + $0x314] ss:$24 sps:$4 sm:$0xff]   ;;  %v9573_v32 = vld [vmem:[#allocation2 + $0x398] ss:$24 sps:$4 sm:$0xff]   ;;  %v9579_v51 = vld [vmem:[#allocation2 + $0x3c8] ss:$24 sps:$4 sm:$0xff]  }
 0x181   :  { %v11588_v36 = vpack.c.b16 %v4438_v6, %v4354_v59  ;;  %v4480_v53 = vsel %vm2154_vm6, %v4479_v49, %v4478_v19  ;;  %v9576_v24 = vld [vmem:[#allocation4 + $0x3d0] ss:$24 sps:$4 sm:$0xff]   ;;  %v9584_v46 = vld [vmem:[#allocation4 + $0x404] ss:$24 sps:$4 sm:$0xff]   ;;  %v9582_v21 = vld [vmem:[#allocation4 + $0x400] ss:$24 sps:$4 sm:$0xff]  }
 0x182   :  { %v11592_v4 = vpack.c.b16 %v4480_v53, %v4396_v33  ;;  %v9587_v11 = vld [vmem:[#allocation2 + $0x3fc] ss:$24 sps:$4 sm:$0xff]   ;;  %v9585_v50 = vld [vmem:[#allocation2 + $0x3f8] ss:$24 sps:$4 sm:$0xff]   ;;  %v9593_v35 = vld [vmem:[#allocation2 + $0x42c] ss:$24 sps:$4 sm:$0xff]  }
 0x183   :  { %4047 = vmatpush1.bf16.msra.mxu0 %v9534_v10  ;;  %6117 = vmatpush1.bf16.msra.mxu1 %v9537_v42  ;;  %v9558_v10 = vld [vmem:[#allocation4 + $0x340] ss:$24 sps:$4 sm:$0xff]   ;;  %v9590_v63 = vld [vmem:[#allocation4 + $0x434] ss:$24 sps:$4 sm:$0xff]   ;;  %v9588_v41 = vld [vmem:[#allocation4 + $0x430] ss:$24 sps:$4 sm:$0xff]  }
 0x184   :  { %4048 = vmatprep.subr.bf16.mxu0 %v9542_v56  ;;  %6118 = vmatprep.subr.bf16.mxu1 %v9545_v5  ;;  %12030 = vst [vmem:[#allocation21_spill] sm:$0xff] %v11592_v4  ;;  %v9567_v42 = vld [vmem:[#allocation2 + $0x368] ss:$24 sps:$4 sm:$0xff]   ;;  %v9581_v56 = vld [vmem:[#allocation2 + $0x3cc] ss:$24 sps:$4 sm:$0xff]   ;;  %v10399_v57 = vld [vmem:[%s12004_s0 + $0x54] sm:$0xff] }
 0x185   :  { %v10392_v5 = vld [vmem:[%s12004_s0 + $0xc] sm:$0xff]  ;;  %v10397_v20 = vld [vmem:[%s12004_s0 + $0x3c] sm:$0xff]  ;;  %v10403_v6 = vld [vmem:[%s12004_s0 + $0x84] sm:$0xff] }
 0x186   :  { %v9591_v1 = vld [vmem:[#allocation2 + $0x428] ss:$24 sps:$4 sm:$0xff]   ;;  %v10401_v59 = vld [vmem:[%s12004_s0 + $0x6c] sm:$0xff]  ;;  %v10402_v49 = vld [vmem:[%s12004_s0 + $0x78] sm:$0xff] }
 0x187   :  { %4049 = vmatpush1.bf16.msra.mxu0 %v9540_v30  ;;  %6119 = vmatpush1.bf16.msra.mxu1 %v9543_v0  ;;  %v10394_v30 = vld [vmem:[%s12004_s0 + $0x18] sm:$0xff]  ;;  %v10395_v0 = vld [vmem:[%s12004_s0 + $0x24] sm:$0xff]  ;;  %v10404_v19 = vld [vmem:[%s12004_s0 + $0x90] sm:$0xff] }
 0x188   :  { %4050 = vmatprep.subr.bf16.mxu0 %v9548_v55  ;;  %6120 = vmatprep.subr.bf16.mxu1 %v9551_v34  ;;  %v10398_v55 = vld [vmem:[%s12004_s0 + $0x48] sm:$0xff]  ;;  %v10400_v12 = vld [vmem:[%s12004_s0 + $0x60] sm:$0xff]  ;;  %v9599_v33 = vld [vmem:[#allocation2 + $0x45c] ss:$24 sps:$4 sm:$0xff]  }
 0x189   :  { %v10405_v53 = vld [vmem:[%s12004_s0 + $0x9c] sm:$0xff] }
 0x18b   :  { %4051 = vmatpush1.bf16.msra.mxu0 %v9546_v23  ;;  %6121 = vmatpush1.bf16.msra.mxu1 %v9549_v60 }
 0x18c   :  { %4063 = vmatprep.subr.bf16.mxu0 %v9554_v3  ;;  %6133 = vmatprep.subr.bf16.mxu1 %v9557_v25 }
 0x18e   :  { %4053 = vmatmul.mubr.bf16.vlgmr.msra.gmra.mrb[4].mxu0 %v10974_v26  ;;  %6123 = vmatmul.mubr.bf16.vlgmr.msra.gmra.mrb[0].mxu1 %v11588_v36  ;;  %v9575_v26 = vld [vmem:[#allocation2 + $0x39c] ss:$24 sps:$4 sm:$0xff]  }
 0x18f   :  { %4064 = vmatpush1.bf16.msra.mxu0 %v9552_v38  ;;  %6134 = vmatpush1.bf16.msra.mxu1 %v9555_v37  ;;  %v9596_v38 = vld [vmem:[#allocation4 + $0x464] ss:$24 sps:$4 sm:$0xff]  }
 0x190   :  { %4065 = vmatprep.subr.bf16.mxu0 %v9560_v18  ;;  %6135 = vmatprep.subr.bf16.mxu1 %v9563_v52  ;;  %v10406_v18 = vld [vmem:[%s12004_s0 + $0xa8] sm:$0xff] }
 0x191   :  { %4095 = vmatprep.mubr.bf16.mxu0 %v11001_v22  ;;  %6165 = vmatprep.mubr.bf16.mxu1 %v11592_v4  ;;  %v11599_v22 = vsub.s32 4, %v10741_v39  ;;  %v10393_v39 = vld [vmem:[%s12004_s0] sm:$0xff] }
 0x193   :  { %4066 = vmatpush1.bf16.msra.mxu0 %v9558_v10  ;;  %6136 = vmatpush1.bf16.msra.mxu1 %v9561_v16  ;;  %12031 = vst [vmem:[#allocation22_spill] sm:$0xff] %v11599_v22  ;;  %v250_v40 = vrot.slane %v10392_v5, %v11599_v22  ;;  %v11609_v17 = vrot.slane %v10393_v39, %v11599_v22  ;;  %v10407_v10 = vld [vmem:[%s12004_s0 + $0xb4] sm:$0xff]  ;;  %v9605_v5 = vld [vmem:[#allocation2 + $0x48c] ss:$24 sps:$4 sm:$0xff]  }
 0x194   :  { %4067 = vmatprep.subr.bf16.mxu0 %v9566_v43  ;;  %6137 = vmatprep.subr.bf16.mxu1 %v9569_v29  ;;  %v11615_v44 = vrot.slane %v10394_v30, %v11599_v22  ;;  %v11621_v13 = vrot.slane %v10395_v0, %v11599_v22  ;;  %v11627_v58 = vrot.slane %v10396_v9, %v11599_v22  ;;  %v11718_v30 = vld [vmem:[%s12004_s0 + $0x14] sm:$0xf]  ;;  %v9600_v0 = vld [vmem:[#allocation4 + $0x490] ss:$24 sps:$4 sm:$0xff]  }
 0x195   :  { %v11633_v7 = vrot.slane %v10397_v20, %v11599_v22  ;;  %v370_v34 = vrot.slane %v10398_v55, %v11599_v22  ;;  %v11643_v14 = vrot.slane %v10399_v57, %v11599_v22  ;;  %v11649_v23 = vrot.slane %v10400_v12, %v11599_v22  ;;  %v9608_v57 = vld [vmem:[#allocation4 + $0x4c4] ss:$24 sps:$4 sm:$0xff]  }
 0x196   :  { %v442_v61 = vrot.slane %v10401_v59, %v11599_v22  ;;  %v11659_v60 = vrot.slane %v10402_v49, %v11599_v22  ;;  %v11665_v2 = vrot.slane %v10403_v6, %v11599_v22  ;;  %v11671_v3 = vrot.slane %v10404_v19, %v11599_v22  ;;  %v11765_v19 = vld [vmem:[%s12004_s0 + $0x68] sm:$0xf] }
 0x197   :  { %4068 = vmatpush1.bf16.msra.mxu0 %v9564_v45  ;;  %6138 = vmatpush1.bf16.msra.mxu1 %v9567_v42  ;;  %v703_v25 = vpack.c.bf16 %v250_v40, %v250_v40  ;;  %v11677_v37 = vrot.slane %v10405_v53, %v11599_v22  ;;  %v11683_v52 = vrot.slane %v10406_v18, %v11599_v22  ;;  %v9594_v42 = vld [vmem:[#allocation4 + $0x460] ss:$24 sps:$4 sm:$0xff]  }
 0x198   :  { %4069 = vmatprep.subr.bf16.mxu0 %v9572_v48  ;;  %6139 = vmatprep.subr.bf16.mxu1 %v9575_v26  ;;  %v11689_v16 = vrot.slane %v10407_v10, %v11599_v22  ;;  %v697_v43 = vpack.c.bf16 %v11609_v17, %v11609_v17  ;;  %v709_v29 = vpack.c.bf16 %v11615_v44, %v11615_v44  ;;  %v9597_v48 = vld [vmem:[#allocation2 + $0x458] ss:$24 sps:$4 sm:$0xff]   ;;  %v9626_v22 = vld [vmem:[#allocation4 + $0x554] ss:$24 sps:$4 sm:$0xff]  }
 0x199   :  { %v715_v45 = vpack.c.bf16 %v11621_v13, %v11621_v13  ;;  %v721_v26 = vpack.c.bf16 %v11627_v58, %v11627_v58  ;;  %v763_v40 = vpack.c.bf16 %v11665_v2, %v11665_v2  ;;  %v262_v44 = vrot.slane %v11718_v30, %v11186_v54  ;;  %v9603_v13 = vld [vmem:[#allocation2 + $0x488] ss:$24 sps:$4 sm:$0xff]   ;;  %v9609_v53 = vld [vmem:[#allocation2 + $0x4b8] ss:$24 sps:$4 sm:$0xff]  }
 0x19a   :  { %v4247_v17 = vunpack.c.l.b16 %v697_v43  ;;  %v4259_v58 = vunpack.c.l.b16 %v709_v29 }
 0x19b   :  { %4070 = vmatpush1.bf16.msra.mxu0 %v9570_v15  ;;  %6140 = vmatpush1.bf16.msra.mxu1 %v9573_v32  ;;  %v727_v15 = vpack.c.bf16 %v11633_v7, %v11633_v7  ;;  %v733_v32 = vpack.c.bf16 %v370_v34, %v370_v34  ;;  %v11731_v20 = vunpack.c.l.b16 %v715_v45  ;;  %v11733_v7 = vunpack.c.l.b16 %v721_v26  ;;  %v11784_v26 = vld [vmem:[%s12004_s0 + $0x8c] sm:$0xf] }
 0x19c   :  { %4071 = vmatprep.subr.bf16.mxu0 %v9578_v31  ;;  %6141 = vmatprep.subr.bf16.mxu1 %v9581_v56  ;;  %v739_v31 = vpack.c.bf16 %v11643_v14, %v11643_v14  ;;  %v745_v56 = vpack.c.bf16 %v11649_v23, %v11649_v23  ;;  %v9611_v14 = vld [vmem:[#allocation2 + $0x4bc] ss:$24 sps:$4 sm:$0xff]   ;;  %v11744_v23 = vld [vmem:[%s12004_s0 + $0x8] sm:$0xf]  ;;  %v11769_v18 = vunpack.c.l.b16 %v763_v40  ;;  %v4371_v43 = vrot.slane %v4259_v58, 6 }
 0x19d   :  { %v238_v59 = vrot.slane %v11744_v23, %v11186_v54  ;;  %v11803_v58 = vld [vmem:[%s12004_s0 + $0x98] sm:$0xf] }
 0x19e   :  { %v11739_v12 = vunpack.c.l.b16 %v739_v31  ;;  %v4295_v2 = vunpack.c.l.b16 %v745_v56  ;;  %v9617_v31 = vld [vmem:[#allocation2 + $0x4ec] ss:$24 sps:$4 sm:$0xff]   ;;  %v4457_v9 = vrot.slane %v11769_v18, 5  ;;  %v11835_v18 = vld [vmem:[%s12004_s0 + $0xb0] sm:$0xf] }
 0x19f   :  { %4072 = vmatpush1.bf16.msra.mxu0 %v9576_v24  ;;  %6142 = vmatpush1.bf16.msra.mxu1 %v9579_v51  ;;  %v751_v24 = vpack.c.bf16 %v442_v61, %v442_v61  ;;  %v757_v51 = vpack.c.bf16 %v11659_v60, %v11659_v60  ;;  %v11751_v61 = vld [vmem:[%s12004_s0 + $0x20] sm:$0xf] }
 0x1a0   :  { %4073 = vmatprep.subr.bf16.mxu0 %v9584_v46  ;;  %6143 = vmatprep.subr.bf16.mxu1 %v9587_v11  ;;  %v4253_v46 = vunpack.c.l.b16 %v703_v25  ;;  %v9602_v11 = vld [vmem:[#allocation4 + $0x494] ss:$24 sps:$4 sm:$0xff]   ;;  %v286_v49 = vrot.slane %v11751_v61, %v11186_v54  ;;  %v11758_v60 = vld [vmem:[%s12004_s0 + $0x80] sm:$0xf]  ;;  %v706_v25 = vpack.c.bf16 %v262_v44, %v262_v44 }
 0x1a1   :  { %v4301_v55 = vunpack.c.l.b16 %v751_v24  ;;  %v478_v6 = vrot.slane %v11758_v60, %v11186_v54  ;;  %v4373_v24 = vrot.slane %v11731_v20, 5  ;;  %v9615_v44 = vld [vmem:[#allocation2 + $0x4e8] ss:$24 sps:$4 sm:$0xff]   ;;  %v526_v20 = vrot.slane %v11803_v58, %v11186_v54 }
 0x1a2   :  { %v4369_v34 = vrot.slane %v4253_v46, 7  ;;  %v4256_v40 = vunpack.c.l.b16 %v706_v25  ;;  %v11818_v25 = vld [vmem:[%s12004_s0 + $0xa4] sm:$0xf] }
 0x1a3   :  { %4074 = vmatpush1.bf16.msra.mxu0 %v9582_v21  ;;  %6144 = vmatpush1.bf16.msra.mxu1 %v9585_v50  ;;  %v769_v21 = vpack.c.bf16 %v11671_v3, %v11671_v3  ;;  %v775_v50 = vpack.c.bf16 %v11677_v37, %v11677_v37  ;;  %v430_v3 = vrot.slane %v11765_v19, %v11186_v54  ;;  %v4307_v37 = vunpack.c.l.b16 %v757_v51 }
 0x1a4   :  { %4075 = vmatprep.subr.bf16.mxu0 %v9590_v63  ;;  %6145 = vmatprep.subr.bf16.mxu1 %v9593_v35  ;;  %v11725_v63 = vld [vmem:[%s12004_s0 + $0x74] sm:$0xf]  ;;  %v4370_v29 = vsel %vm2136_vm0, %v4369_v34, %v4247_v17  ;;  %v4453_v45 = vrot.slane %v4301_v55, 7  ;;  %v712_v51 = vpack.c.bf16 %v286_v49, %v286_v49  ;;  %v760_v46 = vpack.c.bf16 %v478_v6, %v478_v6  ;;  %v9612_v17 = vld [vmem:[#allocation4 + $0x4f0] ss:$24 sps:$4 sm:$0xff]  }
 0x1a5   :  { %v454_v35 = vrot.slane %v11725_v63, %v11186_v54  ;;  %v11771_v10 = vunpack.c.l.b16 %v769_v21  ;;  %v11788_v56 = vunpack.c.l.b16 %v775_v50  ;;  %v11796_v50 = vld [vmem:[%s12004_s0 + $0x38] sm:$0xf]  ;;  %v4455_v34 = vrot.slane %v4307_v37, 6  ;;  %v9623_v49 = vld [vmem:[#allocation2 + $0x51c] ss:$24 sps:$4 sm:$0xff]  }
 0x1a6   :  { %v4454_v55 = vsel %vm2136_vm0, %v4453_v45, %v4295_v2  ;;  %v11811_v6 = vld [vmem:[%s12004_s0 + $0x44] sm:$0xf]  ;;  %v550_v2 = vrot.slane %v11818_v25, %v11186_v54  ;;  %v9618_v45 = vld [vmem:[#allocation4 + $0x520] ss:$24 sps:$4 sm:$0xff]   ;;  %v772_v39 = vpack.c.bf16 %v526_v20, %v526_v20  ;;  %v9624_v20 = vld [vmem:[#allocation4 + $0x550] ss:$24 sps:$4 sm:$0xff]  }
 0x1a7   :  { %4076 = vmatpush1.bf16.msra.mxu0 %v9588_v41  ;;  %6146 = vmatpush1.bf16.msra.mxu1 %v9591_v1  ;;  %v11735_v41 = vunpack.c.l.b16 %v727_v15  ;;  %v11737_v1 = vunpack.c.l.b16 %v733_v32  ;;  %v502_v15 = vrot.slane %v11784_v26, %v11186_v54  ;;  %v9614_v32 = vld [vmem:[#allocation4 + $0x4f4] ss:$24 sps:$4 sm:$0xff]   ;;  %v4456_v4 = vsel %vm2139_vm1, %v4455_v34, %v4454_v55  ;;  %v9627_v55 = vld [vmem:[#allocation2 + $0x548] ss:$24 sps:$4 sm:$0xff]  }
 0x1a8   :  { %4077 = vmatprep.subr.bf16.mxu0 %v9596_v38  ;;  %6147 = vmatprep.subr.bf16.mxu1 %v9599_v33  ;;  %v754_v38 = vpack.c.bf16 %v454_v35, %v454_v35  ;;  %v9606_v33 = vld [vmem:[#allocation4 + $0x4c0] ss:$24 sps:$4 sm:$0xff]   ;;  %v4372_v35 = vsel %vm2139_vm1, %v4371_v43, %v4370_v29  ;;  %v4411_v43 = vrot.slane %v4256_v40, 7  ;;  %v4458_v34 = vsel %vm2142_vm2, %v4457_v9, %v4456_v4 }
 0x1aa   :  { %v4304_v21 = vunpack.c.l.b16 %v754_v38  ;;  %v4262_v38 = vunpack.c.l.b16 %v712_v51 }
 0x1ab   :  { %4078 = vmatpush1.bf16.msra.mxu0 %v9594_v42  ;;  %6148 = vmatpush1.bf16.msra.mxu1 %v9597_v48  ;;  %v11777_v42 = vld [vmem:[%s12004_s0 + $0x2c] sm:$0xf] }
 0x1ac   :  { %4079 = vmatprep.subr.bf16.mxu0 %v9602_v11  ;;  %6149 = vmatprep.subr.bf16.mxu1 %v9605_v5  ;;  %v310_v48 = vrot.slane %v11777_v42, %v11186_v54  ;;  %v700_v11 = vpack.c.bf16 %v238_v59, %v238_v59  ;;  %v748_v5 = vpack.c.bf16 %v430_v3, %v430_v3  ;;  %v9620_v59 = vld [vmem:[#allocation4 + $0x524] ss:$24 sps:$4 sm:$0xff]   ;;  %v4495_v29 = vrot.slane %v4304_v21, 7 }
 0x1ad   :  { %v358_v3 = vrot.slane %v11811_v6, %v11186_v54  ;;  %v4413_v40 = vrot.slane %v4262_v38, 6  ;;  %v9632_v38 = vld [vmem:[#allocation4 + $0x584] ss:$24 sps:$4 sm:$0xff]  }
 0x1ae   :  { %v4298_v37 = vunpack.c.l.b16 %v748_v5 }
 0x1af   :  { %4080 = vmatpush1.bf16.msra.mxu0 %v9600_v0  ;;  %6150 = vmatpush1.bf16.msra.mxu1 %v9603_v13  ;;  %v334_v13 = vrot.slane %v11796_v50, %v11186_v54  ;;  %v730_v5 = vpack.c.bf16 %v358_v3, %v358_v3 }
 0x1b0   :  { %4081 = vmatprep.subr.bf16.mxu0 %v9608_v57  ;;  %6151 = vmatprep.subr.bf16.mxu1 %v9611_v14  ;;  %v718_v57 = vpack.c.bf16 %v310_v48, %v310_v48  ;;  %v766_v14 = vpack.c.bf16 %v502_v15, %v502_v15  ;;  %v9621_v48 = vld [vmem:[#allocation2 + $0x518] ss:$24 sps:$4 sm:$0xff]   ;;  %v4374_v15 = vsel %vm2142_vm2, %v4373_v24, %v4372_v35  ;;  %v9629_v24 = vld [vmem:[#allocation2 + $0x54c] ss:$24 sps:$4 sm:$0xff]   ;;  %v4459_v35 = vrot.slane %v11771_v10, 4 }
 0x1b1   :  { %v724_v0 = vpack.c.bf16 %v334_v13, %v334_v13  ;;  %v778_v13 = vpack.c.bf16 %v550_v2, %v550_v2  ;;  %v11853_v10 = vld [vmem:[%s12004_s0 + $0xbc] sm:$0xf] }
 0x1b2   :  { %v4268_v51 = vunpack.c.l.b16 %v718_v57  ;;  %v11846_v57 = vld [vmem:[%s12004_s0 + $0x5c] sm:$0xf]  ;;  %v598_v3 = vrot.slane %v11853_v10, %v11186_v54 }
 0x1b3   :  { %4082 = vmatpush1.bf16.msra.mxu0 %v9606_v33  ;;  %6152 = vmatpush1.bf16.msra.mxu1 %v9609_v53  ;;  %v4310_v33 = vunpack.c.l.b16 %v760_v46  ;;  %v4250_v53 = vunpack.c.l.b16 %v700_v11  ;;  %v4316_v46 = vunpack.c.l.b16 %v766_v14  ;;  %v574_v11 = vrot.slane %v11835_v18, %v11186_v54 }
 0x1b4   :  { %4083 = vmatprep.subr.bf16.mxu0 %v9614_v32  ;;  %6153 = vmatprep.subr.bf16.mxu1 %v9617_v31  ;;  %v11828_v32 = vld [vmem:[%s12004_s0 + $0x50] sm:$0xf]  ;;  %v406_v14 = vrot.slane %v11846_v57, %v11186_v54  ;;  %v4415_v4 = vrot.slane %v4268_v51, 5  ;;  %v4280_v51 = vunpack.c.l.b16 %v730_v5  ;;  %v12034_v5 = vpack.c.bf16 %v11689_v16, %v11689_v16 }
 0x1b5   :  { %v382_v31 = vrot.slane %v11828_v32, %v11186_v54  ;;  %v4497_v21 = vrot.slane %v4310_v33, 6  ;;  %v4499_v9 = vrot.slane %v4316_v46, 5  ;;  %v9635_v33 = vld [vmem:[#allocation2 + $0x57c] ss:$24 sps:$4 sm:$0xff]   ;;  %v9633_v46 = vld [vmem:[#allocation2 + $0x578] ss:$24 sps:$4 sm:$0xff]  }
 0x1b6   :  { %v12033_v54 = vrot.slane %v11733_v7, 4  ;;  %v4337_v7 = vunpack.c.l.b16 %v12034_v5  ;;  %v9659_v5 = vld [vmem:[#allocation2 + $0x63c] ss:$24 sps:$4 sm:$0xff]  }
 0x1b7   :  { %4084 = vmatpush1.bf16.msra.mxu0 %v9612_v17  ;;  %6154 = vmatpush1.bf16.msra.mxu1 %v9615_v44  ;;  %v4412_v17 = vsel %vm2136_vm0, %v4411_v43, %v4250_v53  ;;  %v4496_v44 = vsel %vm2136_vm0, %v4495_v29, %v4298_v37  ;;  %v736_v2 = vpack.c.bf16 %v382_v31, %v382_v31  ;;  %v4377_v29 = vrot.slane %v11735_v41, 3 }
 0x1b8   :  { %4085 = vmatprep.subr.bf16.mxu0 %v9620_v59  ;;  %6155 = vmatprep.subr.bf16.mxu1 %v9623_v49  ;;  %v4274_v59 = vunpack.c.l.b16 %v724_v0  ;;  %v4322_v49 = vunpack.c.l.b16 %v772_v39  ;;  %v12032_v53 = vpack.c.bf16 %v11683_v52, %v11683_v52  ;;  %v784_v39 = vpack.c.bf16 %v574_v11, %v574_v11 }
 0x1b9   :  { %v4414_v37 = vsel %vm2139_vm1, %v4413_v40, %v4412_v17  ;;  %v4498_v43 = vsel %vm2139_vm1, %v4497_v21, %v4496_v44  ;;  %v4461_v31 = vrot.slane %v11788_v56, 3  ;;  %v4376_v52 = vsel %vm2145_vm3, %v12033_v54, %v4374_v15  ;;  %v9638_v56 = vld [vmem:[#allocation4 + $0x5b4] ss:$24 sps:$4 sm:$0xff]  }
 0x1ba   :  { %v4331_v0 = vunpack.c.l.b16 %v12032_v53  ;;  %v4460_v11 = vsel %vm2145_vm3, %v4459_v35, %v4458_v34  ;;  %v4417_v53 = vrot.slane %v4274_v59, 4  ;;  %v4501_v40 = vrot.slane %v4322_v49, 4  ;;  %v9636_v59 = vld [vmem:[#allocation4 + $0x5b0] ss:$24 sps:$4 sm:$0xff]  }
 0x1bb   :  { %4086 = vmatpush1.bf16.msra.mxu0 %v9618_v45  ;;  %6156 = vmatpush1.bf16.msra.mxu1 %v9621_v48  ;;  %v4328_v45 = vunpack.c.l.b16 %v778_v13  ;;  %v9630_v48 = vld [vmem:[#allocation4 + $0x580] ss:$24 sps:$4 sm:$0xff]   ;;  %v742_v17 = vpack.c.bf16 %v406_v14, %v406_v14  ;;  %v790_v21 = vpack.c.bf16 %v598_v3, %v598_v3  ;;  %v4500_v41 = vsel %vm2142_vm2, %v4499_v9, %v4498_v43  ;;  %v9644_v3 = vld [vmem:[#allocation4 + $0x5e4] ss:$24 sps:$4 sm:$0xff]  }
 0x1bc   :  { %4087 = vmatprep.subr.bf16.mxu0 %v9626_v22  ;;  %6157 = vmatprep.subr.bf16.mxu1 %v9629_v24  ;;  %v4416_v22 = vsel %vm2142_vm2, %v4415_v4, %v4414_v37  ;;  %v9641_v24 = vld [vmem:[#allocation2 + $0x5ac] ss:$24 sps:$4 sm:$0xff]   ;;  %v4379_v54 = vrot.slane %v11737_v1, 2  ;;  %v4286_v15 = vunpack.c.l.b16 %v736_v2  ;;  %v4334_v35 = vunpack.c.l.b16 %v784_v39  ;;  %v9647_v9 = vld [vmem:[#allocation2 + $0x5dc] ss:$24 sps:$4 sm:$0xff]  }
 0x1bd   :  { %v4378_v13 = vsel %vm2148_vm4, %v4377_v29, %v4376_v52  ;;  %v4463_v44 = vrot.slane %v4331_v0, 2  ;;  %v4419_v34 = vrot.slane %v4280_v51, 3  ;;  %v4503_v14 = vrot.slane %v4328_v45, 3  ;;  %v9653_v52 = vld [vmem:[#allocation2 + $0x60c] ss:$24 sps:$4 sm:$0xff]  }
 0x1be   :  { %v4418_v49 = vsel %vm2145_vm3, %v4417_v53, %v4416_v22  ;;  %v4502_v16 = vsel %vm2145_vm3, %v4501_v40, %v4500_v41  ;;  %v4381_v1 = vrot.slane %v11739_v12, 1  ;;  %v4292_v2 = vunpack.c.l.b16 %v742_v17  ;;  %v9645_v12 = vld [vmem:[#allocation2 + $0x5d8] ss:$24 sps:$4 sm:$0xff]  }
 0x1bf   :  { %4088 = vmatpush1.bf16.msra.mxu0 %v9624_v20  ;;  %6158 = vmatpush1.bf16.msra.mxu1 %v9627_v55  ;;  %v9639_v20 = vld [vmem:[#allocation2 + $0x5a8] ss:$24 sps:$4 sm:$0xff]   ;;  %v4462_v55 = vsel %vm2148_vm4, %v4461_v31, %v4460_v11  ;;  %v4340_v4 = vunpack.c.l.b16 %v790_v21  ;;  %v4421_v0 = vrot.slane %v4286_v15, 2  ;;  %v4505_v39 = vrot.slane %v4334_v35, 2  ;;  %v9662_v35 = vld [vmem:[#allocation4 + $0x674] ss:$24 sps:$4 sm:$0xff]  }
 0x1c0   :  { %4089 = vmatprep.subr.bf16.mxu0 %v9632_v38  ;;  %6159 = vmatprep.subr.bf16.mxu1 %v9635_v33  ;;  %v4380_v38 = vsel %vm2151_vm5, %v4379_v54, %v4378_v13  ;;  %v4465_v33 = vrot.slane %v4337_v7, 1  ;;  %v4464_v37 = vsel %vm2151_vm5, %v4463_v44, %v4462_v55  ;;  %v4420_v43 = vsel %vm2148_vm4, %v4419_v34, %v4418_v49  ;;  %v9642_v31 = vld [vmem:[#allocation4 + $0x5e0] ss:$24 sps:$4 sm:$0xff]   ;;  %v9648_v17 = vld [vmem:[#allocation4 + $0x610] ss:$24 sps:$4 sm:$0xff]  }
 0x1c1   :  { %v4504_v29 = vsel %vm2148_vm4, %v4503_v14, %v4502_v16  ;;  %v4382_v51 = vsel %vm2154_vm6, %v4381_v1, %v4380_v38  ;;  %v4423_v45 = vrot.slane %v4292_v2, 1  ;;  %v4422_v53 = vsel %vm2151_vm5, %v4421_v0, %v4420_v43  ;;  %v9651_v21 = vld [vmem:[#allocation2 + $0x608] ss:$24 sps:$4 sm:$0xff]   ;;  %v9657_v54 = vld [vmem:[#allocation2 + $0x638] ss:$24 sps:$4 sm:$0xff]  }
 0x1c2   :  { %v4466_v11 = vsel %vm2154_vm6, %v4465_v33, %v4464_v37  ;;  %v4506_v40 = vsel %vm2151_vm5, %v4505_v39, %v4504_v29  ;;  %v9654_v7 = vld [vmem:[#allocation4 + $0x640] ss:$24 sps:$4 sm:$0xff]   ;;  %v9665_v13 = vld [vmem:[#allocation2 + $0x66c] ss:$24 sps:$4 sm:$0xff]   ;;  %v9660_v44 = vld [vmem:[#allocation4 + $0x670] ss:$24 sps:$4 sm:$0xff]  }
 0x1c3   :  { %4090 = vmatpush1.bf16.msra.mxu0 %v9630_v48  ;;  %6160 = vmatpush1.bf16.msra.mxu1 %v9633_v46  ;;  %v4507_v48 = vrot.slane %v4340_v4, 1  ;;  %v9650_v46 = vld [vmem:[#allocation4 + $0x614] ss:$24 sps:$4 sm:$0xff]   ;;  %v11887_v22 = vpack.c.b16 %v4466_v11, %v4382_v51  ;;  %v4424_v41 = vsel %vm2154_vm6, %v4423_v45, %v4422_v53  ;;  %v9663_v34 = vld [vmem:[#allocation2 + $0x668] ss:$24 sps:$4 sm:$0xff]  }
 0x1c4   :  { %4091 = vmatprep.subr.bf16.mxu0 %v9638_v56  ;;  %6161 = vmatprep.subr.bf16.mxu1 %v9641_v24  ;;  %v9656_v24 = vld [vmem:[#allocation4 + $0x644] ss:$24 sps:$4 sm:$0xff]   ;;  %v9674_v55 = vld [vmem:[#allocation4 + $0x6d4] ss:$24 sps:$4 sm:$0xff]   ;;  %v9672_v16 = vld [vmem:[#allocation4 + $0x6d0] ss:$24 sps:$4 sm:$0xff]  }
 0x1c5   :  { %v4508_v56 = vsel %vm2154_vm6, %v4507_v48, %v4506_v40  ;;  %v9668_v14 = vld [vmem:[#allocation4 + $0x6a4] ss:$24 sps:$4 sm:$0xff]   ;;  %v9678_v2 = vld [vmem:[#allocation4 + $0x700] ss:$24 sps:$4 sm:$0xff]   ;;  %v9684_v33 = vld [vmem:[#allocation4 + $0x730] ss:$24 sps:$4 sm:$0xff]   ;;  %v282_v48 = vrot.slane %v11751_v61, %v11441_v47  ;;  %v306_v61 = vrot.slane %v11777_v42, %v11441_v47 }
 0x1c6   :  { %v11891_v15 = vpack.c.b16 %v4508_v56, %v4424_v41  ;;  %v9677_v49 = vld [vmem:[#allocation2 + $0x6cc] ss:$24 sps:$4 sm:$0xff]   ;;  %v9681_v4 = vld [vmem:[#allocation2 + $0x6f8] ss:$24 sps:$4 sm:$0xff]   ;;  %v9687_v0 = vld [vmem:[#allocation2 + $0x728] ss:$24 sps:$4 sm:$0xff]  }
 0x1c7   :  { %4092 = vmatpush1.bf16.msra.mxu0 %v9636_v59  ;;  %6162 = vmatpush1.bf16.msra.mxu1 %v9639_v20  ;;  %v9671_v59 = vld [vmem:[#allocation2 + $0x69c] ss:$24 sps:$4 sm:$0xff]   ;;  %v9669_v20 = vld [vmem:[#allocation2 + $0x698] ss:$24 sps:$4 sm:$0xff]   ;;  %v9689_v38 = vld [vmem:[#allocation2 + $0x72c] ss:$24 sps:$4 sm:$0xff]   ;;  %v711_v41 = vpack.c.bf16 %v282_v48, %v282_v48 }
 0x1c8   :  { %4093 = vmatprep.subr.bf16.mxu0 %v9644_v3  ;;  %6163 = vmatprep.subr.bf16.mxu1 %v9647_v9  ;;  %v9675_v3 = vld [vmem:[#allocation2 + $0x6c8] ss:$24 sps:$4 sm:$0xff]   ;;  %v9680_v1 = vld [vmem:[#allocation4 + $0x704] ss:$24 sps:$4 sm:$0xff]   ;;  %v9686_v9 = vld [vmem:[#allocation4 + $0x734] ss:$24 sps:$4 sm:$0xff]  }
 0x1c9   :  { %v9692_v39 = vld [vmem:[#allocation4 + $0x764] ss:$24 sps:$4 sm:$0xff]   ;;  %v9690_v43 = vld [vmem:[#allocation4 + $0x760] ss:$24 sps:$4 sm:$0xff]   ;;  %v9698_v51 = vld [vmem:[#allocation4 + $0x794] ss:$24 sps:$4 sm:$0xff]  }
 0x1ca   :  { %v9695_v37 = vld [vmem:[#allocation2 + $0x75c] ss:$24 sps:$4 sm:$0xff]   ;;  %v9693_v29 = vld [vmem:[#allocation2 + $0x758] ss:$24 sps:$4 sm:$0xff]   ;;  %v9701_v45 = vld [vmem:[#allocation2 + $0x78c] ss:$24 sps:$4 sm:$0xff]  }
 0x1cb   :  { %4094 = vmatpush1.bf16.msra.mxu0 %v9642_v31  ;;  %6164 = vmatpush1.bf16.msra.mxu1 %v9645_v12  ;;  %v258_v31 = vrot.slane %v11718_v30, %v11441_v47  ;;  %v450_v12 = vrot.slane %v11725_v63, %v11441_v47  ;;  %v9699_v11 = vld [vmem:[#allocation2 + $0x788] ss:$24 sps:$4 sm:$0xff]   ;;  %v234_v30 = vrot.slane %v11744_v23, %v11441_v47  ;;  %v9710_v42 = vld [vmem:[#allocation4 + $0x7f4] ss:$24 sps:$4 sm:$0xff]  }
 0x1cc   :  { %4106 = vmatprep.subr.bf16.mxu0 %v9650_v46  ;;  %6176 = vmatprep.subr.bf16.mxu1 %v9653_v52  ;;  %v474_v46 = vrot.slane %v11758_v60, %v11441_v47  ;;  %v9696_v52 = vld [vmem:[#allocation4 + $0x790] ss:$24 sps:$4 sm:$0xff]   ;;  %v426_v63 = vrot.slane %v11765_v19, %v11441_v47  ;;  %v498_v60 = vrot.slane %v11784_v26, %v11441_v47  ;;  %v9702_v23 = vld [vmem:[#allocation4 + $0x7c0] ss:$24 sps:$4 sm:$0xff]   ;;  %v9713_v26 = vld [vmem:[#allocation2 + $0x7ec] ss:$24 sps:$4 sm:$0xff]  }
 0x1cd   :  { %v705_v53 = vpack.c.bf16 %v258_v31, %v258_v31  ;;  %v753_v40 = vpack.c.bf16 %v450_v12, %v450_v12 }
 0x1ce   :  { %4096 = vmatmul.mubr.bf16.vlgmr.msra.gmra.mrb[4].mxu0 %v11069_v27  ;;  %6166 = vmatmul.mubr.bf16.vlgmr.msra.gmra.mrb[0].mxu1 %v11887_v22  ;;  %v9666_v27 = vld [vmem:[#allocation4 + $0x6a0] ss:$24 sps:$4 sm:$0xff]   ;;  %v759_v56 = vpack.c.bf16 %v474_v46, %v474_v46  ;;  %v747_v19 = vpack.c.bf16 %v426_v63, %v426_v63  ;;  %v9725_v46 = vld [vmem:[#allocation2 + $0x84c] ss:$24 sps:$4 sm:$0xff]  }
 0x1cf   :  { %4107 = vmatpush1.bf16.msra.mxu0 %v9648_v17  ;;  %6177 = vmatpush1.bf16.msra.mxu1 %v9651_v21  ;;  %v9704_v17 = vld [vmem:[#allocation4 + $0x7c4] ss:$24 sps:$4 sm:$0xff]  }
 0x1d0   :  { %4108 = vmatprep.subr.bf16.mxu0 %v9656_v24  ;;  %6178 = vmatprep.subr.bf16.mxu1 %v9659_v5  ;;  %v9707_v21 = vld [vmem:[#allocation2 + $0x7bc] ss:$24 sps:$4 sm:$0xff]   ;;  %v9705_v24 = vld [vmem:[#allocation2 + $0x7b8] ss:$24 sps:$4 sm:$0xff]   ;;  %v699_v5 = vpack.c.bf16 %v234_v30, %v234_v30 }
 0x1d1   :  { %6208 = vmatprep.mubr.bf16.mxu1 %v11891_v15  ;;  %4138 = vmatprep.mubr.bf16.mxu0 %v11181_v62  ;;  %v9683_v62 = vld [vmem:[#allocation2 + $0x6fc] ss:$24 sps:$4 sm:$0xff]  }
 0x1d3   :  { %4109 = vmatpush1.bf16.msra.mxu0 %v9654_v7  ;;  %6179 = vmatpush1.bf16.msra.mxu1 %v9657_v54  ;;  %v4255_v7 = vunpack.c.l.b16 %v705_v53  ;;  %v4303_v54 = vunpack.c.l.b16 %v753_v40 }
 0x1d4   :  { %4110 = vmatprep.subr.bf16.mxu0 %v9662_v35  ;;  %6180 = vmatprep.subr.bf16.mxu1 %v9665_v13  ;;  %v330_v35 = vrot.slane %v11796_v50, %v11441_v47  ;;  %v522_v13 = vrot.slane %v11803_v58, %v11441_v47  ;;  %v9708_v50 = vld [vmem:[#allocation4 + $0x7f0] ss:$24 sps:$4 sm:$0xff]   ;;  %v4297_v58 = vunpack.c.l.b16 %v747_v19 }
 0x1d7   :  { %4111 = vmatpush1.bf16.msra.mxu0 %v9660_v44  ;;  %6181 = vmatpush1.bf16.msra.mxu1 %v9663_v34  ;;  %v717_v44 = vpack.c.bf16 %v306_v61, %v306_v61  ;;  %v765_v34 = vpack.c.bf16 %v498_v60, %v498_v60 }
 0x1d8   :  { %4112 = vmatprep.subr.bf16.mxu0 %v9668_v14  ;;  %6182 = vmatprep.subr.bf16.mxu1 %v9671_v59  ;;  %v354_v14 = vrot.slane %v11811_v6, %v11441_v47  ;;  %v546_v59 = vrot.slane %v11818_v25, %v11441_v47  ;;  %v378_v6 = vrot.slane %v11828_v32, %v11441_v47 }
 0x1d9   :  { %v570_v25 = vrot.slane %v11835_v18, %v11441_v47  ;;  %v402_v32 = vrot.slane %v11846_v57, %v11441_v47  ;;  %v594_v18 = vrot.slane %v11853_v10, %v11441_v47  ;;  %v9723_v57 = vld [vmem:[#allocation2 + $0x848] ss:$24 sps:$4 sm:$0xff]   ;;  %v9728_v10 = vld [vmem:[#allocation4 + $0x884] ss:$24 sps:$4 sm:$0xff]  }
 0x1db   :  { %4113 = vmatpush1.bf16.msra.mxu0 %v9666_v27  ;;  %6183 = vmatpush1.bf16.msra.mxu1 %v9669_v20  ;;  %v4261_v27 = vunpack.c.l.b16 %v711_v41  ;;  %v4309_v20 = vunpack.c.l.b16 %v759_v56  ;;  %v783_v63 = vpack.c.bf16 %v570_v25, %v570_v25  ;;  %v741_v60 = vpack.c.bf16 %v402_v32, %v402_v32  ;;  %v9741_v25 = vld [vmem:[#allocation2 + $0x8d8] ss:$24 sps:$4 sm:$0xff]   ;;  %v9755_v32 = vld [vmem:[#allocation2 + $0x94] ss:$24 sps:$4 sm:$0xff]  }
 0x1dc   :  { %4114 = vmatprep.subr.bf16.mxu0 %v9674_v55  ;;  %6184 = vmatprep.subr.bf16.mxu1 %v9677_v49  ;;  %v9711_v55 = vld [vmem:[#allocation2 + $0x7e8] ss:$24 sps:$4 sm:$0xff]   ;;  %v4249_v49 = vunpack.c.l.b16 %v699_v5 }
 0x1df   :  { %4115 = vmatpush1.bf16.msra.mxu0 %v9672_v16  ;;  %6185 = vmatpush1.bf16.msra.mxu1 %v9675_v3  ;;  %v4397_v16 = vrot.slane %v4255_v7, 7  ;;  %v4481_v3 = vrot.slane %v4303_v54, 7  ;;  %v4333_v54 = vunpack.c.l.b16 %v783_v63  ;;  %v9765_v63 = vld [vmem:[#allocation2 + $0x150] ss:$24 sps:$4 sm:$0xff]  }
 0x1e0   :  { %4116 = vmatprep.subr.bf16.mxu0 %v9680_v1  ;;  %6186 = vmatprep.subr.bf16.mxu1 %v9683_v62  ;;  %v723_v1 = vpack.c.bf16 %v330_v35, %v330_v35  ;;  %v771_v62 = vpack.c.bf16 %v522_v13, %v522_v13  ;;  %v9726_v35 = vld [vmem:[#allocation4 + $0x880] ss:$24 sps:$4 sm:$0xff]  }
 0x1e1   :  { %v4398_v31 = vsel %vm2136_vm0, %v4397_v16, %v4249_v49  ;;  %v4482_v12 = vsel %vm2136_vm0, %v4481_v3, %v4297_v58  ;;  %v9729_v13 = vld [vmem:[#allocation2 + $0x878] ss:$24 sps:$4 sm:$0xff]   ;;  %v9735_v58 = vld [vmem:[#allocation2 + $0x8a8] ss:$24 sps:$4 sm:$0xff]  }
 0x1e2   :  { %v4321_v48 = vunpack.c.l.b16 %v771_v62  ;;  %v9732_v49 = vld [vmem:[#allocation4 + $0x8b0] ss:$24 sps:$4 sm:$0xff]   ;;  %v9743_v62 = vld [vmem:[#allocation2 + $0x8dc] ss:$24 sps:$4 sm:$0xff]  }
 0x1e3   :  { %4117 = vmatpush1.bf16.msra.mxu0 %v9678_v2  ;;  %6187 = vmatpush1.bf16.msra.mxu1 %v9681_v4  ;;  %v9716_v2 = vld [vmem:[#allocation4 + $0x824] ss:$24 sps:$4 sm:$0xff]  }
 0x1e4   :  { %4118 = vmatprep.subr.bf16.mxu0 %v9686_v9  ;;  %6188 = vmatprep.subr.bf16.mxu1 %v9689_v38  ;;  %v9719_v4 = vld [vmem:[#allocation2 + $0x81c] ss:$24 sps:$4 sm:$0xff]   ;;  %v4267_v9 = vunpack.c.l.b16 %v717_v44  ;;  %v4315_v38 = vunpack.c.l.b16 %v765_v34  ;;  %v4487_v56 = vrot.slane %v4321_v48, 4 }
 0x1e5   :  { %v9758_v48 = vld [vmem:[#allocation2 + $0xc4] ss:$24 sps:$4 sm:$0xff]  }
 0x1e6   :  { %v4485_v30 = vrot.slane %v4315_v38, 5  ;;  %v9738_v38 = vld [vmem:[#allocation4 + $0x8e0] ss:$24 sps:$4 sm:$0xff]  }
 0x1e7   :  { %4119 = vmatpush1.bf16.msra.mxu0 %v9684_v33  ;;  %6189 = vmatpush1.bf16.msra.mxu1 %v9687_v0  ;;  %v4399_v33 = vrot.slane %v4261_v27, 6  ;;  %v4483_v0 = vrot.slane %v4309_v20, 6  ;;  %v4291_v27 = vunpack.c.l.b16 %v741_v60  ;;  %v9779_v60 = vld [vmem:[#allocation2 + $0x214] ss:$24 sps:$4 sm:$0xff]  }
 0x1e8   :  { %4120 = vmatprep.subr.bf16.mxu0 %v9692_v39  ;;  %6190 = vmatprep.subr.bf16.mxu1 %v9695_v37  ;;  %v9714_v39 = vld [vmem:[#allocation4 + $0x820] ss:$24 sps:$4 sm:$0xff]  }
 0x1e9   :  { %v9717_v37 = vld [vmem:[#allocation2 + $0x818] ss:$24 sps:$4 sm:$0xff]   ;;  %v4400_v53 = vsel %vm2139_vm1, %v4399_v33, %v4398_v31  ;;  %v4484_v40 = vsel %vm2139_vm1, %v4483_v0, %v4482_v12  ;;  %v9746_v33 = vld [vmem:[#allocation2 + $0x4] ss:$24 sps:$4 sm:$0xff]  }
 0x1ea   :  { %v4486_v19 = vsel %vm2142_vm2, %v4485_v30, %v4484_v40  ;;  %v9747_v31 = vld [vmem:[#allocation2 + $0x30] ss:$24 sps:$4 sm:$0xff]   ;;  %v9752_v12 = vld [vmem:[#allocation2 + $0x64] ss:$24 sps:$4 sm:$0xff]   ;;  %v9767_v30 = vld [vmem:[#allocation2 + $0x154] ss:$24 sps:$4 sm:$0xff]  }
 0x1eb   :  { %4121 = vmatpush1.bf16.msra.mxu0 %v9690_v43  ;;  %6191 = vmatpush1.bf16.msra.mxu1 %v9693_v29  ;;  %v729_v43 = vpack.c.bf16 %v354_v14, %v354_v14  ;;  %v777_v29 = vpack.c.bf16 %v546_v59, %v546_v59  ;;  %v4488_v34 = vsel %vm2145_vm3, %v4487_v56, %v4486_v19  ;;  %v9734_v14 = vld [vmem:[#allocation4 + $0x8b4] ss:$24 sps:$4 sm:$0xff]   ;;  %v9768_v40 = vld [vmem:[#allocation2 + $0x180] ss:$24 sps:$4 sm:$0xff]   ;;  %v9782_v56 = vld [vmem:[#allocation2 + $0x244] ss:$24 sps:$4 sm:$0xff]  }
 0x1ec   :  { %4122 = vmatprep.subr.bf16.mxu0 %v9698_v51  ;;  %6192 = vmatprep.subr.bf16.mxu1 %v9701_v45  ;;  %v9722_v51 = vld [vmem:[#allocation4 + $0x854] ss:$24 sps:$4 sm:$0xff]   ;;  %v4273_v45 = vunpack.c.l.b16 %v723_v1  ;;  %v9740_v1 = vld [vmem:[#allocation4 + $0x8e4] ss:$24 sps:$4 sm:$0xff]   ;;  %v9786_v19 = vld [vmem:[#allocation2 + $0x2a0] ss:$24 sps:$4 sm:$0xff]  }
 0x1ed   :  { %v4327_v61 = vunpack.c.l.b16 %v777_v29  ;;  %v9737_v59 = vld [vmem:[#allocation2 + $0x8ac] ss:$24 sps:$4 sm:$0xff]  }
 0x1ee   :  { %v4403_v41 = vrot.slane %v4273_v45, 4  ;;  %v9749_v29 = vld [vmem:[#allocation2 + $0x34] ss:$24 sps:$4 sm:$0xff]   ;;  %v9753_v45 = vld [vmem:[#allocation2 + $0x90] ss:$24 sps:$4 sm:$0xff]  }
 0x1ef   :  { %4123 = vmatpush1.bf16.msra.mxu0 %v9696_v52  ;;  %6193 = vmatpush1.bf16.msra.mxu1 %v9699_v11  ;;  %v735_v52 = vpack.c.bf16 %v378_v6, %v378_v6  ;;  %v4401_v11 = vrot.slane %v4267_v9, 5 }
 0x1f0   :  { %4124 = vmatprep.subr.bf16.mxu0 %v9704_v17  ;;  %6194 = vmatprep.subr.bf16.mxu1 %v9707_v21  ;;  %v9720_v17 = vld [vmem:[#allocation4 + $0x850] ss:$24 sps:$4 sm:$0xff]   ;;  %v4279_v21 = vunpack.c.l.b16 %v729_v43  ;;  %v9744_v43 = vld [vmem:[#allocation2] ss:$24 sps:$4 sm:$0xff]  }
 0x1f1   :  { %v4402_v5 = vsel %vm2142_vm2, %v4401_v11, %v4400_v53  ;;  %v4285_v7 = vunpack.c.l.b16 %v735_v52  ;;  %v9764_v52 = vld [vmem:[#allocation2 + $0x124] ss:$24 sps:$4 sm:$0xff]   ;;  %v9762_v11 = vld [vmem:[#allocation2 + $0x120] ss:$24 sps:$4 sm:$0xff]  }
 0x1f2   :  { %v4404_v44 = vsel %vm2145_vm3, %v4403_v41, %v4402_v5  ;;  %v9770_v53 = vld [vmem:[#allocation2 + $0x184] ss:$24 sps:$4 sm:$0xff]   ;;  %v9777_v41 = vld [vmem:[#allocation2 + $0x210] ss:$24 sps:$4 sm:$0xff]  }
 0x1f3   :  { %4125 = vmatpush1.bf16.msra.mxu0 %v9702_v23  ;;  %6195 = vmatpush1.bf16.msra.mxu1 %v9705_v24  ;;  %v9731_v23 = vld [vmem:[#allocation2 + $0x87c] ss:$24 sps:$4 sm:$0xff]   ;;  %v789_v24 = vpack.c.bf16 %v594_v18, %v594_v18 }
 0x1f4   :  { %4126 = vmatprep.subr.bf16.mxu0 %v9710_v42  ;;  %6196 = vmatprep.subr.bf16.mxu1 %v9713_v26  ;;  %v4405_v42 = vrot.slane %v4279_v21, 3  ;;  %v4489_v26 = vrot.slane %v4327_v61, 3  ;;  %v9761_v18 = vld [vmem:[#allocation2 + $0xf4] ss:$24 sps:$4 sm:$0xff]   ;;  %v9776_v21 = vld [vmem:[#allocation2 + $0x1e4] ss:$24 sps:$4 sm:$0xff]  }
 0x1f5   :  { %v4339_v20 = vunpack.c.l.b16 %v789_v24  ;;  %v9774_v61 = vld [vmem:[#allocation2 + $0x1e0] ss:$24 sps:$4 sm:$0xff]   ;;  %v9783_v24 = vld [vmem:[#allocation2 + $0x270] ss:$24 sps:$4 sm:$0xff]   ;;  %v9788_v5 = vld [vmem:[#allocation2 + $0x2a4] ss:$24 sps:$4 sm:$0xff]  }
 0x1f6   :  { %v4406_v16 = vsel %vm2148_vm4, %v4405_v42, %v4404_v44  ;;  %v4490_v3 = vsel %vm2148_vm4, %v4489_v26, %v4488_v34  ;;  %v9797_v42 = vld [vmem:[#allocation2 + $0x334] ss:$24 sps:$4 sm:$0xff]   ;;  %v9795_v26 = vld [vmem:[#allocation2 + $0x330] ss:$24 sps:$4 sm:$0xff]   ;;  %v9800_v34 = vld [vmem:[#allocation2 + $0x364] ss:$24 sps:$4 sm:$0xff]  }
 0x1f7   :  { %4127 = vmatpush1.bf16.msra.mxu0 %v9708_v50  ;;  %6197 = vmatpush1.bf16.msra.mxu1 %v9711_v55  ;;  %v4407_v50 = vrot.slane %v4285_v7, 2  ;;  %v4491_v55 = vrot.slane %v4333_v54, 2  ;;  %v9791_v7 = vld [vmem:[#allocation2 + $0x2d4] ss:$24 sps:$4 sm:$0xff]   ;;  %v9789_v54 = vld [vmem:[#allocation2 + $0x2d0] ss:$24 sps:$4 sm:$0xff]  }
 0x1f8   :  { %4128 = vmatprep.subr.bf16.mxu0 %v9716_v2  ;;  %6198 = vmatprep.subr.bf16.mxu1 %v9719_v4  ;;  %v4409_v2 = vrot.slane %v4291_v27, 1  ;;  %v4493_v4 = vrot.slane %v4339_v20, 1  ;;  %v12035_v44 = vld [vmem:[#allocation21_spill] sm:$0xff]  ;;  %v9806_v20 = vld [vmem:[#allocation2 + $0x3c4] ss:$24 sps:$4 sm:$0xff]  }
 0x1f9   :  { %v4408_v6 = vsel %vm2151_vm5, %v4407_v50, %v4406_v16  ;;  %v4492_v9 = vsel %vm2151_vm5, %v4491_v55, %v4490_v3  ;;  %v9801_v27 = vld [vmem:[#allocation2 + $0x390] ss:$24 sps:$4 sm:$0xff]   ;;  %v9804_v50 = vld [vmem:[#allocation2 + $0x3c0] ss:$24 sps:$4 sm:$0xff]   ;;  %v9809_v55 = vld [vmem:[#allocation2 + $0x3f4] ss:$24 sps:$4 sm:$0xff]  }
 0x1fa   :  { %v4410_v0 = vsel %vm2154_vm6, %v4409_v2, %v4408_v6  ;;  %v9810_v16 = vld [vmem:[#allocation2 + $0x420] ss:$24 sps:$4 sm:$0xff]   ;;  %v9815_v3 = vld [vmem:[#allocation2 + $0x454] ss:$24 sps:$4 sm:$0xff]   ;;  %v9819_v6 = vld [vmem:[#allocation2 + $0x4b0] ss:$24 sps:$4 sm:$0xff]  }
 0x1fb   :  { %4129 = vmatpush1.bf16.msra.mxu0 %v9714_v39  ;;  %6199 = vmatpush1.bf16.msra.mxu1 %v9717_v37  ;;  %v4494_v39 = vsel %vm2154_vm6, %v4493_v4, %v4492_v9  ;;  %v9816_v2 = vld [vmem:[#allocation2 + $0x480] ss:$24 sps:$4 sm:$0xff]   ;;  %v9821_v4 = vld [vmem:[#allocation2 + $0x4b4] ss:$24 sps:$4 sm:$0xff]   ;;  %v9824_v9 = vld [vmem:[#allocation2 + $0x4e4] ss:$24 sps:$4 sm:$0xff]  }
 0x1fc   :  { %4130 = vmatprep.subr.bf16.mxu0 %v9722_v51  ;;  %6200 = vmatprep.subr.bf16.mxu1 %v9725_v46  ;;  %v11943_v37 = vpack.c.b16 %v4494_v39, %v4410_v0  ;;  %v9750_v51 = vld [vmem:[#allocation2 + $0x60] ss:$24 sps:$4 sm:$0xff]   ;;  %v9830_v0 = vld [vmem:[#allocation2 + $0x544] ss:$24 sps:$4 sm:$0xff]  }
 0x1fd   :  { %v9756_v46 = vld [vmem:[#allocation2 + $0xc0] ss:$24 sps:$4 sm:$0xff]  }
 0x1fe   :  { %v9828_v39 = vld [vmem:[#allocation2 + $0x540] ss:$24 sps:$4 sm:$0xff]  }
 0x1ff   :  { %4131 = vmatpush1.bf16.msra.mxu0 %v9720_v17  ;;  %6201 = vmatpush1.bf16.msra.mxu1 %v9723_v57  ;;  %v9773_v17 = vld [vmem:[#allocation2 + $0x1b4] ss:$24 sps:$4 sm:$0xff]   ;;  %v9771_v57 = vld [vmem:[#allocation2 + $0x1b0] ss:$24 sps:$4 sm:$0xff]  }
 0x200   :  { %4132 = vmatprep.subr.bf16.mxu0 %v9728_v10  ;;  %6202 = vmatprep.subr.bf16.mxu1 %v9731_v23  ;;  %v9780_v10 = vld [vmem:[#allocation2 + $0x240] ss:$24 sps:$4 sm:$0xff]   ;;  %v9785_v23 = vld [vmem:[#allocation2 + $0x274] ss:$24 sps:$4 sm:$0xff]  }
 0x203   :  { %4133 = vmatpush1.bf16.msra.mxu0 %v9726_v35  ;;  %6203 = vmatpush1.bf16.msra.mxu1 %v9729_v13  ;;  %v9794_v35 = vld [vmem:[#allocation2 + $0x304] ss:$24 sps:$4 sm:$0xff]   ;;  %v9792_v13 = vld [vmem:[#allocation2 + $0x300] ss:$24 sps:$4 sm:$0xff]  }
 0x204   :  { %4134 = vmatprep.subr.bf16.mxu0 %v9734_v14  ;;  %6204 = vmatprep.subr.bf16.mxu1 %v9737_v59  ;;  %v9798_v14 = vld [vmem:[#allocation2 + $0x360] ss:$24 sps:$4 sm:$0xff]   ;;  %v9803_v59 = vld [vmem:[#allocation2 + $0x394] ss:$24 sps:$4 sm:$0xff]  }
 0x207   :  { %4135 = vmatpush1.bf16.msra.mxu0 %v9732_v49  ;;  %6205 = vmatpush1.bf16.msra.mxu1 %v9735_v58  ;;  %v9807_v49 = vld [vmem:[#allocation2 + $0x3f0] ss:$24 sps:$4 sm:$0xff]   ;;  %v9812_v58 = vld [vmem:[#allocation2 + $0x424] ss:$24 sps:$4 sm:$0xff]  }
 0x208   :  { %4136 = vmatprep.subr.bf16.mxu0 %v9740_v1  ;;  %6206 = vmatprep.subr.bf16.mxu1 %v9743_v62  ;;  %v9813_v1 = vld [vmem:[#allocation2 + $0x450] ss:$24 sps:$4 sm:$0xff]   ;;  %v9818_v62 = vld [vmem:[#allocation2 + $0x484] ss:$24 sps:$4 sm:$0xff]  }
 0x20b   :  { %4137 = vmatpush1.bf16.msra.mxu0 %v9738_v38  ;;  %6207 = vmatpush1.bf16.msra.mxu1 %v9741_v25  ;;  %v9822_v38 = vld [vmem:[#allocation2 + $0x4e0] ss:$24 sps:$4 sm:$0xff]   ;;  %v9827_v25 = vld [vmem:[#allocation2 + $0x514] ss:$24 sps:$4 sm:$0xff]  }
 0x20c   :  { %5961 = vmatprep.subr.bf16.mxu0 %v9746_v33  ;;  %v9825_v33 = vld [vmem:[#allocation2 + $0x510] ss:$24 sps:$4 sm:$0xff]  }
 0x20e   :  { %6209 = vmatmul.mubr.bf16.vlgmr.msra.gmra.mrb[0].mxu1 %v11943_v37  ;;  %4139 = vmatmul.mubr.bf16.vlgmr.msra.gmra.mrb[4].mxu0 %v11430_v28  ;;  %v9759_v28 = vld [vmem:[#allocation2 + $0xf0] ss:$24 sps:$4 sm:$0xff]  }
 0x20f   :  { %5962 = vmatpush1.bf16.msra.mxu0 %v9744_v43  ;;  %5993 = vmatprep.mubr.bf16.mxu0 %v11434_v8  ;;  %v9833_v43 = vld [vmem:[#allocation2 + $0x574] ss:$24 sps:$4 sm:$0xff]  }
 0x210   :  { %5963 = vmatprep.subr.bf16.mxu0 %v9749_v29  ;;  %v9831_v29 = vld [vmem:[#allocation2 + $0x570] ss:$24 sps:$4 sm:$0xff]  }
 0x213   :  { %5964 = vmatpush1.bf16.msra.mxu0 %v9747_v31  ;;  %v9836_v31 = vld [vmem:[#allocation2 + $0x5a4] ss:$24 sps:$4 sm:$0xff]  }
 0x214   :  { %5965 = vmatprep.subr.bf16.mxu0 %v9752_v12  ;;  %v9834_v12 = vld [vmem:[#allocation2 + $0x5a0] ss:$24 sps:$4 sm:$0xff]  }
 0x217   :  { %5966 = vmatpush1.bf16.msra.mxu0 %v9750_v51  ;;  %v9839_v51 = vld [vmem:[#allocation2 + $0x5d4] ss:$24 sps:$4 sm:$0xff]  }
 0x218   :  { %5967 = vmatprep.subr.bf16.mxu0 %v9755_v32  ;;  %v9837_v32 = vld [vmem:[#allocation2 + $0x5d0] ss:$24 sps:$4 sm:$0xff]  }
 0x21b   :  { %5968 = vmatpush1.bf16.msra.mxu0 %v9753_v45  ;;  %v9842_v45 = vld [vmem:[#allocation2 + $0x604] ss:$24 sps:$4 sm:$0xff]  }
 0x21c   :  { %5969 = vmatprep.subr.bf16.mxu0 %v9758_v48  ;;  %v9840_v48 = vld [vmem:[#allocation2 + $0x600] ss:$24 sps:$4 sm:$0xff]  }
 0x21f   :  { %5970 = vmatpush1.bf16.msra.mxu0 %v9756_v46  ;;  %v9845_v46 = vld [vmem:[#allocation2 + $0x634] ss:$24 sps:$4 sm:$0xff]  }
 0x220   :  { %5971 = vmatprep.subr.bf16.mxu0 %v9761_v18  ;;  %v9843_v18 = vld [vmem:[#allocation2 + $0x630] ss:$24 sps:$4 sm:$0xff]  }
 0x223   :  { %5972 = vmatpush1.bf16.msra.mxu0 %v9759_v28  ;;  %v9848_v28 = vld [vmem:[#allocation2 + $0x664] ss:$24 sps:$4 sm:$0xff]  }
 0x224   :  { %5973 = vmatprep.subr.bf16.mxu0 %v9764_v52  ;;  %v9846_v52 = vld [vmem:[#allocation2 + $0x660] ss:$24 sps:$4 sm:$0xff]  }
 0x227   :  { %5974 = vmatpush1.bf16.msra.mxu0 %v9762_v11  ;;  %v9851_v11 = vld [vmem:[#allocation2 + $0x694] ss:$24 sps:$4 sm:$0xff]  }
 0x228   :  { %5975 = vmatprep.subr.bf16.mxu0 %v9767_v30  ;;  %v9849_v30 = vld [vmem:[#allocation2 + $0x690] ss:$24 sps:$4 sm:$0xff]  }
 0x22b   :  { %5976 = vmatpush1.bf16.msra.mxu0 %v9765_v63  ;;  %v9854_v63 = vld [vmem:[#allocation2 + $0x6c4] ss:$24 sps:$4 sm:$0xff]  }
 0x22c   :  { %5977 = vmatprep.subr.bf16.mxu0 %v9770_v53  ;;  %v9852_v53 = vld [vmem:[#allocation2 + $0x6c0] ss:$24 sps:$4 sm:$0xff]  }
 0x22f   :  { %5978 = vmatpush1.bf16.msra.mxu0 %v9768_v40  ;;  %v9857_v40 = vld [vmem:[#allocation2 + $0x6f4] ss:$24 sps:$4 sm:$0xff]  }
 0x230   :  { %5979 = vmatprep.subr.bf16.mxu0 %v9773_v17  ;;  %v9855_v17 = vld [vmem:[#allocation2 + $0x6f0] ss:$24 sps:$4 sm:$0xff]  }
 0x233   :  { %5980 = vmatpush1.bf16.msra.mxu0 %v9771_v57  ;;  %v9860_v57 = vld [vmem:[#allocation2 + $0x724] ss:$24 sps:$4 sm:$0xff]  }
 0x234   :  { %5981 = vmatprep.subr.bf16.mxu0 %v9776_v21  ;;  %v9858_v21 = vld [vmem:[#allocation2 + $0x720] ss:$24 sps:$4 sm:$0xff]  }
 0x237   :  { %5982 = vmatpush1.bf16.msra.mxu0 %v9774_v61  ;;  %v9863_v61 = vld [vmem:[#allocation2 + $0x754] ss:$24 sps:$4 sm:$0xff]  }
 0x238   :  { %5983 = vmatprep.subr.bf16.mxu0 %v9779_v60  ;;  %v9861_v60 = vld [vmem:[#allocation2 + $0x750] ss:$24 sps:$4 sm:$0xff]  }
 0x23b   :  { %5984 = vmatpush1.bf16.msra.mxu0 %v9777_v41  ;;  %v9866_v41 = vld [vmem:[#allocation2 + $0x784] ss:$24 sps:$4 sm:$0xff]  }
 0x23c   :  { %5985 = vmatprep.subr.bf16.mxu0 %v9782_v56  ;;  %v9864_v56 = vld [vmem:[#allocation2 + $0x780] ss:$24 sps:$4 sm:$0xff]  }
 0x23f   :  { %5986 = vmatpush1.bf16.msra.mxu0 %v9780_v10  ;;  %v9869_v10 = vld [vmem:[#allocation2 + $0x7b4] ss:$24 sps:$4 sm:$0xff]  }
 0x240   :  { %5987 = vmatprep.subr.bf16.mxu0 %v9785_v23  ;;  %v9867_v23 = vld [vmem:[#allocation2 + $0x7b0] ss:$24 sps:$4 sm:$0xff]  }
 0x243   :  { %5988 = vmatpush1.bf16.msra.mxu0 %v9783_v24  ;;  %v9872_v24 = vld [vmem:[#allocation2 + $0x7e4] ss:$24 sps:$4 sm:$0xff]  }
 0x244   :  { %5989 = vmatprep.subr.bf16.mxu0 %v9788_v5  ;;  %v9870_v5 = vld [vmem:[#allocation2 + $0x7e0] ss:$24 sps:$4 sm:$0xff]  }
 0x247   :  { %5990 = vmatpush1.bf16.msra.mxu0 %v9786_v19  ;;  %v9875_v19 = vld [vmem:[#allocation2 + $0x814] ss:$24 sps:$4 sm:$0xff]  }
 0x248   :  { %5991 = vmatprep.subr.bf16.mxu0 %v9791_v7  ;;  %v9873_v7 = vld [vmem:[#allocation2 + $0x810] ss:$24 sps:$4 sm:$0xff]  }
 0x24b   :  { %5992 = vmatpush1.bf16.msra.mxu0 %v9789_v54  ;;  %v9878_v54 = vld [vmem:[#allocation2 + $0x844] ss:$24 sps:$4 sm:$0xff]  }
 0x24c   :  { %6004 = vmatprep.subr.bf16.mxu0 %v9794_v35  ;;  %v9876_v35 = vld [vmem:[#allocation2 + $0x840] ss:$24 sps:$4 sm:$0xff]  }
 0x24e   :  { %5994 = vmatmul.mubr.bf16.vlgmr.msra.gmra.mrb[0].mxu0 %v11588_v36 }
 0x24f   :  { %6005 = vmatpush1.bf16.msra.mxu0 %v9792_v13  ;;  %6036 = vmatprep.mubr.bf16.mxu0 %v12035_v44  ;;  %v9881_v13 = vld [vmem:[#allocation2 + $0x874] ss:$24 sps:$4 sm:$0xff]  }
 0x250   :  { %6006 = vmatprep.subr.bf16.mxu0 %v9797_v42  ;;  %v9879_v42 = vld [vmem:[#allocation2 + $0x870] ss:$24 sps:$4 sm:$0xff]  }
 0x253   :  { %6007 = vmatpush1.bf16.msra.mxu0 %v9795_v26  ;;  %v9884_v26 = vld [vmem:[#allocation2 + $0x8a4] ss:$24 sps:$4 sm:$0xff]  }
 0x254   :  { %6008 = vmatprep.subr.bf16.mxu0 %v9800_v34  ;;  %v9882_v34 = vld [vmem:[#allocation2 + $0x8a0] ss:$24 sps:$4 sm:$0xff]  }
 0x257   :  { %6009 = vmatpush1.bf16.msra.mxu0 %v9798_v14  ;;  %v9887_v14 = vld [vmem:[#allocation2 + $0x8d4] ss:$24 sps:$4 sm:$0xff]  }
 0x258   :  { %6010 = vmatprep.subr.bf16.mxu0 %v9803_v59  ;;  %v9885_v59 = vld [vmem:[#allocation2 + $0x8d0] ss:$24 sps:$4 sm:$0xff]  }
 0x25b   :  { %6011 = vmatpush1.bf16.msra.mxu0 %v9801_v27  ;;  %v9890_v27 = vld [vmem:[#allocation2 + $0x14] ss:$24 sps:$4 sm:$0xff]  }
 0x25c   :  { %6012 = vmatprep.subr.bf16.mxu0 %v9806_v20  ;;  %v9888_v20 = vld [vmem:[#allocation2 + $0x10] ss:$24 sps:$4 sm:$0xff]  }
 0x25f   :  { %6013 = vmatpush1.bf16.msra.mxu0 %v9804_v50  ;;  %v9893_v50 = vld [vmem:[#allocation2 + $0x44] ss:$24 sps:$4 sm:$0xff]  }
 0x260   :  { %6014 = vmatprep.subr.bf16.mxu0 %v9809_v55  ;;  %v9891_v55 = vld [vmem:[#allocation2 + $0x40] ss:$24 sps:$4 sm:$0xff]  }
 0x263   :  { %6015 = vmatpush1.bf16.msra.mxu0 %v9807_v49  ;;  %v9896_v49 = vld [vmem:[#allocation2 + $0x74] ss:$24 sps:$4 sm:$0xff]  }
 0x264   :  { %6016 = vmatprep.subr.bf16.mxu0 %v9812_v58  ;;  %v9894_v58 = vld [vmem:[#allocation2 + $0x70] ss:$24 sps:$4 sm:$0xff]  }
 0x267   :  { %6017 = vmatpush1.bf16.msra.mxu0 %v9810_v16  ;;  %v9899_v16 = vld [vmem:[#allocation2 + $0xa4] ss:$24 sps:$4 sm:$0xff]  }
 0x268   :  { %6018 = vmatprep.subr.bf16.mxu0 %v9815_v3  ;;  %v9897_v3 = vld [vmem:[#allocation2 + $0xa0] ss:$24 sps:$4 sm:$0xff]  }
 0x26b   :  { %6019 = vmatpush1.bf16.msra.mxu0 %v9813_v1  ;;  %v9902_v1 = vld [vmem:[#allocation2 + $0xd4] ss:$24 sps:$4 sm:$0xff]  }
 0x26c   :  { %6020 = vmatprep.subr.bf16.mxu0 %v9818_v62  ;;  %v9900_v62 = vld [vmem:[#allocation2 + $0xd0] ss:$24 sps:$4 sm:$0xff]  }
 0x26f   :  { %6021 = vmatpush1.bf16.msra.mxu0 %v9816_v2  ;;  %v11954_v2 = vld [vmem:[#allocation6] sm:$0x3f] }
 0x270   :  { %6022 = vmatprep.subr.bf16.mxu0 %v9821_v4  ;;  %v9905_v4 = vld [vmem:[#allocation2 + $0x104] ss:$24 sps:$4 sm:$0xff]  }
 0x273   :  { %6023 = vmatpush1.bf16.msra.mxu0 %v9819_v6  ;;  %v12036_v6 = vld [vmem:[#allocation20_spill] sm:$0xff] }
 0x274   :  { %6024 = vmatprep.subr.bf16.mxu0 %v9824_v9  ;;  %v6361_v9 = vrot.slane %v11954_v2, %v12036_v6 }
 0x277   :  { %6025 = vmatpush1.bf16.msra.mxu0 %v9822_v38 }
 0x278   :  { %6026 = vmatprep.subr.bf16.mxu0 %v9827_v25  ;;  %v9903_v25 = vld [vmem:[#allocation2 + $0x100] ss:$24 sps:$4 sm:$0xff]  }
 0x27b   :  { %6027 = vmatpush1.bf16.msra.mxu0 %v9825_v33  ;;  %v9908_v33 = vld [vmem:[#allocation2 + $0x134] ss:$24 sps:$4 sm:$0xff]  }
 0x27c   :  { %6028 = vmatprep.subr.bf16.mxu0 %v9830_v0 }
 0x27f   :  { %6029 = vmatpush1.bf16.msra.mxu0 %v9828_v39 }
 0x280   :  { %6030 = vmatprep.subr.bf16.mxu0 %v9833_v43 }
 0x283   :  { %6031 = vmatpush1.bf16.msra.mxu0 %v9831_v29 }
 0x284   :  { %6032 = vmatprep.subr.bf16.mxu0 %v9836_v31 }
 0x287   :  { %6033 = vmatpush1.bf16.msra.mxu0 %v9834_v12  ;;  %v9906_v12 = vld [vmem:[#allocation2 + $0x130] ss:$24 sps:$4 sm:$0xff]  }
 0x288   :  { %6034 = vmatprep.subr.bf16.mxu0 %v9839_v51 }
 0x28b   :  { %6035 = vmatpush1.bf16.msra.mxu0 %v9837_v32 }
 0x28c   :  { %6047 = vmatprep.subr.bf16.mxu0 %v9842_v45  ;;  %v9911_v45 = vld [vmem:[#allocation2 + $0x164] ss:$24 sps:$4 sm:$0xff]  }
 0x28e   :  { %6037 = vmatmul.mubr.bf16.vlgmr.msra.gmra.mrb[0].mxu0 %v11887_v22 }
 0x28f   :  { %6048 = vmatpush1.bf16.msra.mxu0 %v9840_v48  ;;  %6079 = vmatprep.mubr.bf16.mxu0 %v11891_v15 }
 0x290   :  { %6049 = vmatprep.subr.bf16.mxu0 %v9845_v46  ;;  %v9909_v46 = vld [vmem:[#allocation2 + $0x160] ss:$24 sps:$4 sm:$0xff]  }
 0x293   :  { %6050 = vmatpush1.bf16.msra.mxu0 %v9843_v18  ;;  %v9914_v18 = vld [vmem:[#allocation2 + $0x194] ss:$24 sps:$4 sm:$0xff]  }
 0x294   :  { %6051 = vmatprep.subr.bf16.mxu0 %v9848_v28  ;;  %v9912_v28 = vld [vmem:[#allocation2 + $0x190] ss:$24 sps:$4 sm:$0xff]  }
 0x297   :  { %6052 = vmatpush1.bf16.msra.mxu0 %v9846_v52  ;;  %v9917_v52 = vld [vmem:[#allocation2 + $0x1c4] ss:$24 sps:$4 sm:$0xff]  }
 0x298   :  { %6053 = vmatprep.subr.bf16.mxu0 %v9851_v11 }
 0x29b   :  { %6054 = vmatpush1.bf16.msra.mxu0 %v9849_v30 }
 0x29c   :  { %6055 = vmatprep.subr.bf16.mxu0 %v9854_v63  ;;  %v9915_v63 = vld [vmem:[#allocation2 + $0x1c0] ss:$24 sps:$4 sm:$0xff]  }
 0x29f   :  { %6056 = vmatpush1.bf16.msra.mxu0 %v9852_v53 }
 0x2a0   :  { %6057 = vmatprep.subr.bf16.mxu0 %v9857_v40  ;;  %v9920_v40 = vld [vmem:[#allocation2 + $0x1f4] ss:$24 sps:$4 sm:$0xff]  }
 0x2a3   :  { %6058 = vmatpush1.bf16.msra.mxu0 %v9855_v17 }
 0x2a4   :  { %6059 = vmatprep.subr.bf16.mxu0 %v9860_v57 }
 0x2a7   :  { %6060 = vmatpush1.bf16.msra.mxu0 %v9858_v21  ;;  %v10016_v21 = vld [vmem:[#allocation7 + $0x4] ss:$16 sps:$4 sm:$0xff]  }
 0x2a8   :  { %6061 = vmatprep.subr.bf16.mxu0 %v9863_v61  ;;  %7584 = vmatprep.subr.bf16.mxu1 %v10016_v21  ;;  %v10076_v21 = vld [vmem:[#allocation7 + $0x1c4] ss:$16 sps:$4 sm:$0xff]  }
 0x2ab   :  { %6062 = vmatpush1.bf16.msra.mxu0 %v9861_v60  ;;  %v9918_v60 = vld [vmem:[#allocation2 + $0x1f0] ss:$24 sps:$4 sm:$0xff]  }
 0x2ac   :  { %6063 = vmatprep.subr.bf16.mxu0 %v9866_v41  ;;  %v10014_v41 = vld [vmem:[#allocation7] ss:$16 sps:$4 sm:$0xff]  }
 0x2ad   :  { %7585 = vmatpush1.bf16.msra.mxu1 %v10014_v41  ;;  %v10074_v41 = vld [vmem:[#allocation7 + $0x1c0] ss:$16 sps:$4 sm:$0xff]  }
 0x2af   :  { %6064 = vmatpush1.bf16.msra.mxu0 %v9864_v56  ;;  %v9923_v56 = vld [vmem:[#allocation2 + $0x224] ss:$24 sps:$4 sm:$0xff]  }
 0x2b0   :  { %6065 = vmatprep.subr.bf16.mxu0 %v9869_v10  ;;  %v10022_v10 = vld [vmem:[#allocation7 + $0x24] ss:$16 sps:$4 sm:$0xff]  }
 0x2b1   :  { %7586 = vmatprep.subr.bf16.mxu1 %v10022_v10  ;;  %v9960_v10 = vld [vmem:[#allocation2 + $0x490] ss:$24 sps:$4 sm:$0xff]  }
 0x2b3   :  { %6066 = vmatpush1.bf16.msra.mxu0 %v9867_v23  ;;  %v9921_v23 = vld [vmem:[#allocation2 + $0x220] ss:$24 sps:$4 sm:$0xff]  }
 0x2b4   :  { %6067 = vmatprep.subr.bf16.mxu0 %v9872_v24  ;;  %v10020_v24 = vld [vmem:[#allocation7 + $0x20] ss:$16 sps:$4 sm:$0xff]  }
 0x2b5   :  { %7587 = vmatpush1.bf16.msra.mxu1 %v10020_v24  ;;  %v10077_v24 = vld [vmem:[#allocation7 + $0x1e0] ss:$16 sps:$4 sm:$0xff]  }
 0x2b7   :  { %6068 = vmatpush1.bf16.msra.mxu0 %v9870_v5  ;;  %v9926_v5 = vld [vmem:[#allocation2 + $0x254] ss:$24 sps:$4 sm:$0xff]  }
 0x2b8   :  { %6069 = vmatprep.subr.bf16.mxu0 %v9875_v19  ;;  %v10028_v19 = vld [vmem:[#allocation7 + $0x44] ss:$16 sps:$4 sm:$0xff]  }
 0x2b9   :  { %7588 = vmatprep.subr.bf16.mxu1 %v10028_v19  ;;  %v9968_v19 = vld [vmem:[#allocation2 + $0x4f4] ss:$24 sps:$4 sm:$0xff]  }
 0x2bb   :  { %6070 = vmatpush1.bf16.msra.mxu0 %v9873_v7  ;;  %v9924_v7 = vld [vmem:[#allocation2 + $0x250] ss:$24 sps:$4 sm:$0xff]  }
 0x2bc   :  { %6071 = vmatprep.subr.bf16.mxu0 %v9878_v54  ;;  %v10026_v54 = vld [vmem:[#allocation7 + $0x40] ss:$16 sps:$4 sm:$0xff]  }
 0x2bd   :  { %7589 = vmatpush1.bf16.msra.mxu1 %v10026_v54  ;;  %v9966_v54 = vld [vmem:[#allocation2 + $0x4f0] ss:$24 sps:$4 sm:$0xff]  }
 0x2bf   :  { %6072 = vmatpush1.bf16.msra.mxu0 %v9876_v35  ;;  %v9929_v35 = vld [vmem:[#allocation2 + $0x284] ss:$24 sps:$4 sm:$0xff]  }
 0x2c0   :  { %6073 = vmatprep.subr.bf16.mxu0 %v9881_v13  ;;  %v10034_v13 = vld [vmem:[#allocation7 + $0x64] ss:$16 sps:$4 sm:$0xff]  }
 0x2c1   :  { %7590 = vmatprep.subr.bf16.mxu1 %v10034_v13  ;;  %v9969_v13 = vld [vmem:[#allocation2 + $0x520] ss:$24 sps:$4 sm:$0xff]  }
 0x2c3   :  { %6074 = vmatpush1.bf16.msra.mxu0 %v9879_v42  ;;  %v9927_v42 = vld [vmem:[#allocation2 + $0x280] ss:$24 sps:$4 sm:$0xff]  }
 0x2c4   :  { %6075 = vmatprep.subr.bf16.mxu0 %v9884_v26  ;;  %v10032_v26 = vld [vmem:[#allocation7 + $0x60] ss:$16 sps:$4 sm:$0xff]  }
 0x2c5   :  { %7591 = vmatpush1.bf16.msra.mxu1 %v10032_v26  ;;  %v9972_v26 = vld [vmem:[#allocation2 + $0x550] ss:$24 sps:$4 sm:$0xff]  }
 0x2c7   :  { %6076 = vmatpush1.bf16.msra.mxu0 %v9882_v34  ;;  %v9932_v34 = vld [vmem:[#allocation2 + $0x2b4] ss:$24 sps:$4 sm:$0xff]  }
 0x2c8   :  { %6077 = vmatprep.subr.bf16.mxu0 %v9887_v14  ;;  %v10040_v14 = vld [vmem:[#allocation7 + $0x84] ss:$16 sps:$4 sm:$0xff]  }
 0x2c9   :  { %7592 = vmatprep.subr.bf16.mxu1 %v10040_v14  ;;  %v9975_v14 = vld [vmem:[#allocation2 + $0x580] ss:$24 sps:$4 sm:$0xff]  }
 0x2cb   :  { %6078 = vmatpush1.bf16.msra.mxu0 %v9885_v59  ;;  %v9930_v59 = vld [vmem:[#allocation2 + $0x2b0] ss:$24 sps:$4 sm:$0xff]  }
 0x2cc   :  { %6219 = vmatprep.subr.bf16.mxu0 %v9890_v27  ;;  %v10038_v27 = vld [vmem:[#allocation7 + $0x80] ss:$16 sps:$4 sm:$0xff]  }
 0x2cd   :  { %7593 = vmatpush1.bf16.msra.mxu1 %v10038_v27  ;;  %v9978_v27 = vld [vmem:[#allocation2 + $0x5b0] ss:$24 sps:$4 sm:$0xff]  }
 0x2ce   :  { %6080 = vmatmul.mubr.bf16.vlgmr.msra.gmra.mrb[0].mxu0 %v11943_v37 }
 0x2cf   :  { %6220 = vmatpush1.bf16.msra.mxu0 %v9888_v20  ;;  %6251 = vmatprep.mubr.bf16.mxu0 %v11434_v8  ;;  %v12037_v8 = vld [vmem:[#allocation17_spill] sm:$0xff]  ;;  %v9935_v20 = vld [vmem:[#allocation2 + $0x2e4] ss:$24 sps:$4 sm:$0xff]  }
 0x2d0   :  { %6221 = vmatprep.subr.bf16.mxu0 %v9893_v50  ;;  %v6365_v38 = vrot.slane %v11954_v2, %v12037_v8  ;;  %v10046_v50 = vld [vmem:[#allocation7 + $0xa4] ss:$16 sps:$4 sm:$0xff]  }
 0x2d1   :  { %7594 = vmatprep.subr.bf16.mxu1 %v10046_v50  ;;  %v9981_v50 = vld [vmem:[#allocation2 + $0x5e0] ss:$24 sps:$4 sm:$0xff]  }
 0x2d3   :  { %6222 = vmatpush1.bf16.msra.mxu0 %v9891_v55  ;;  %v9933_v55 = vld [vmem:[#allocation2 + $0x2e0] ss:$24 sps:$4 sm:$0xff]  }
 0x2d4   :  { %6223 = vmatprep.subr.bf16.mxu0 %v9896_v49  ;;  %v10044_v49 = vld [vmem:[#allocation7 + $0xa0] ss:$16 sps:$4 sm:$0xff]  }
 0x2d5   :  { %7595 = vmatpush1.bf16.msra.mxu1 %v10044_v49  ;;  %v9984_v49 = vld [vmem:[#allocation2 + $0x610] ss:$24 sps:$4 sm:$0xff]  }
 0x2d7   :  { %6224 = vmatpush1.bf16.msra.mxu0 %v9894_v58  ;;  %v9938_v58 = vld [vmem:[#allocation2 + $0x314] ss:$24 sps:$4 sm:$0xff]  }
 0x2d8   :  { %6225 = vmatprep.subr.bf16.mxu0 %v9899_v16  ;;  %v10052_v16 = vld [vmem:[#allocation7 + $0xc4] ss:$16 sps:$4 sm:$0xff]  }
 0x2d9   :  { %7596 = vmatprep.subr.bf16.mxu1 %v10052_v16  ;;  %v9987_v16 = vld [vmem:[#allocation2 + $0x640] ss:$24 sps:$4 sm:$0xff]  }
 0x2db   :  { %6226 = vmatpush1.bf16.msra.mxu0 %v9897_v3  ;;  %v9936_v3 = vld [vmem:[#allocation2 + $0x310] ss:$24 sps:$4 sm:$0xff]  }
 0x2dc   :  { %6227 = vmatprep.subr.bf16.mxu0 %v9902_v1  ;;  %v10050_v1 = vld [vmem:[#allocation7 + $0xc0] ss:$16 sps:$4 sm:$0xff]  }
 0x2dd   :  { %7597 = vmatpush1.bf16.msra.mxu1 %v10050_v1  ;;  %v9990_v1 = vld [vmem:[#allocation2 + $0x670] ss:$24 sps:$4 sm:$0xff]  }
 0x2df   :  { %6228 = vmatpush1.bf16.msra.mxu0 %v9900_v62  ;;  %v9941_v62 = vld [vmem:[#allocation2 + $0x344] ss:$24 sps:$4 sm:$0xff]  }
 0x2e0   :  { %6229 = vmatprep.subr.bf16.mxu0 %v9905_v4  ;;  %v10053_v4 = vld [vmem:[#allocation7 + $0xe0] ss:$16 sps:$4 sm:$0xff]  }
 0x2e1   :  { %v6210_v0 = vpop.f32.mrb[0].mxu1 }
 0x2e2   :  { %v6382_v39 = vadd.f32 %v6361_v9, %v6210_v0  ;;  %v6212_v43 = vpop.f32.mrb[1].mxu1  ;;  %v10056_v0 = vld [vmem:[#allocation7 + $0x100] ss:$16 sps:$4 sm:$0xff]  }
 0x2e3   :  { %v6383_v29 = vadd.f32 %v6365_v38, %v6212_v43  ;;  %v6214_v31 = vpop.f32.mrb[2].mxu1  ;;  %6230 = vmatpush1.bf16.msra.mxu0 %v9903_v25  ;;  %v10058_v25 = vld [vmem:[#allocation7 + $0x104] ss:$16 sps:$4 sm:$0xff]  }
 0x2e4   :  { %10352 = vtanh.f32 %v6382_v39  ;;  %v6388_v51 = vadd.f32 %v6361_v9, %v6214_v31  ;;  %v6216_v32 = vpop.f32.mrb[3].mxu1  ;;  %6231 = vmatprep.subr.bf16.mxu0 %v9908_v33  ;;  %v10055_v9 = vld [vmem:[#allocation7 + $0xe4] ss:$16 sps:$4 sm:$0xff]  }
 0x2e5   :  { %10354 = vtanh.f32 %v6383_v29  ;;  %v6389_v48 = vadd.f32 %v6365_v38, %v6216_v32  ;;  %v9939_v38 = vld [vmem:[#allocation2 + $0x340] ss:$24 sps:$4 sm:$0xff]   ;;  %v9944_v33 = vld [vmem:[#allocation2 + $0x374] ss:$24 sps:$4 sm:$0xff]   ;;  %7598 = vmatprep.subr.bf16.mxu1 %v10055_v9  ;;  %v9942_v43 = vld [vmem:[#allocation2 + $0x370] ss:$24 sps:$4 sm:$0xff]  }
 0x2e6   :  { %10356 = vtanh.f32 %v6388_v51  ;;  %7599 = vmatpush1.bf16.msra.mxu1 %v10053_v4  ;;  %v10061_v39 = vld [vmem:[#allocation7 + $0x124] ss:$16 sps:$4 sm:$0xff]   ;;  %v10062_v51 = vld [vmem:[#allocation7 + $0x140] ss:$16 sps:$4 sm:$0xff]  }
 0x2e7   :  { %10358 = vtanh.f32 %v6389_v48  ;;  %6232 = vmatpush1.bf16.msra.mxu0 %v9906_v12  ;;  %7600 = vmatprep.subr.bf16.mxu1 %v10058_v25  ;;  %v9947_v29 = vld [vmem:[#allocation2 + $0x3a4] ss:$24 sps:$4 sm:$0xff]   ;;  %v9945_v12 = vld [vmem:[#allocation2 + $0x3a0] ss:$24 sps:$4 sm:$0xff]   ;;  %v9998_v9 = vld [vmem:[#allocation2 + $0x6d4] ss:$24 sps:$4 sm:$0xff]  }
 0x2e8   :  { %6233 = vmatprep.subr.bf16.mxu0 %v9911_v45  ;;  %v10064_v31 = vld [vmem:[#allocation7 + $0x144] ss:$16 sps:$4 sm:$0xff]  }
 0x2e9   :  { %v10067_v32 = vld [vmem:[#allocation7 + $0x164] ss:$16 sps:$4 sm:$0xff]  }
 0x2ea   :  { %7601 = vmatpush1.bf16.msra.mxu1 %v10056_v0  ;;  %v9948_v45 = vld [vmem:[#allocation2 + $0x3d0] ss:$24 sps:$4 sm:$0xff]   ;;  %v9953_v48 = vld [vmem:[#allocation2 + $0x404] ss:$24 sps:$4 sm:$0xff]   ;;  %v9993_v4 = vld [vmem:[#allocation2 + $0x6a0] ss:$24 sps:$4 sm:$0xff]  }
 0x2eb   :  { %6234 = vmatpush1.bf16.msra.mxu0 %v9909_v46  ;;  %7602 = vmatprep.subr.bf16.mxu1 %v10061_v39  ;;  %v10065_v46 = vld [vmem:[#allocation7 + $0x160] ss:$16 sps:$4 sm:$0xff]  }
 0x2ec   :  { %6235 = vmatprep.subr.bf16.mxu0 %v9914_v18  ;;  %v9951_v18 = vld [vmem:[#allocation2 + $0x400] ss:$24 sps:$4 sm:$0xff]   ;;  %v10001_v25 = vld [vmem:[#allocation2 + $0x704] ss:$24 sps:$4 sm:$0xff]  }
 0x2ed   :  { %v10007_v0 = vld [vmem:[#allocation2 + $0x764] ss:$24 sps:$4 sm:$0xff]   ;;  %v10005_v39 = vld [vmem:[#allocation2 + $0x760] ss:$24 sps:$4 sm:$0xff]  }
 0x2ee   :  { %v10353_v11 = vpop.eup %10352 }
 0x2ef   :  { %v10355_v30 = vpop.eup %10354  ;;  %6236 = vmatpush1.bf16.msra.mxu0 %v9912_v28  ;;  %v9956_v28 = vld [vmem:[#allocation2 + $0x434] ss:$24 sps:$4 sm:$0xff]  }
 0x2f0   :  { %v10357_v53 = vpop.eup %10356  ;;  %6237 = vmatprep.subr.bf16.mxu0 %v9917_v52  ;;  %v10070_v52 = vld [vmem:[#allocation7 + $0x184] ss:$16 sps:$4 sm:$0xff]  }
 0x2f1   :  { %v10359_v17 = vpop.eup %10358  ;;  %v11960_v57 = vpack.c.bf16 %v10357_v53, %v10353_v11  ;;  %v9954_v11 = vld [vmem:[#allocation2 + $0x430] ss:$24 sps:$4 sm:$0xff]  }
 0x2f2   :  { %v11962_v61 = vpack.c.bf16 %v10359_v17, %v10355_v30  ;;  %v10068_v30 = vld [vmem:[#allocation7 + $0x180] ss:$16 sps:$4 sm:$0xff]   ;;  %v10073_v53 = vld [vmem:[#allocation7 + $0x1a4] ss:$16 sps:$4 sm:$0xff]  }
 0x2f3   :  { %6238 = vmatpush1.bf16.msra.mxu0 %v9915_v63  ;;  %v9959_v63 = vld [vmem:[#allocation2 + $0x464] ss:$24 sps:$4 sm:$0xff]  }
 0x2f4   :  { %6239 = vmatprep.subr.bf16.mxu0 %v9920_v40  ;;  %v9957_v40 = vld [vmem:[#allocation2 + $0x460] ss:$24 sps:$4 sm:$0xff]  }
 0x2f5   :  { %v10071_v17 = vld [vmem:[#allocation7 + $0x1a0] ss:$16 sps:$4 sm:$0xff]  }
 0x2f7   :  { %6240 = vmatpush1.bf16.msra.mxu0 %v9918_v60  ;;  %v9962_v60 = vld [vmem:[#allocation2 + $0x494] ss:$24 sps:$4 sm:$0xff]  }
 0x2f8   :  { %6241 = vmatprep.subr.bf16.mxu0 %v9923_v56  ;;  %v10079_v56 = vld [vmem:[#allocation7 + $0x1e4] ss:$16 sps:$4 sm:$0xff]  }
 0x2fb   :  { %6242 = vmatpush1.bf16.msra.mxu0 %v9921_v23  ;;  %v9965_v23 = vld [vmem:[#allocation2 + $0x4c4] ss:$24 sps:$4 sm:$0xff]  }
 0x2fc   :  { %6243 = vmatprep.subr.bf16.mxu0 %v9926_v5  ;;  %v9963_v5 = vld [vmem:[#allocation2 + $0x4c0] ss:$24 sps:$4 sm:$0xff]  }
 0x2ff   :  { %6244 = vmatpush1.bf16.msra.mxu0 %v9924_v7  ;;  %v10082_v7 = vld [vmem:[#allocation7 + $0x204] ss:$16 sps:$4 sm:$0xff]  }
 0x300   :  { %6245 = vmatprep.subr.bf16.mxu0 %v9929_v35  ;;  %v9971_v35 = vld [vmem:[#allocation2 + $0x524] ss:$24 sps:$4 sm:$0xff]  }
 0x303   :  { %6246 = vmatpush1.bf16.msra.mxu0 %v9927_v42  ;;  %v9974_v42 = vld [vmem:[#allocation2 + $0x554] ss:$24 sps:$4 sm:$0xff]  }
 0x304   :  { %6247 = vmatprep.subr.bf16.mxu0 %v9932_v34  ;;  %v9977_v34 = vld [vmem:[#allocation2 + $0x584] ss:$24 sps:$4 sm:$0xff]  }
 0x307   :  { %6248 = vmatpush1.bf16.msra.mxu0 %v9930_v59  ;;  %v9980_v59 = vld [vmem:[#allocation2 + $0x5b4] ss:$24 sps:$4 sm:$0xff]  }
 0x308   :  { %6249 = vmatprep.subr.bf16.mxu0 %v9935_v20  ;;  %v9983_v20 = vld [vmem:[#allocation2 + $0x5e4] ss:$24 sps:$4 sm:$0xff]  }
 0x30b   :  { %6250 = vmatpush1.bf16.msra.mxu0 %v9933_v55  ;;  %v9986_v55 = vld [vmem:[#allocation2 + $0x614] ss:$24 sps:$4 sm:$0xff]  }
 0x30c   :  { %6262 = vmatprep.subr.bf16.mxu0 %v9938_v58  ;;  %v9989_v58 = vld [vmem:[#allocation2 + $0x644] ss:$24 sps:$4 sm:$0xff]  }
 0x30e   :  { %6252 = vmatmul.mubr.bf16.vlgmr.msra.gmra.mrb[4].mxu0 %v11588_v36  ;;  %v10059_v36 = vld [vmem:[#allocation7 + $0x120] ss:$16 sps:$4 sm:$0xff]  }
 0x30f   :  { %6263 = vmatpush1.bf16.msra.mxu0 %v9936_v3  ;;  %6294 = vmatprep.mubr.bf16.mxu0 %v12035_v44  ;;  %v9950_v44 = vld [vmem:[#allocation2 + $0x3d4] ss:$24 sps:$4 sm:$0xff]  }
 0x310   :  { %6264 = vmatprep.subr.bf16.mxu0 %v9941_v62  ;;  %7603 = vmatpush1.bf16.msra.mxu1 %v10059_v36  ;;  %v9992_v3 = vld [vmem:[#allocation2 + $0x674] ss:$24 sps:$4 sm:$0xff]   ;;  %v9995_v62 = vld [vmem:[#allocation2 + $0x6a4] ss:$24 sps:$4 sm:$0xff]  }
 0x311   :  { %7604 = vmatprep.subr.bf16.mxu1 %v10064_v31  ;;  %v10013_v36 = vld [vmem:[#allocation2 + $0x7c4] ss:$24 sps:$4 sm:$0xff]   ;;  %v10011_v31 = vld [vmem:[#allocation2 + $0x7c0] ss:$24 sps:$4 sm:$0xff]  }
 0x313   :  { %6265 = vmatpush1.bf16.msra.mxu0 %v9939_v38  ;;  %v9996_v38 = vld [vmem:[#allocation2 + $0x6d0] ss:$24 sps:$4 sm:$0xff]  }
 0x314   :  { %6266 = vmatprep.subr.bf16.mxu0 %v9944_v33  ;;  %7605 = vmatpush1.bf16.msra.mxu1 %v10062_v51  ;;  %v10004_v33 = vld [vmem:[#allocation2 + $0x734] ss:$24 sps:$4 sm:$0xff]   ;;  %v10025_v51 = vld [vmem:[#allocation2 + $0x824] ss:$24 sps:$4 sm:$0xff]  }
 0x315   :  { %7606 = vmatprep.subr.bf16.mxu1 %v10067_v32  ;;  %v10023_v32 = vld [vmem:[#allocation2 + $0x820] ss:$24 sps:$4 sm:$0xff]  }
 0x317   :  { %6267 = vmatpush1.bf16.msra.mxu0 %v9942_v43  ;;  %v10010_v43 = vld [vmem:[#allocation2 + $0x794] ss:$24 sps:$4 sm:$0xff]  }
 0x318   :  { %6268 = vmatprep.subr.bf16.mxu0 %v9947_v29  ;;  %7607 = vmatpush1.bf16.msra.mxu1 %v10065_v46  ;;  %v10008_v29 = vld [vmem:[#allocation2 + $0x790] ss:$24 sps:$4 sm:$0xff]   ;;  %v10037_v46 = vld [vmem:[#allocation2 + $0x884] ss:$24 sps:$4 sm:$0xff]  }
 0x319   :  { %7608 = vmatprep.subr.bf16.mxu1 %v10070_v52  ;;  %v10041_v52 = vld [vmem:[#allocation2 + $0x8b0] ss:$24 sps:$4 sm:$0xff]  }
 0x31b   :  { %6269 = vmatpush1.bf16.msra.mxu0 %v9945_v12  ;;  %v10019_v12 = vld [vmem:[#allocation2 + $0x7f4] ss:$24 sps:$4 sm:$0xff]  }
 0x31c   :  { %6270 = vmatprep.subr.bf16.mxu0 %v9950_v44  ;;  %7609 = vmatpush1.bf16.msra.mxu1 %v10068_v30  ;;  %v10017_v44 = vld [vmem:[#allocation2 + $0x7f0] ss:$24 sps:$4 sm:$0xff]   ;;  %v10047_v30 = vld [vmem:[#allocation2 + $0x8e0] ss:$24 sps:$4 sm:$0xff]  }
 0x31d   :  { %7610 = vmatprep.subr.bf16.mxu1 %v10073_v53  ;;  %v12038_v53 = vld [vmem:[#allocation18_spill] sm:$0xff] }
 0x31f   :  { %6271 = vmatpush1.bf16.msra.mxu0 %v9948_v45  ;;  %v10031_v45 = vld [vmem:[#allocation2 + $0x854] ss:$24 sps:$4 sm:$0xff]  }
 0x320   :  { %6272 = vmatprep.subr.bf16.mxu0 %v9953_v48  ;;  %7611 = vmatpush1.bf16.msra.mxu1 %v10071_v17  ;;  %v10029_v48 = vld [vmem:[#allocation2 + $0x850] ss:$24 sps:$4 sm:$0xff]  }
 0x321   :  { %7612 = vmatprep.subr.bf16.mxu1 %v10076_v21 }
 0x323   :  { %6273 = vmatpush1.bf16.msra.mxu0 %v9951_v18  ;;  %v10035_v18 = vld [vmem:[#allocation2 + $0x880] ss:$24 sps:$4 sm:$0xff]  }
 0x324   :  { %6274 = vmatprep.subr.bf16.mxu0 %v9956_v28  ;;  %7613 = vmatpush1.bf16.msra.mxu1 %v10074_v41  ;;  %v10043_v28 = vld [vmem:[#allocation2 + $0x8b4] ss:$24 sps:$4 sm:$0xff]  }
 0x325   :  { %7614 = vmatprep.subr.bf16.mxu1 %v10079_v56 }
 0x327   :  { %6275 = vmatpush1.bf16.msra.mxu0 %v9954_v11  ;;  %v10049_v11 = vld [vmem:[#allocation2 + $0x8e4] ss:$24 sps:$4 sm:$0xff]  }
 0x328   :  { %6276 = vmatprep.subr.bf16.mxu0 %v9959_v63  ;;  %7615 = vmatpush1.bf16.msra.mxu1 %v10077_v24  ;;  %v6353_v63 = vrot.slane %v11954_v2, %v11441_v47 }
 0x329   :  { %7627 = vmatprep.subr.bf16.mxu1 %v10082_v7 }
 0x32b   :  { %6277 = vmatpush1.bf16.msra.mxu0 %v9957_v40  ;;  %v6357_v40 = vrot.slane %v11954_v2, %v12038_v53 }
 0x32c   :  { %6278 = vmatprep.subr.bf16.mxu0 %v9962_v60 }
 0x32f   :  { %6279 = vmatpush1.bf16.msra.mxu0 %v9960_v10 }
 0x330   :  { %6280 = vmatprep.subr.bf16.mxu0 %v9965_v23 }
 0x333   :  { %6281 = vmatpush1.bf16.msra.mxu0 %v9963_v5 }
 0x334   :  { %6282 = vmatprep.subr.bf16.mxu0 %v9968_v19 }
 0x337   :  { %6283 = vmatpush1.bf16.msra.mxu0 %v9966_v54 }
 0x338   :  { %6284 = vmatprep.subr.bf16.mxu0 %v9971_v35 }
 0x33b   :  { %6285 = vmatpush1.bf16.msra.mxu0 %v9969_v13  ;;  %v10080_v13 = vld [vmem:[#allocation7 + $0x200] ss:$16 sps:$4 sm:$0xff]  }
 0x33c   :  { %6286 = vmatprep.subr.bf16.mxu0 %v9974_v42  ;;  %v10085_v42 = vld [vmem:[#allocation7 + $0x224] ss:$16 sps:$4 sm:$0xff]  }
 0x33f   :  { %6287 = vmatpush1.bf16.msra.mxu0 %v9972_v26  ;;  %v10083_v26 = vld [vmem:[#allocation7 + $0x220] ss:$16 sps:$4 sm:$0xff]  }
 0x340   :  { %6288 = vmatprep.subr.bf16.mxu0 %v9977_v34  ;;  %v10088_v34 = vld [vmem:[#allocation7 + $0x244] ss:$16 sps:$4 sm:$0xff]  }
 0x343   :  { %6289 = vmatpush1.bf16.msra.mxu0 %v9975_v14  ;;  %v10086_v14 = vld [vmem:[#allocation7 + $0x240] ss:$16 sps:$4 sm:$0xff]  }
 0x344   :  { %6290 = vmatprep.subr.bf16.mxu0 %v9980_v59  ;;  %v10091_v59 = vld [vmem:[#allocation7 + $0x264] ss:$16 sps:$4 sm:$0xff]  }
 0x347   :  { %6291 = vmatpush1.bf16.msra.mxu0 %v9978_v27  ;;  %v10089_v27 = vld [vmem:[#allocation7 + $0x260] ss:$16 sps:$4 sm:$0xff]  }
 0x348   :  { %6292 = vmatprep.subr.bf16.mxu0 %v9983_v20  ;;  %v10094_v20 = vld [vmem:[#allocation7 + $0x284] ss:$16 sps:$4 sm:$0xff]  }
 0x34b   :  { %6293 = vmatpush1.bf16.msra.mxu0 %v9981_v50  ;;  %v10092_v50 = vld [vmem:[#allocation7 + $0x280] ss:$16 sps:$4 sm:$0xff]  }
 0x34c   :  { %6305 = vmatprep.subr.bf16.mxu0 %v9986_v55  ;;  %v10097_v55 = vld [vmem:[#allocation7 + $0x2a4] ss:$16 sps:$4 sm:$0xff]  }
 0x34e   :  { %6295 = vmatmul.mubr.bf16.vlgmr.msra.gmra.mrb[4].mxu0 %v11887_v22  ;;  %v9999_v22 = vld [vmem:[#allocation2 + $0x700] ss:$24 sps:$4 sm:$0xff]  }
 0x34f   :  { %6306 = vmatpush1.bf16.msra.mxu0 %v9984_v49  ;;  %6337 = vmatprep.mubr.bf16.mxu0 %v11891_v15  ;;  %v10002_v15 = vld [vmem:[#allocation2 + $0x730] ss:$24 sps:$4 sm:$0xff]  }
 0x350   :  { %6307 = vmatprep.subr.bf16.mxu0 %v9989_v58  ;;  %v10095_v49 = vld [vmem:[#allocation7 + $0x2a0] ss:$16 sps:$4 sm:$0xff]   ;;  %v10100_v58 = vld [vmem:[#allocation7 + $0x2c4] ss:$16 sps:$4 sm:$0xff]  }
 0x353   :  { %6308 = vmatpush1.bf16.msra.mxu0 %v9987_v16  ;;  %v10098_v16 = vld [vmem:[#allocation7 + $0x2c0] ss:$16 sps:$4 sm:$0xff]  }
 0x354   :  { %6309 = vmatprep.subr.bf16.mxu0 %v9992_v3  ;;  %v10103_v3 = vld [vmem:[#allocation7 + $0x2e4] ss:$16 sps:$4 sm:$0xff]  }
 0x357   :  { %6310 = vmatpush1.bf16.msra.mxu0 %v9990_v1  ;;  %v10101_v1 = vld [vmem:[#allocation7 + $0x2e0] ss:$16 sps:$4 sm:$0xff]  }
 0x358   :  { %6311 = vmatprep.subr.bf16.mxu0 %v9995_v62  ;;  %v10106_v62 = vld [vmem:[#allocation7 + $0x304] ss:$16 sps:$4 sm:$0xff]  }
 0x35b   :  { %6312 = vmatpush1.bf16.msra.mxu0 %v9993_v4  ;;  %v10104_v4 = vld [vmem:[#allocation7 + $0x300] ss:$16 sps:$4 sm:$0xff]  }
 0x35c   :  { %6313 = vmatprep.subr.bf16.mxu0 %v9998_v9  ;;  %v10109_v9 = vld [vmem:[#allocation7 + $0x324] ss:$16 sps:$4 sm:$0xff]  }
 0x35f   :  { %6314 = vmatpush1.bf16.msra.mxu0 %v9996_v38  ;;  %v10107_v38 = vld [vmem:[#allocation7 + $0x320] ss:$16 sps:$4 sm:$0xff]  }
 0x360   :  { %6315 = vmatprep.subr.bf16.mxu0 %v10001_v25  ;;  %v10112_v25 = vld [vmem:[#allocation7 + $0x344] ss:$16 sps:$4 sm:$0xff]  }
 0x363   :  { %6316 = vmatpush1.bf16.msra.mxu0 %v9999_v22  ;;  %v10110_v22 = vld [vmem:[#allocation7 + $0x340] ss:$16 sps:$4 sm:$0xff]  }
 0x364   :  { %6317 = vmatprep.subr.bf16.mxu0 %v10004_v33  ;;  %v10115_v33 = vld [vmem:[#allocation7 + $0x364] ss:$16 sps:$4 sm:$0xff]  }
 0x367   :  { %6318 = vmatpush1.bf16.msra.mxu0 %v10002_v15  ;;  %v10113_v15 = vld [vmem:[#allocation7 + $0x360] ss:$16 sps:$4 sm:$0xff]  }
 0x368   :  { %6319 = vmatprep.subr.bf16.mxu0 %v10007_v0  ;;  %v10118_v0 = vld [vmem:[#allocation7 + $0x384] ss:$16 sps:$4 sm:$0xff]  }
 0x36b   :  { %6320 = vmatpush1.bf16.msra.mxu0 %v10005_v39  ;;  %v10116_v39 = vld [vmem:[#allocation7 + $0x380] ss:$16 sps:$4 sm:$0xff]  }
 0x36c   :  { %6321 = vmatprep.subr.bf16.mxu0 %v10010_v43  ;;  %v10121_v43 = vld [vmem:[#allocation7 + $0x3a4] ss:$16 sps:$4 sm:$0xff]  }
 0x36f   :  { %6322 = vmatpush1.bf16.msra.mxu0 %v10008_v29  ;;  %v10119_v29 = vld [vmem:[#allocation7 + $0x3a0] ss:$16 sps:$4 sm:$0xff]  }
 0x370   :  { %6323 = vmatprep.subr.bf16.mxu0 %v10013_v36  ;;  %v10124_v36 = vld [vmem:[#allocation7 + $0x3c4] ss:$16 sps:$4 sm:$0xff]  }
 0x373   :  { %6324 = vmatpush1.bf16.msra.mxu0 %v10011_v31  ;;  %v10122_v31 = vld [vmem:[#allocation7 + $0x3c0] ss:$16 sps:$4 sm:$0xff]  }
 0x374   :  { %6325 = vmatprep.subr.bf16.mxu0 %v10019_v12  ;;  %v10127_v12 = vld [vmem:[#allocation7 + $0x3e4] ss:$16 sps:$4 sm:$0xff]  }
 0x377   :  { %6326 = vmatpush1.bf16.msra.mxu0 %v10017_v44  ;;  %v10125_v44 = vld [vmem:[#allocation7 + $0x3e0] ss:$16 sps:$4 sm:$0xff]  }
 0x378   :  { %6327 = vmatprep.subr.bf16.mxu0 %v10025_v51  ;;  %v10130_v51 = vld [vmem:[#allocation7 + $0x404] ss:$16 sps:$4 sm:$0xff]  }
 0x37b   :  { %6328 = vmatpush1.bf16.msra.mxu0 %v10023_v32  ;;  %v10128_v32 = vld [vmem:[#allocation7 + $0x400] ss:$16 sps:$4 sm:$0xff]  }
 0x37c   :  { %6329 = vmatprep.subr.bf16.mxu0 %v10031_v45  ;;  %v10133_v45 = vld [vmem:[#allocation7 + $0x424] ss:$16 sps:$4 sm:$0xff]  }
 0x37f   :  { %6330 = vmatpush1.bf16.msra.mxu0 %v10029_v48  ;;  %v10131_v48 = vld [vmem:[#allocation7 + $0x420] ss:$16 sps:$4 sm:$0xff]  }
 0x380   :  { %6331 = vmatprep.subr.bf16.mxu0 %v10037_v46  ;;  %v10136_v46 = vld [vmem:[#allocation7 + $0x444] ss:$16 sps:$4 sm:$0xff]  }
 0x383   :  { %6332 = vmatpush1.bf16.msra.mxu0 %v10035_v18  ;;  %v10134_v18 = vld [vmem:[#allocation7 + $0x440] ss:$16 sps:$4 sm:$0xff]  }
 0x384   :  { %6333 = vmatprep.subr.bf16.mxu0 %v10043_v28  ;;  %v10139_v28 = vld [vmem:[#allocation7 + $0x464] ss:$16 sps:$4 sm:$0xff]  }
 0x387   :  { %6334 = vmatpush1.bf16.msra.mxu0 %v10041_v52  ;;  %v10137_v52 = vld [vmem:[#allocation7 + $0x460] ss:$16 sps:$4 sm:$0xff]  }
 0x388   :  { %6335 = vmatprep.subr.bf16.mxu0 %v10049_v11  ;;  %v10142_v11 = vld [vmem:[#allocation7 + $0x484] ss:$16 sps:$4 sm:$0xff]  }
 0x38b   :  { %6336 = vmatpush1.bf16.msra.mxu0 %v10047_v30  ;;  %v10140_v30 = vld [vmem:[#allocation7 + $0x480] ss:$16 sps:$4 sm:$0xff]  }
 0x38e   :  { %6338 = vmatmul.mubr.bf16.vlgmr.msra.gmra.mrb[4].mxu0 %v11943_v37 }
 0x3a1   :  { %v6081_v17 = vpop.f32.mrb[0].mxu0 }
 0x3a2   :  { %v6380_v21 = vadd.f32 %v6353_v63, %v6081_v17  ;;  %v6083_v60 = vpop.f32.mrb[1].mxu0  ;;  %v10148_v17 = vld [vmem:[#allocation7 + $0x4c4] ss:$16 sps:$4 sm:$0xff]  }
 0x3a3   :  { %v6381_v41 = vadd.f32 %v6357_v40, %v6083_v60  ;;  %v6085_v56 = vpop.f32.mrb[2].mxu0  ;;  %v10151_v60 = vld [vmem:[#allocation7 + $0x4e4] ss:$16 sps:$4 sm:$0xff]  }
 0x3a4   :  { %10360 = vtanh.f32 %v6380_v21  ;;  %v6386_v10 = vadd.f32 %v6353_v63, %v6085_v56  ;;  %v6087_v23 = vpop.f32.mrb[3].mxu0  ;;  %v10145_v63 = vld [vmem:[#allocation7 + $0x4a4] ss:$16 sps:$4 sm:$0xff]   ;;  %v10146_v21 = vld [vmem:[#allocation7 + $0x4c0] ss:$16 sps:$4 sm:$0xff]  }
 0x3a5   :  { %10362 = vtanh.f32 %v6381_v41  ;;  %v6387_v24 = vadd.f32 %v6357_v40, %v6087_v23  ;;  %v10143_v40 = vld [vmem:[#allocation7 + $0x4a0] ss:$16 sps:$4 sm:$0xff]   ;;  %v10154_v56 = vld [vmem:[#allocation7 + $0x504] ss:$16 sps:$4 sm:$0xff]  }
 0x3a6   :  { %10364 = vtanh.f32 %v6386_v10  ;;  %v10149_v41 = vld [vmem:[#allocation7 + $0x4e0] ss:$16 sps:$4 sm:$0xff]   ;;  %v10157_v23 = vld [vmem:[#allocation7 + $0x524] ss:$16 sps:$4 sm:$0xff]  }
 0x3a7   :  { %10366 = vtanh.f32 %v6387_v24  ;;  %v10152_v10 = vld [vmem:[#allocation7 + $0x500] ss:$16 sps:$4 sm:$0xff]  }
 0x3a8   :  { %v10155_v24 = vld [vmem:[#allocation7 + $0x520] ss:$16 sps:$4 sm:$0xff]  }
 0x3ae   :  { %v10361_v5 = vpop.eup %10360 }
 0x3af   :  { %v10363_v37 = vpop.eup %10362 }
 0x3b0   :  { %v10365_v19 = vpop.eup %10364 }
 0x3b1   :  { %v10367_v7 = vpop.eup %10366  ;;  %v11973_v54 = vpack.c.bf16 %v10365_v19, %v10361_v5  ;;  %v10160_v5 = vld [vmem:[#allocation7 + $0x544] ss:$16 sps:$4 sm:$0xff]  }
 0x3b2   :  { %v11975_v35 = vpack.c.bf16 %v10367_v7, %v10363_v37  ;;  %v10158_v37 = vld [vmem:[#allocation7 + $0x540] ss:$16 sps:$4 sm:$0xff]   ;;  %v10163_v19 = vld [vmem:[#allocation7 + $0x564] ss:$16 sps:$4 sm:$0xff]  }
 0x3b3   :  { %v10161_v7 = vld [vmem:[#allocation7 + $0x560] ss:$16 sps:$4 sm:$0xff]  }
 0x3b4   :  { %7616 = vmatprep.mubr.bf16.mxu1 %v11975_v35 }
 0x3b5   :  { %7617 = vmatmul.mubr.bf16.vlgmr.msra.gmra.mrb[4].mxu1 %v11973_v54 }
 0x3b6   :  { %7628 = vmatpush1.bf16.msra.mxu1 %v10080_v13  ;;  %7659 = vmatprep.mubr.bf16.mxu1 %v11962_v61  ;;  %v10166_v13 = vld [vmem:[#allocation7 + $0x584] ss:$16 sps:$4 sm:$0xff]  }
 0x3b7   :  { %7629 = vmatprep.subr.bf16.mxu1 %v10085_v42  ;;  %v10164_v42 = vld [vmem:[#allocation7 + $0x580] ss:$16 sps:$4 sm:$0xff]  }
 0x3ba   :  { %7630 = vmatpush1.bf16.msra.mxu1 %v10083_v26  ;;  %v10169_v26 = vld [vmem:[#allocation7 + $0x5a4] ss:$16 sps:$4 sm:$0xff]  }
 0x3bb   :  { %7631 = vmatprep.subr.bf16.mxu1 %v10088_v34  ;;  %v10167_v34 = vld [vmem:[#allocation7 + $0x5a0] ss:$16 sps:$4 sm:$0xff]  }
 0x3be   :  { %7632 = vmatpush1.bf16.msra.mxu1 %v10086_v14  ;;  %v10172_v14 = vld [vmem:[#allocation7 + $0x5c4] ss:$16 sps:$4 sm:$0xff]  }
 0x3bf   :  { %7633 = vmatprep.subr.bf16.mxu1 %v10091_v59  ;;  %v10170_v59 = vld [vmem:[#allocation7 + $0x5c0] ss:$16 sps:$4 sm:$0xff]  }
 0x3c2   :  { %7634 = vmatpush1.bf16.msra.mxu1 %v10089_v27  ;;  %v10175_v27 = vld [vmem:[#allocation7 + $0x5e4] ss:$16 sps:$4 sm:$0xff]  }
 0x3c3   :  { %7635 = vmatprep.subr.bf16.mxu1 %v10094_v20  ;;  %v10173_v20 = vld [vmem:[#allocation7 + $0x5e0] ss:$16 sps:$4 sm:$0xff]  }
 0x3c6   :  { %7636 = vmatpush1.bf16.msra.mxu1 %v10092_v50  ;;  %v10178_v50 = vld [vmem:[#allocation7 + $0xc] ss:$16 sps:$4 sm:$0xff]  }
 0x3c7   :  { %7637 = vmatprep.subr.bf16.mxu1 %v10097_v55  ;;  %v12039_v55 = vld [vmem:[#allocation22_spill] sm:$0xff] }
 0x3ca   :  { %7638 = vmatpush1.bf16.msra.mxu1 %v10095_v49  ;;  %v6369_v49 = vrot.slane %v11954_v2, %v12039_v55  ;;  %v10324_v55 = vld [vmem:[#allocation10 + $0x50] sm:$0xff]  }
 0x3cb   :  { %7639 = vmatprep.subr.bf16.mxu1 %v10100_v58  ;;  %v12040_v58 = vld [vmem:[#allocation19_spill] sm:$0xff] }
 0x3ce   :  { %7640 = vmatpush1.bf16.msra.mxu1 %v10098_v16  ;;  %v6373_v16 = vrot.slane %v11954_v2, %v12040_v58  ;;  %v10176_v2 = vld [vmem:[#allocation7 + $0x8] ss:$16 sps:$4 sm:$0xff]  }
 0x3cf   :  { %7641 = vmatprep.subr.bf16.mxu1 %v10103_v3  ;;  %v10325_v58 = vld [vmem:[#allocation10 + $0x10] sm:$0xff]  }
 0x3d2   :  { %7642 = vmatpush1.bf16.msra.mxu1 %v10101_v1 }
 0x3d3   :  { %7643 = vmatprep.subr.bf16.mxu1 %v10106_v62 }
 0x3d6   :  { %7644 = vmatpush1.bf16.msra.mxu1 %v10104_v4 }
 0x3d7   :  { %7645 = vmatprep.subr.bf16.mxu1 %v10109_v9 }
 0x3da   :  { %7646 = vmatpush1.bf16.msra.mxu1 %v10107_v38 }
 0x3db   :  { %7647 = vmatprep.subr.bf16.mxu1 %v10112_v25 }
 0x3de   :  { %7648 = vmatpush1.bf16.msra.mxu1 %v10110_v22 }
 0x3df   :  { %7649 = vmatprep.subr.bf16.mxu1 %v10115_v33 }
 0x3e2   :  { %7650 = vmatpush1.bf16.msra.mxu1 %v10113_v15 }
 0x3e3   :  { %7651 = vmatprep.subr.bf16.mxu1 %v10118_v0 }
 0x3e6   :  { %7652 = vmatpush1.bf16.msra.mxu1 %v10116_v39 }
 0x3e7   :  { %7653 = vmatprep.subr.bf16.mxu1 %v10121_v43 }
 0x3ea   :  { %7654 = vmatpush1.bf16.msra.mxu1 %v10119_v29 }
 0x3eb   :  { %7655 = vmatprep.subr.bf16.mxu1 %v10124_v36  ;;  %v10181_v36 = vld [vmem:[#allocation7 + $0x2c] ss:$16 sps:$4 sm:$0xff]  }
 0x3ee   :  { %7656 = vmatpush1.bf16.msra.mxu1 %v10122_v31  ;;  %v10179_v31 = vld [vmem:[#allocation7 + $0x28] ss:$16 sps:$4 sm:$0xff]  }
 0x3ef   :  { %7657 = vmatprep.subr.bf16.mxu1 %v10127_v12  ;;  %v10184_v12 = vld [vmem:[#allocation7 + $0x4c] ss:$16 sps:$4 sm:$0xff]  }
 0x3f2   :  { %7658 = vmatpush1.bf16.msra.mxu1 %v10125_v44  ;;  %v10182_v44 = vld [vmem:[#allocation7 + $0x48] ss:$16 sps:$4 sm:$0xff]  }
 0x3f3   :  { %7670 = vmatprep.subr.bf16.mxu1 %v10130_v51  ;;  %v10187_v51 = vld [vmem:[#allocation7 + $0x6c] ss:$16 sps:$4 sm:$0xff]  }
 0x3f5   :  { %7660 = vmatmul.mubr.bf16.vlgmr.msra.gmra.mrb[4].mxu1 %v11960_v57 }
 0x3f6   :  { %7671 = vmatpush1.bf16.msra.mxu1 %v10128_v32  ;;  %v10185_v32 = vld [vmem:[#allocation7 + $0x68] ss:$16 sps:$4 sm:$0xff]  }
 0x3f7   :  { %7672 = vmatprep.subr.bf16.mxu1 %v10133_v45  ;;  %v10190_v45 = vld [vmem:[#allocation7 + $0x8c] ss:$16 sps:$4 sm:$0xff]  }
 0x3fa   :  { %7673 = vmatpush1.bf16.msra.mxu1 %v10131_v48  ;;  %v10188_v48 = vld [vmem:[#allocation7 + $0x88] ss:$16 sps:$4 sm:$0xff]  }
 0x3fb   :  { %7674 = vmatprep.subr.bf16.mxu1 %v10136_v46  ;;  %v10193_v46 = vld [vmem:[#allocation7 + $0xac] ss:$16 sps:$4 sm:$0xff]  }
 0x3fe   :  { %7675 = vmatpush1.bf16.msra.mxu1 %v10134_v18  ;;  %v10191_v18 = vld [vmem:[#allocation7 + $0xa8] ss:$16 sps:$4 sm:$0xff]  }
 0x3ff   :  { %7676 = vmatprep.subr.bf16.mxu1 %v10139_v28  ;;  %v10196_v28 = vld [vmem:[#allocation7 + $0xcc] ss:$16 sps:$4 sm:$0xff]  }
 0x402   :  { %7677 = vmatpush1.bf16.msra.mxu1 %v10137_v52  ;;  %v10199_v52 = vld [vmem:[#allocation7 + $0xec] ss:$16 sps:$4 sm:$0xff]  }
 0x403   :  { %7678 = vmatprep.subr.bf16.mxu1 %v10142_v11  ;;  %v10197_v11 = vld [vmem:[#allocation7 + $0xe8] ss:$16 sps:$4 sm:$0xff]  }
 0x406   :  { %7679 = vmatpush1.bf16.msra.mxu1 %v10140_v30  ;;  %v10202_v30 = vld [vmem:[#allocation7 + $0x10c] ss:$16 sps:$4 sm:$0xff]  }
 0x407   :  { %7680 = vmatprep.subr.bf16.mxu1 %v10145_v63  ;;  %v10200_v63 = vld [vmem:[#allocation7 + $0x108] ss:$16 sps:$4 sm:$0xff]  }
 0x40a   :  { %7681 = vmatpush1.bf16.msra.mxu1 %v10143_v40  ;;  %v10205_v40 = vld [vmem:[#allocation7 + $0x12c] ss:$16 sps:$4 sm:$0xff]  }
 0x40b   :  { %7682 = vmatprep.subr.bf16.mxu1 %v10148_v17  ;;  %v10203_v17 = vld [vmem:[#allocation7 + $0x128] ss:$16 sps:$4 sm:$0xff]  }
 0x40e   :  { %7683 = vmatpush1.bf16.msra.mxu1 %v10146_v21  ;;  %v10208_v21 = vld [vmem:[#allocation7 + $0x14c] ss:$16 sps:$4 sm:$0xff]  }
 0x40f   :  { %7684 = vmatprep.subr.bf16.mxu1 %v10151_v60  ;;  %v10206_v60 = vld [vmem:[#allocation7 + $0x148] ss:$16 sps:$4 sm:$0xff]  }
 0x412   :  { %7685 = vmatpush1.bf16.msra.mxu1 %v10149_v41  ;;  %v10211_v41 = vld [vmem:[#allocation7 + $0x16c] ss:$16 sps:$4 sm:$0xff]  }
 0x413   :  { %7686 = vmatprep.subr.bf16.mxu1 %v10154_v56  ;;  %v10209_v56 = vld [vmem:[#allocation7 + $0x168] ss:$16 sps:$4 sm:$0xff]  }
 0x416   :  { %7687 = vmatpush1.bf16.msra.mxu1 %v10152_v10  ;;  %v10214_v10 = vld [vmem:[#allocation7 + $0x18c] ss:$16 sps:$4 sm:$0xff]  }
 0x417   :  { %7688 = vmatprep.subr.bf16.mxu1 %v10157_v23  ;;  %v10212_v23 = vld [vmem:[#allocation7 + $0x188] ss:$16 sps:$4 sm:$0xff]  }
 0x41a   :  { %7689 = vmatpush1.bf16.msra.mxu1 %v10155_v24  ;;  %v10217_v24 = vld [vmem:[#allocation7 + $0x1ac] ss:$16 sps:$4 sm:$0xff]  }
 0x41b   :  { %7690 = vmatprep.subr.bf16.mxu1 %v10160_v5  ;;  %v10215_v5 = vld [vmem:[#allocation7 + $0x1a8] ss:$16 sps:$4 sm:$0xff]  }
 0x41e   :  { %7691 = vmatpush1.bf16.msra.mxu1 %v10158_v37  ;;  %v10220_v37 = vld [vmem:[#allocation7 + $0x1cc] ss:$16 sps:$4 sm:$0xff]  }
 0x41f   :  { %7692 = vmatprep.subr.bf16.mxu1 %v10163_v19  ;;  %v10218_v19 = vld [vmem:[#allocation7 + $0x1c8] ss:$16 sps:$4 sm:$0xff]  }
 0x422   :  { %7693 = vmatpush1.bf16.msra.mxu1 %v10161_v7  ;;  %v10223_v7 = vld [vmem:[#allocation7 + $0x1ec] ss:$16 sps:$4 sm:$0xff]  }
 0x423   :  { %7694 = vmatprep.subr.bf16.mxu1 %v10166_v13  ;;  %v10221_v13 = vld [vmem:[#allocation7 + $0x1e8] ss:$16 sps:$4 sm:$0xff]  }
 0x426   :  { %7695 = vmatpush1.bf16.msra.mxu1 %v10164_v42  ;;  %v10226_v42 = vld [vmem:[#allocation7 + $0x20c] ss:$16 sps:$4 sm:$0xff]  }
 0x427   :  { %7696 = vmatprep.subr.bf16.mxu1 %v10169_v26  ;;  %v10224_v26 = vld [vmem:[#allocation7 + $0x208] ss:$16 sps:$4 sm:$0xff]  }
 0x42a   :  { %7697 = vmatpush1.bf16.msra.mxu1 %v10167_v34  ;;  %v10320_v34 = vld [vmem:[#allocation10 + $0x40] sm:$0xff]  }
 0x42b   :  { %7698 = vmatprep.subr.bf16.mxu1 %v10172_v14  ;;  %v10229_v14 = vld [vmem:[#allocation7 + $0x22c] ss:$16 sps:$4 sm:$0xff]   ;;  %9027 = vmatprep.subr.bf16.mxu0 %v10320_v34 }
 0x42c   :  { %v10292_v34 = vld [vmem:[#allocation7 + $0x4cc] ss:$16 sps:$4 sm:$0xff]  }
 0x42e   :  { %7699 = vmatpush1.bf16.msra.mxu1 %v10170_v59  ;;  %v10321_v59 = vld [vmem:[#allocation10] sm:$0xff]  }
 0x42f   :  { %7700 = vmatprep.subr.bf16.mxu1 %v10175_v27  ;;  %9028 = vmatpush3.bf16.msra.mxu0 %v10321_v59  ;;  %v10322_v27 = vld [vmem:[#allocation10 + $0x48] sm:$0xff]   ;;  %v10293_v59 = vld [vmem:[#allocation7 + $0x4e8] ss:$16 sps:$4 sm:$0xff]  }
 0x430   :  { %9029 = vmatprep.subr.bf16.mxu0 %v10322_v27  ;;  %v10298_v27 = vld [vmem:[#allocation7 + $0x50c] ss:$16 sps:$4 sm:$0xff]  }
 0x432   :  { %7701 = vmatpush1.bf16.msra.mxu1 %v10173_v20  ;;  %v10323_v20 = vld [vmem:[#allocation10 + $0x8] sm:$0xff]  }
 0x433   :  { %7713 = vmatprep.subr.bf16.mxu1 %v10178_v50  ;;  %v10227_v50 = vld [vmem:[#allocation7 + $0x228] ss:$16 sps:$4 sm:$0xff]   ;;  %9030 = vmatpush3.bf16.msra.mxu0 %v10323_v20 }
 0x434   :  { %9031 = vmatprep.subr.bf16.mxu0 %v10324_v55  ;;  %v10296_v20 = vld [vmem:[#allocation7 + $0x508] ss:$16 sps:$4 sm:$0xff]  }
 0x435   :  { %v10299_v55 = vld [vmem:[#allocation7 + $0x528] ss:$16 sps:$4 sm:$0xff]  }
 0x437   :  { %9032 = vmatpush3.bf16.msra.mxu0 %v10325_v58  ;;  %v10302_v58 = vld [vmem:[#allocation7 + $0x548] ss:$16 sps:$4 sm:$0xff]  }
 0x461   :  { %v6339_v3 = vpop.f32.mrb[4].mxu0 }
 0x462   :  { %v6384_v1 = vadd.f32 %v6369_v49, %v6339_v3  ;;  %v6341_v62 = vpop.f32.mrb[5].mxu0  ;;  %v10326_v3 = vld [vmem:[#allocation10 + $0x58] sm:$0xff]  }
 0x463   :  { %v6385_v4 = vadd.f32 %v6373_v16, %v6341_v62  ;;  %v6343_v9 = vpop.f32.mrb[6].mxu0  ;;  %v10233_v62 = vld [vmem:[#allocation7 + $0x268] ss:$16 sps:$4 sm:$0xff]   ;;  %9033 = vmatprep.subr.bf16.mxu0 %v10326_v3 }
 0x464   :  { %10368 = vtanh.f32 %v6384_v1  ;;  %v6390_v38 = vadd.f32 %v6369_v49, %v6343_v9  ;;  %v6345_v25 = vpop.f32.mrb[7].mxu0  ;;  %v10232_v49 = vld [vmem:[#allocation7 + $0x24c] ss:$16 sps:$4 sm:$0xff]   ;;  %v10329_v9 = vld [vmem:[#allocation10 + $0x20] sm:$0xff]  }
 0x465   :  { %10370 = vtanh.f32 %v6385_v4  ;;  %v6391_v22 = vadd.f32 %v6373_v16, %v6345_v25  ;;  %v10230_v16 = vld [vmem:[#allocation7 + $0x248] ss:$16 sps:$4 sm:$0xff]   ;;  %v10235_v1 = vld [vmem:[#allocation7 + $0x26c] ss:$16 sps:$4 sm:$0xff]  }
 0x466   :  { %10372 = vtanh.f32 %v6390_v38  ;;  %v10328_v4 = vld [vmem:[#allocation10 + $0x60] sm:$0xff]   ;;  %v10330_v25 = vld [vmem:[#allocation10 + $0x68] sm:$0xff]  }
 0x467   :  { %10374 = vtanh.f32 %v6391_v22  ;;  %v10236_v38 = vld [vmem:[#allocation7 + $0x288] ss:$16 sps:$4 sm:$0xff]   ;;  %v10241_v22 = vld [vmem:[#allocation7 + $0x2ac] ss:$16 sps:$4 sm:$0xff]  }
 0x468   :  { %v10305_v3 = vld [vmem:[#allocation7 + $0x568] ss:$16 sps:$4 sm:$0xff]  }
 0x46e   :  { %v10369_v33 = vpop.eup %10368 }
 0x46f   :  { %v10371_v15 = vpop.eup %10370 }
 0x470   :  { %v10373_v0 = vpop.eup %10372 }
 0x471   :  { %v10375_v39 = vpop.eup %10374  ;;  %v11985_v43 = vpack.c.bf16 %v10373_v0, %v10369_v33  ;;  %v10239_v33 = vld [vmem:[#allocation7 + $0x2a8] ss:$16 sps:$4 sm:$0xff]   ;;  %v10331_v0 = vld [vmem:[#allocation10 + $0x28] sm:$0xff]  }
 0x472   :  { %v11987_v29 = vpack.c.bf16 %v10375_v39, %v10371_v15  ;;  %v10244_v15 = vld [vmem:[#allocation7 + $0x2cc] ss:$16 sps:$4 sm:$0xff]   ;;  %v10242_v39 = vld [vmem:[#allocation7 + $0x2c8] ss:$16 sps:$4 sm:$0xff]  }
 0x474   :  { %7702 = vmatprep.mubr.bf16.mxu1 %v11987_v29 }
 0x475   :  { %7703 = vmatmul.mubr.bf16.vlgmr.msra.gmra.mrb[4].mxu1 %v11985_v43 }
 0x476   :  { %7714 = vmatpush1.bf16.msra.mxu1 %v10176_v2  ;;  %7745 = vmatprep.mubr.bf16.mxu1 %v11975_v35  ;;  %v10194_v35 = vld [vmem:[#allocation7 + $0xc8] ss:$16 sps:$4 sm:$0xff]  }
 0x477   :  { %7715 = vmatprep.subr.bf16.mxu1 %v10181_v36  ;;  %v10332_v2 = vld [vmem:[#allocation10 + $0x70] sm:$0xff]   ;;  %v10247_v36 = vld [vmem:[#allocation7 + $0x2ec] ss:$16 sps:$4 sm:$0xff]  }
 0x47a   :  { %7716 = vmatpush1.bf16.msra.mxu1 %v10179_v31  ;;  %v10333_v31 = vld [vmem:[#allocation10 + $0x30] sm:$0xff]  }
 0x47b   :  { %7717 = vmatprep.subr.bf16.mxu1 %v10184_v12  ;;  %v10245_v12 = vld [vmem:[#allocation7 + $0x2e8] ss:$16 sps:$4 sm:$0xff]  }
 0x47e   :  { %7718 = vmatpush1.bf16.msra.mxu1 %v10182_v44  ;;  %v10334_v44 = vld [vmem:[#allocation10 + $0x78] sm:$0xff]  }
 0x47f   :  { %7719 = vmatprep.subr.bf16.mxu1 %v10187_v51  ;;  %v10250_v51 = vld [vmem:[#allocation7 + $0x30c] ss:$16 sps:$4 sm:$0xff]  }
 0x482   :  { %7720 = vmatpush1.bf16.msra.mxu1 %v10185_v32  ;;  %v10335_v32 = vld [vmem:[#allocation10 + $0x38] sm:$0xff]  }
 0x483   :  { %7721 = vmatprep.subr.bf16.mxu1 %v10190_v45  ;;  %v10248_v45 = vld [vmem:[#allocation7 + $0x308] ss:$16 sps:$4 sm:$0xff]  }
 0x486   :  { %7722 = vmatpush1.bf16.msra.mxu1 %v10188_v48  ;;  %v10253_v48 = vld [vmem:[#allocation7 + $0x32c] ss:$16 sps:$4 sm:$0xff]  }
 0x487   :  { %7723 = vmatprep.subr.bf16.mxu1 %v10193_v46  ;;  %v10251_v46 = vld [vmem:[#allocation7 + $0x328] ss:$16 sps:$4 sm:$0xff]  }
 0x48a   :  { %7724 = vmatpush1.bf16.msra.mxu1 %v10191_v18  ;;  %v10256_v18 = vld [vmem:[#allocation7 + $0x34c] ss:$16 sps:$4 sm:$0xff]  }
 0x48b   :  { %7725 = vmatprep.subr.bf16.mxu1 %v10196_v28  ;;  %v10254_v28 = vld [vmem:[#allocation7 + $0x348] ss:$16 sps:$4 sm:$0xff]  }
 0x48e   :  { %7726 = vmatpush1.bf16.msra.mxu1 %v10194_v35  ;;  %v10259_v35 = vld [vmem:[#allocation7 + $0x36c] ss:$16 sps:$4 sm:$0xff]  }
 0x48f   :  { %7727 = vmatprep.subr.bf16.mxu1 %v10199_v52  ;;  %v10257_v52 = vld [vmem:[#allocation7 + $0x368] ss:$16 sps:$4 sm:$0xff]  }
 0x492   :  { %7728 = vmatpush1.bf16.msra.mxu1 %v10197_v11  ;;  %v10262_v11 = vld [vmem:[#allocation7 + $0x38c] ss:$16 sps:$4 sm:$0xff]  }
 0x493   :  { %7729 = vmatprep.subr.bf16.mxu1 %v10202_v30  ;;  %v10260_v30 = vld [vmem:[#allocation7 + $0x388] ss:$16 sps:$4 sm:$0xff]  }
 0x496   :  { %7730 = vmatpush1.bf16.msra.mxu1 %v10200_v63  ;;  %v10265_v63 = vld [vmem:[#allocation7 + $0x3ac] ss:$16 sps:$4 sm:$0xff]  }
 0x497   :  { %7731 = vmatprep.subr.bf16.mxu1 %v10205_v40  ;;  %v10263_v40 = vld [vmem:[#allocation7 + $0x3a8] ss:$16 sps:$4 sm:$0xff]  }
 0x49a   :  { %7732 = vmatpush1.bf16.msra.mxu1 %v10203_v17  ;;  %v10268_v17 = vld [vmem:[#allocation7 + $0x3cc] ss:$16 sps:$4 sm:$0xff]  }
 0x49b   :  { %7733 = vmatprep.subr.bf16.mxu1 %v10208_v21  ;;  %v10266_v21 = vld [vmem:[#allocation7 + $0x3c8] ss:$16 sps:$4 sm:$0xff]  }
 0x49e   :  { %7734 = vmatpush1.bf16.msra.mxu1 %v10206_v60  ;;  %v10271_v60 = vld [vmem:[#allocation7 + $0x3ec] ss:$16 sps:$4 sm:$0xff]  }
 0x49f   :  { %7735 = vmatprep.subr.bf16.mxu1 %v10211_v41  ;;  %v10269_v41 = vld [vmem:[#allocation7 + $0x3e8] ss:$16 sps:$4 sm:$0xff]  }
 0x4a2   :  { %7736 = vmatpush1.bf16.msra.mxu1 %v10209_v56  ;;  %v10274_v56 = vld [vmem:[#allocation7 + $0x40c] ss:$16 sps:$4 sm:$0xff]  }
 0x4a3   :  { %7737 = vmatprep.subr.bf16.mxu1 %v10214_v10  ;;  %v10272_v10 = vld [vmem:[#allocation7 + $0x408] ss:$16 sps:$4 sm:$0xff]  }
 0x4a6   :  { %7738 = vmatpush1.bf16.msra.mxu1 %v10212_v23  ;;  %v10277_v23 = vld [vmem:[#allocation7 + $0x42c] ss:$16 sps:$4 sm:$0xff]  }
 0x4a7   :  { %7739 = vmatprep.subr.bf16.mxu1 %v10217_v24  ;;  %v10275_v24 = vld [vmem:[#allocation7 + $0x428] ss:$16 sps:$4 sm:$0xff]  }
 0x4aa   :  { %7740 = vmatpush1.bf16.msra.mxu1 %v10215_v5  ;;  %v10280_v5 = vld [vmem:[#allocation7 + $0x44c] ss:$16 sps:$4 sm:$0xff]  }
 0x4ab   :  { %7741 = vmatprep.subr.bf16.mxu1 %v10220_v37  ;;  %v10278_v37 = vld [vmem:[#allocation7 + $0x448] ss:$16 sps:$4 sm:$0xff]  }
 0x4ae   :  { %7742 = vmatpush1.bf16.msra.mxu1 %v10218_v19  ;;  %v10283_v19 = vld [vmem:[#allocation7 + $0x46c] ss:$16 sps:$4 sm:$0xff]  }
 0x4af   :  { %7743 = vmatprep.subr.bf16.mxu1 %v10223_v7  ;;  %v10281_v7 = vld [vmem:[#allocation7 + $0x468] ss:$16 sps:$4 sm:$0xff]  }
 0x4b2   :  { %7744 = vmatpush1.bf16.msra.mxu1 %v10221_v13  ;;  %v10286_v13 = vld [vmem:[#allocation7 + $0x48c] ss:$16 sps:$4 sm:$0xff]  }
 0x4b3   :  { %7756 = vmatprep.subr.bf16.mxu1 %v10226_v42  ;;  %v10284_v42 = vld [vmem:[#allocation7 + $0x488] ss:$16 sps:$4 sm:$0xff]  }
 0x4b5   :  { %7746 = vmatmul.mubr.bf16.vlgmr.msra.gmra.mrb[8].mxu1 %v11973_v54  ;;  %v10327_v54 = vld [vmem:[#allocation10 + $0x18] sm:$0xff]  }
 0x4b6   :  { %7757 = vmatpush1.bf16.msra.mxu1 %v10224_v26  ;;  %7788 = vmatprep.mubr.bf16.mxu1 %v11962_v61  ;;  %v10238_v61 = vld [vmem:[#allocation7 + $0x28c] ss:$16 sps:$4 sm:$0xff]  }
 0x4b7   :  { %7758 = vmatprep.subr.bf16.mxu1 %v10229_v14  ;;  %9034 = vmatpush3.bf16.msra.mxu0 %v10327_v54  ;;  %v10289_v26 = vld [vmem:[#allocation7 + $0x4ac] ss:$16 sps:$4 sm:$0xff]   ;;  %v10308_v54 = vld [vmem:[#allocation7 + $0x588] ss:$16 sps:$4 sm:$0xff]  }
 0x4b8   :  { %9035 = vmatprep.subr.bf16.mxu0 %v10328_v4  ;;  %v10295_v14 = vld [vmem:[#allocation7 + $0x4ec] ss:$16 sps:$4 sm:$0xff]   ;;  %v10311_v4 = vld [vmem:[#allocation7 + $0x5a8] ss:$16 sps:$4 sm:$0xff]  }
 0x4ba   :  { %7759 = vmatpush1.bf16.msra.mxu1 %v10227_v50  ;;  %v10301_v50 = vld [vmem:[#allocation7 + $0x52c] ss:$16 sps:$4 sm:$0xff]  }
 0x4bb   :  { %7760 = vmatprep.subr.bf16.mxu1 %v10232_v49  ;;  %9036 = vmatpush3.bf16.msra.mxu0 %v10329_v9  ;;  %v10304_v49 = vld [vmem:[#allocation7 + $0x54c] ss:$16 sps:$4 sm:$0xff]   ;;  %v10314_v9 = vld [vmem:[#allocation7 + $0x5c8] ss:$16 sps:$4 sm:$0xff]  }
 0x4bc   :  { %9037 = vmatprep.subr.bf16.mxu0 %v10330_v25  ;;  %v10317_v25 = vld [vmem:[#allocation7 + $0x5e8] ss:$16 sps:$4 sm:$0xff]  }
 0x4be   :  { %7761 = vmatpush1.bf16.msra.mxu1 %v10230_v16  ;;  %v10307_v16 = vld [vmem:[#allocation7 + $0x56c] ss:$16 sps:$4 sm:$0xff]  }
 0x4bf   :  { %7762 = vmatprep.subr.bf16.mxu1 %v10235_v1  ;;  %9038 = vmatpush3.bf16.msra.mxu0 %v10331_v0  ;;  %v10310_v1 = vld [vmem:[#allocation7 + $0x58c] ss:$16 sps:$4 sm:$0xff]  }
 0x4c0   :  { %9039 = vmatprep.subr.bf16.mxu0 %v10332_v2  ;;  %v10339_v0 = vld [vmem:[#allocation10 + $0x88] sm:$0xff]   ;;  %v10341_v2 = vld [vmem:[#allocation10 + $0x90] sm:$0xff]  }
 0x4c2   :  { %7763 = vmatpush1.bf16.msra.mxu1 %v10233_v62  ;;  %v10313_v62 = vld [vmem:[#allocation7 + $0x5ac] ss:$16 sps:$4 sm:$0xff]  }
 0x4c3   :  { %7764 = vmatprep.subr.bf16.mxu1 %v10238_v61  ;;  %9040 = vmatpush3.bf16.msra.mxu0 %v10333_v31  ;;  %v10316_v61 = vld [vmem:[#allocation7 + $0x5cc] ss:$16 sps:$4 sm:$0xff]  }
 0x4c4   :  { %9041 = vmatprep.subr.bf16.mxu0 %v10334_v44  ;;  %v10343_v31 = vld [vmem:[#allocation10 + $0x98] sm:$0xff]  }
 0x4c5   :  { %v6602_v44 = vld [vmem:[#allocation9] sm:$0xf] }
 0x4c6   :  { %7765 = vmatpush1.bf16.msra.mxu1 %v10236_v38  ;;  %v10319_v38 = vld [vmem:[#allocation7 + $0x5ec] ss:$16 sps:$4 sm:$0xff]  }
 0x4c7   :  { %7766 = vmatprep.subr.bf16.mxu1 %v10241_v22  ;;  %9042 = vmatpush3.bf16.msra.mxu0 %v10335_v32  ;;  %v10336_v22 = vld [vmem:[#allocation10 + $0xc0] sm:$0xff]   ;;  %v10346_v32 = vld [vmem:[#allocation10 + $0xe8] sm:$0xff]  }
 0x4ca   :  { %7767 = vmatpush1.bf16.msra.mxu1 %v10239_v33  ;;  %v10337_v33 = vld [vmem:[#allocation10 + $0x80] sm:$0xff]  }
 0x4cb   :  { %7768 = vmatprep.subr.bf16.mxu1 %v10244_v15  ;;  %v10338_v15 = vld [vmem:[#allocation10 + $0xc8] sm:$0xff]  }
 0x4ce   :  { %7769 = vmatpush1.bf16.msra.mxu1 %v10242_v39  ;;  %v10340_v39 = vld [vmem:[#allocation10 + $0xd0] sm:$0xff]  }
 0x4cf   :  { %7770 = vmatprep.subr.bf16.mxu1 %v10247_v36  ;;  %v10342_v36 = vld [vmem:[#allocation10 + $0xd8] sm:$0xff]  }
 0x4d2   :  { %7771 = vmatpush1.bf16.msra.mxu1 %v10245_v12  ;;  %v10344_v12 = vld [vmem:[#allocation10 + $0xe0] sm:$0xff]  }
 0x4d3   :  { %7772 = vmatprep.subr.bf16.mxu1 %v10250_v51  ;;  %v10345_v51 = vld [vmem:[#allocation10 + $0xa0] sm:$0xff]  }
 0x4d6   :  { %7773 = vmatpush1.bf16.msra.mxu1 %v10248_v45  ;;  %v6607_v45 = vrot.slane %v6602_v44, %v11441_v47  ;;  %v10347_v47 = vld [vmem:[#allocation10 + $0xa8] sm:$0xff]  }
 0x4d7   :  { %7774 = vmatprep.subr.bf16.mxu1 %v10253_v48 }
 0x4da   :  { %7775 = vmatpush1.bf16.msra.mxu1 %v10251_v46 }
 0x4db   :  { %7776 = vmatprep.subr.bf16.mxu1 %v10256_v18 }
 0x4de   :  { %7777 = vmatpush1.bf16.msra.mxu1 %v10254_v28 }
 0x4df   :  { %7778 = vmatprep.subr.bf16.mxu1 %v10259_v35 }
 0x4e2   :  { %7779 = vmatpush1.bf16.msra.mxu1 %v10257_v52 }
 0x4e3   :  { %7780 = vmatprep.subr.bf16.mxu1 %v10262_v11 }
 0x4e6   :  { %7781 = vmatpush1.bf16.msra.mxu1 %v10260_v30 }
 0x4e7   :  { %7782 = vmatprep.subr.bf16.mxu1 %v10265_v63 }
 0x4ea   :  { %7783 = vmatpush1.bf16.msra.mxu1 %v10263_v40 }
 0x4eb   :  { %7784 = vmatprep.subr.bf16.mxu1 %v10268_v17 }
 0x4ee   :  { %7785 = vmatpush1.bf16.msra.mxu1 %v10266_v21 }
 0x4ef   :  { %7786 = vmatprep.subr.bf16.mxu1 %v10271_v60 }
 0x4f2   :  { %7787 = vmatpush1.bf16.msra.mxu1 %v10269_v41 }
 0x4f3   :  { %7799 = vmatprep.subr.bf16.mxu1 %v10274_v56  ;;  %v10349_v56 = vld [vmem:[#allocation10 + $0xb0] sm:$0xff]  }
 0x4f5   :  { %7789 = vmatmul.mubr.bf16.vlgmr.msra.gmra.mrb[8].mxu1 %v11960_v57  ;;  %v10287_v57 = vld [vmem:[#allocation7 + $0x4a8] ss:$16 sps:$4 sm:$0xff]  }
 0x4f6   :  { %7800 = vmatpush1.bf16.msra.mxu1 %v10272_v10  ;;  %7831 = vmatprep.mubr.bf16.mxu1 %v11987_v29  ;;  %v10290_v29 = vld [vmem:[#allocation7 + $0x4c8] ss:$16 sps:$4 sm:$0xff]   ;;  %v10350_v10 = vld [vmem:[#allocation10 + $0xf8] sm:$0xff]  }
 0x4f7   :  { %7801 = vmatprep.subr.bf16.mxu1 %v10277_v23  ;;  %v10351_v23 = vld [vmem:[#allocation10 + $0xb8] sm:$0xff]  }
 0x4fa   :  { %7802 = vmatpush1.bf16.msra.mxu1 %v10275_v24  ;;  %v6615_v24 = vrot.slane %v6602_v44, %v12036_v6 }
 0x4fb   :  { %7803 = vmatprep.subr.bf16.mxu1 %v10280_v5  ;;  %v6619_v5 = vrot.slane %v6602_v44, %v12037_v8 }
 0x4fe   :  { %7804 = vmatpush1.bf16.msra.mxu1 %v10278_v37 }
 0x4ff   :  { %7805 = vmatprep.subr.bf16.mxu1 %v10283_v19 }
 0x502   :  { %7806 = vmatpush1.bf16.msra.mxu1 %v10281_v7 }
 0x503   :  { %7807 = vmatprep.subr.bf16.mxu1 %v10286_v13 }
 0x506   :  { %7808 = vmatpush1.bf16.msra.mxu1 %v10284_v42 }
 0x507   :  { %7809 = vmatprep.subr.bf16.mxu1 %v10289_v26 }
 0x50a   :  { %7810 = vmatpush1.bf16.msra.mxu1 %v10287_v57 }
 0x50b   :  { %7811 = vmatprep.subr.bf16.mxu1 %v10292_v34 }
 0x50e   :  { %7812 = vmatpush1.bf16.msra.mxu1 %v10290_v29 }
 0x50f   :  { %7813 = vmatprep.subr.bf16.mxu1 %v10295_v14 }
 0x512   :  { %7814 = vmatpush1.bf16.msra.mxu1 %v10293_v59 }
 0x513   :  { %7815 = vmatprep.subr.bf16.mxu1 %v10298_v27 }
 0x516   :  { %7816 = vmatpush1.bf16.msra.mxu1 %v10296_v20 }
 0x517   :  { %7817 = vmatprep.subr.bf16.mxu1 %v10301_v50 }
 0x51a   :  { %7818 = vmatpush1.bf16.msra.mxu1 %v10299_v55 }
 0x51b   :  { %7819 = vmatprep.subr.bf16.mxu1 %v10304_v49 }
 0x51e   :  { %7820 = vmatpush1.bf16.msra.mxu1 %v10302_v58 }
 0x51f   :  { %7821 = vmatprep.subr.bf16.mxu1 %v10307_v16 }
 0x522   :  { %7822 = vmatpush1.bf16.msra.mxu1 %v10305_v3  ;;  %v8985_v3 = vld [vmem:[#allocation12] ss:$0 sm:$0xff] }
 0x523   :  { %7823 = vmatprep.subr.bf16.mxu1 %v10310_v1 }
 0x526   :  { %7824 = vmatpush1.bf16.msra.mxu1 %v10308_v54 }
 0x527   :  { %7825 = vmatprep.subr.bf16.mxu1 %v10313_v62 }
 0x52a   :  { %7826 = vmatpush1.bf16.msra.mxu1 %v10311_v4 }
 0x52b   :  { %7827 = vmatprep.subr.bf16.mxu1 %v10316_v61 }
 0x52e   :  { %7828 = vmatpush1.bf16.msra.mxu1 %v10314_v9 }
 0x52f   :  { %7829 = vmatprep.subr.bf16.mxu1 %v10319_v38 }
 0x532   :  { %7830 = vmatpush1.bf16.msra.mxu1 %v10317_v25 }
 0x533   :  { %9049 = vmatprep.subr.bf16.mxu1 %v10336_v22 }
 0x535   :  { %7832 = vmatmul.mubr.bf16.vlgmr.msra.gmra.mrb[8].mxu1 %v11985_v43  ;;  %v6611_v43 = vrot.slane %v6602_v44, %v12038_v53  ;;  %v10348_v53 = vld [vmem:[#allocation10 + $0xf0] sm:$0xff]  }
 0x536   :  { %9050 = vmatpush3.bf16.msra.mxu1 %v10337_v33 }
 0x537   :  { %9051 = vmatprep.subr.bf16.mxu1 %v10338_v15 }
 0x53a   :  { %9052 = vmatpush3.bf16.msra.mxu1 %v10339_v0 }
 0x53b   :  { %9053 = vmatprep.subr.bf16.mxu1 %v10340_v39 }
 0x53e   :  { %9054 = vmatpush3.bf16.msra.mxu1 %v10341_v2 }
 0x53f   :  { %9055 = vmatprep.subr.bf16.mxu1 %v10342_v36 }
 0x542   :  { %9056 = vmatpush3.bf16.msra.mxu1 %v10343_v31 }
 0x543   :  { %9057 = vmatprep.subr.bf16.mxu1 %v10344_v12 }
 0x546   :  { %9058 = vmatpush3.bf16.msra.mxu1 %v10345_v51 }
 0x547   :  { %9059 = vmatprep.subr.bf16.mxu1 %v10346_v32 }
 0x548   :  { %v7704_v48 = vpop.f32.mrb[4].mxu1 }
 0x549   :  { %v9071_v46 = vadd.f32 %v7704_v48, %v6607_v45  ;;  %v7706_v18 = vpop.f32.mrb[5].mxu1 }
 0x54a   :  { %v9072_v28 = vadd.f32 %v7706_v18, %v6611_v43  ;;  %v7708_v35 = vpop.f32.mrb[6].mxu1  ;;  %9060 = vmatpush3.bf16.msra.mxu1 %v10347_v47 }
 0x54b   :  { %v9073_v52 = vadd.f32 %v7708_v35, %v6607_v45  ;;  %v7710_v11 = vpop.f32.mrb[7].mxu1  ;;  %v7842_v63 = vmax.f32 %v9071_v46, 0.0  ;;  %9061 = vmatprep.subr.bf16.mxu1 %v10348_v53 }
 0x54c   :  { %v9074_v30 = vadd.f32 %v7710_v11, %v6611_v43  ;;  %v7843_v17 = vmax.f32 %v9072_v28, 0.0 }
 0x54d   :  { %v7846_v40 = vmax.f32 %v9073_v52, 0.0 }
 0x54e   :  { %v7847_v21 = vmax.f32 %v9074_v30, 0.0  ;;  %9062 = vmatpush3.bf16.msra.mxu1 %v10349_v56 }
 0x54f   :  { %v7850_v60 = vpack.c.bf16 %v7846_v40, %v7842_v63  ;;  %9063 = vmatprep.subr.bf16.mxu1 %v10350_v10 }
 0x550   :  { %v7851_v41 = vpack.c.bf16 %v7847_v21, %v7843_v17 }
 0x552   :  { %8149 = vmatprep.mubr.bf16.mxu0 %v7851_v41  ;;  %9064 = vmatpush3.bf16.msra.mxu1 %v10351_v23 }
 0x553   :  { %8150 = vmatmul.mubr.bf16.vlgmr.msra.gmra.mrb[8].mxu0 %v7850_v60 }
 0x608   :  { %v7833_v37 = vpop.f32.mrb[8].mxu1 }
 0x609   :  { %v9075_v19 = vadd.f32 %v7833_v37, %v6615_v24  ;;  %v7835_v7 = vpop.f32.mrb[9].mxu1 }
 0x60a   :  { %v9076_v13 = vadd.f32 %v7835_v7, %v6619_v5  ;;  %v7837_v42 = vpop.f32.mrb[10].mxu1 }
 0x60b   :  { %v9077_v26 = vadd.f32 %v7837_v42, %v6615_v24  ;;  %v7839_v57 = vpop.f32.mrb[11].mxu1  ;;  %v7844_v29 = vmax.f32 %v9075_v19, 0.0 }
 0x60c   :  { %v9078_v34 = vadd.f32 %v7839_v57, %v6619_v5  ;;  %v7845_v59 = vmax.f32 %v9076_v13, 0.0 }
 0x60d   :  { %v7848_v14 = vmax.f32 %v9077_v26, 0.0 }
 0x60e   :  { %v7849_v27 = vmax.f32 %v9078_v34, 0.0 }
 0x60f   :  { %v7852_v20 = vpack.c.bf16 %v7848_v14, %v7844_v29 }
 0x610   :  { %v7853_v50 = vpack.c.bf16 %v7849_v27, %v7845_v59 }
 0x612   :  { %8190 = vmatprep.mubr.bf16.mxu1 %v7853_v50 }
 0x613   :  { %8191 = vmatmul.mubr.bf16.vlgmr.msra.gmra.mrb[12].mxu1 %v7852_v20 }
 0x626   :  { %v9043_v55 = vpop.f32.mrb[8].mxu0 }
 0x627   :  { %v9044_v6 = vpop.f32.mrb[9].mxu0 }
 0x628   :  { %v9045_v49 = vadd.f32 %v9044_v6, %v9043_v55  ;;  %v9046_v8 = vpop.f32.mrb[10].mxu0 }
 0x629   :  { %v9047_v58 = vpop.f32.mrb[11].mxu0 }
 0x62a   :  { %v9048_v16 = vadd.f32 %v9047_v58, %v9046_v8  ;;  %v8152_v62 = vadd.f32 %v9045_v49, %v8985_v3 }
 0x62c   :  { %v8155_v38 = vadd.f32 %v9048_v16, %v8985_v3 }
 0x6e6   :  { %v9065_v1 = vpop.f32.mrb[12].mxu1 }
 0x6e7   :  { %v9066_v54 = vpop.f32.mrb[13].mxu1 }
 0x6e8   :  { %v9067_v4 = vadd.f32 %v9066_v54, %v9065_v1  ;;  %v9068_v61 = vpop.f32.mrb[14].mxu1 }
 0x6e9   :  { %v9069_v9 = vpop.f32.mrb[15].mxu1 }
 0x6ea   :  { %v8193_v25 = vadd.f32 %v9067_v4, %v8152_v62  ;;  %v9070_v22 = vadd.f32 %v9069_v9, %v9068_v61 }
 0x6ec   :  { %v8196_v33 = vadd.f32 %v9070_v22, %v8155_v38 }
 0x6ee   :  { %v9025_v15 = vpack.c.bf16 %v8196_v33, %v8193_v25 }
 0x6f0   :  { %9026 = vst [vmem:[%s12012_s8] sm:$0xff] %v9025_v15  }
 0x6f1   :  { %8213 = vsyncpa [#allocation3], 1 }
 0x6f2   :  { %8214 = vsyncpa [#allocation5], 1 }
 0x6f3   :  { %8215 = vsyncpa [#allocation8], 1 }
 0x6f4   :  { %8216 = vsyncpa [#allocation11], 1 }

</bundles_post_ra>
